<compile_context>
chip_gen: v7x
topology: tpu7x:2x2x1
jax: 0.10.0
libtpu: 0.0.40
codegen_flags: <defaults>
</compile_context>

<pallas_src>
import functools

import jax
import jax.numpy as jnp
from jax.experimental import pallas as pl
from jax.experimental.pallas import tpu as pltpu


def _round_up(n, m):
    return ((n + m - 1) // m) * m


def src_embed_kernel(x_ref, w_ref, b_ref, a2_ref, b2_ref, o_ref, *, eps):
    # Linear: x @ W (W pre-transposed to [in, out]); f32 accumulation on MXU.
    h = jnp.dot(x_ref[...], w_ref[...], preferred_element_type=jnp.float32)
    h = h + b_ref[...]                                    # (1, D) broadcast

    # Custom LayerNorm, matching the PyTorch module exactly:
    #   a_2 * (h - mean) / (std + eps) + b_2
    # with UNBIASED std (divide by D-1) and eps added to std (not to var).
    d = h.shape[-1]
    mean = jnp.mean(h, axis=-1, keepdims=True)
    centered = h - mean
    var = jnp.sum(centered * centered, axis=-1, keepdims=True) * (1.0 / (d - 1))
    denom = jnp.sqrt(var) + eps
    # EUP approximate reciprocal + one Newton-Raphson step (~f32 accurate);
    # both act on a tiny (tb, 1) column, so VALU cost is negligible.
    inv = pl.reciprocal(denom, approx=True)
    inv = inv * (2.0 - denom * inv)
    o = a2_ref[...] * (centered * inv) + b2_ref[...]
    o_ref[...] = o.astype(o_ref.dtype)


def _pick_batch_tile(B, IN, D, x_itemsize, *, block_b, min_steps,
                     vmem_budget_bytes):
    """Batch tile: multiple of 8 sublanes, as large as possible (big tiles
    amortize the ~0.35us per-step pipeline overhead on this HBM-bound kernel),
    subject to:
      * tb <= block_b,
      * the grid keeps >= min_steps steps when B allows (>= 2 steps per
        TensorCore on v7x so megacore sharding + double-buffering both work),
      * double-buffered x tile + resident (single-buffered) W + double-buffered
        lane-padded out tile fit a conservative VMEM budget.
    """
    tb = min(block_b, _round_up(B, 8))
    if B > min_steps * 8:
        tb = min(tb, _round_up(pl.cdiv(B, min_steps), 8))

    d_pad = _round_up(D, 128)                       # lane padding of last dim
    w_bytes = _round_up(IN, 8) * d_pad * x_itemsize  # W, single-buffered
    fixed = w_bytes + 3 * (8 * d_pad * 4)            # + bias / a_2 / b_2 (f32)
    per_row = 2 * IN * x_itemsize + 2 * d_pad * 4    # x dbl-buf + out dbl-buf
    budget_tb = (vmem_budget_bytes - fixed) // per_row
    tb = min(tb, max(8, (budget_tb // 8) * 8))
    return max(tb, 8)


def src_embed_forward(x, w, b, a2, b2, *, eps=1e-6, block_b=512, min_steps=4,
                      out_dtype=None, vmem_budget_bytes=12 << 20):
    """SrcEmbed forward: custom-LayerNorm(Linear(x)).

    x  : [B, IN]   (f32 or bf16 -- NOT cast here; a wrapper-side astype would
                    be an extra full HBM pass over x, strictly worse than
                    DMAing the original dtype once)
    w  : [IN, D]   (pre-transposed Linear weight; tiny, cast to x.dtype)
    b, a2, b2 : [D]
    """
    B, IN = x.shape
    D = w.shape[1]
    if out_dtype is None:
        out_dtype = x.dtype

    if w.dtype != x.dtype:
        w = w.astype(x.dtype)               # tiny one-time cast; fine

    # Epilogue params stay f32.
    b_2d = b.reshape(1, D).astype(jnp.float32)
    a2_2d = a2.reshape(1, D).astype(jnp.float32)
    b2_2d = b2.reshape(1, D).astype(jnp.float32)

    tb = _pick_batch_tile(B, IN, D, x.dtype.itemsize, block_b=block_b,
                          min_steps=min_steps,
                          vmem_budget_bytes=vmem_budget_bytes)
    grid = (pl.cdiv(B, tb),)   # ragged final block handled by Pallas (no jnp.pad)

    resident = dict(pipeline_mode=pl.Buffered(1))   # fetched once, 1 buffer

    out = pl.pallas_call(
        functools.partial(src_embed_kernel, eps=eps),
        out_shape=jax.ShapeDtypeStruct((B, D), out_dtype),
        grid_spec=pl.GridSpec(
            grid=grid,
            in_specs=[
                pl.BlockSpec((tb, IN), lambda i: (i, 0)),             # x: batch-tiled, dbl-buffered
                pl.BlockSpec((IN, D), lambda i: (0, 0), **resident),  # W: resident in VMEM
                pl.BlockSpec((1, D), lambda i: (0, 0), **resident),   # Linear bias
                pl.BlockSpec((1, D), lambda i: (0, 0), **resident),   # LayerNorm gain a_2
                pl.BlockSpec((1, D), lambda i: (0, 0), **resident),   # LayerNorm shift b_2
            ],
            out_specs=pl.BlockSpec((tb, D), lambda i: (i, 0)),
        ),
        compiler_params=pltpu.CompilerParams(
            dimension_semantics=("parallel",),   # independent batch tiles; 2 TCs on v7x
        ),
        cost_estimate=pl.CostEstimate(
            flops=2 * B * IN * D,
            transcendentals=B,                   # one sqrt + one recip per row
            bytes_accessed=(B * IN * x.dtype.itemsize
                            + IN * D * w.dtype.itemsize
                            + B * D * jnp.dtype(out_dtype).itemsize),
        ),
    )(x, w, b_2d, a2_2d, b2_2d)
    return out


def _ref_forward(x, w, b, a2, b2, eps=1e-6):
    h = jnp.dot(x, w, preferred_element_type=jnp.float32) + b
    mean = h.mean(-1, keepdims=True)
    std = jnp.std(h, axis=-1, keepdims=True, ddof=1)    # unbiased, like torch.std
    return a2 * (h - mean) / (std + eps) + b2


if __name__ == "__main__":
    # Shapes from the module: input_dim = 1406, d_model = 20.
    input_dim = 1406
    d_model = 20
    batch = 1000        # multiple grid steps + a ragged final block

    key = jax.random.PRNGKey(0)
    kx, kw, kb, ka, kb2 = jax.random.split(key, 5)

    x = jax.random.normal(kx, (batch, input_dim), dtype=jnp.float32)
    # PyTorch Linear stores weight as [out, in]; we keep it pre-transposed [in, out].
    w = jax.random.normal(kw, (input_dim, d_model), dtype=jnp.float32) * 0.02
    b = jax.random.normal(kb, (d_model,), dtype=jnp.float32) * 0.1
    a2 = 1.0 + 0.1 * jax.random.normal(ka, (d_model,), dtype=jnp.float32)
    b2 = 0.1 * jax.random.normal(kb2, (d_model,), dtype=jnp.float32)

    # f32 path.
    out = jax.block_until_ready(src_embed_forward(x, w, b, a2, b2))
    ref = _ref_forward(x, w, b, a2, b2)
    assert out.shape == (batch, d_model) and out.dtype == jnp.float32
    assert jnp.allclose(out, ref, atol=1e-3, rtol=1e-3), "f32 path mismatch"

    # Natively-bf16 activations (no wrapper cast): x DMA bytes halve in-kernel.
    x_bf16 = x.astype(jnp.bfloat16)   # stands in for an upstream bf16 producer
    out_bf16 = jax.block_until_ready(src_embed_forward(x_bf16, w, b, a2, b2))
    ref_bf16 = _ref_forward(x_bf16, w.astype(jnp.bfloat16), b, a2, b2)
    assert out_bf16.shape == (batch, d_model) and out_bf16.dtype == jnp.bfloat16
    assert jnp.allclose(out_bf16.astype(jnp.float32), ref_bf16,
                        atol=3e-2, rtol=3e-2), "bf16 path mismatch"

    print("KERNEL_OK")
</pallas_src>

<mosaic_0001>
module attributes {stable_mosaic.version = 11 : i64} {
  func.func @src_embed_kernel(%arg0: i32, %arg1: memref<256x1406xf32, #tpu.memory_space<vmem>>, %arg2: memref<1406x20xf32, #tpu.memory_space<vmem>>, %arg3: memref<1x20xf32, #tpu.memory_space<vmem>>, %arg4: memref<1x20xf32, #tpu.memory_space<vmem>>, %arg5: memref<1x20xf32, #tpu.memory_space<vmem>>, %arg6: memref<256x20xf32, #tpu.memory_space<vmem>>) attributes {dimension_semantics = [#tpu.dimension_semantics<parallel>], iteration_bounds = array<i64: 4>, scalar_prefetch = 0 : i64, scratch_operands = 0 : i64, tpu.core_type = #tpu.core_type<tc>, window_params = [{transform_indices = @transform_0, window_bounds = array<i64: 256, 1406>}, {pipeline_mode = #tpu.pipeline_mode<synchronous>, transform_indices = @transform_1, window_bounds = array<i64: 1406, 20>}, {pipeline_mode = #tpu.pipeline_mode<synchronous>, transform_indices = @transform_2, window_bounds = array<i64: 1, 20>}, {pipeline_mode = #tpu.pipeline_mode<synchronous>, transform_indices = @transform_3, window_bounds = array<i64: 1, 20>}, {pipeline_mode = #tpu.pipeline_mode<synchronous>, transform_indices = @transform_4, window_bounds = array<i64: 1, 20>}, {transform_indices = @transform_5, window_bounds = array<i64: 256, 20>}]} {
    %c0 = arith.constant 0 : index
    %c0_0 = arith.constant 0 : index
    %0 = vector.load %arg1[%c0, %c0_0] : memref<256x1406xf32, #tpu.memory_space<vmem>>, vector<256x1406xf32>
    %c0_1 = arith.constant 0 : index
    %c0_2 = arith.constant 0 : index
    %1 = vector.load %arg2[%c0_1, %c0_2] : memref<1406x20xf32, #tpu.memory_space<vmem>>, vector<1406x20xf32>
    %cst = arith.constant dense<0.000000e+00> : vector<256x20xf32>
    %2 = tpu.matmul %0, %1, %cst {dimension_numbers = #tpu.dot_dimension_numbers<[1], [0], [0], [1], [0, 0, 1, 1], [], []>} : vector<256x1406xf32>, vector<1406x20xf32>, vector<256x20xf32> -> vector<256x20xf32>
    %c0_3 = arith.constant 0 : index
    %c0_4 = arith.constant 0 : index
    %3 = vector.load %arg3[%c0_3, %c0_4] : memref<1x20xf32, #tpu.memory_space<vmem>>, vector<1x20xf32>
    %4 = vector.broadcast %3 : vector<1x20xf32> to vector<256x20xf32>
    %5 = arith.addf %2, %4 : vector<256x20xf32>
    %cst_5 = arith.constant dense<0.000000e+00> : vector<256xf32>
    %6 = vector.multi_reduction <add>, %5, %cst_5 [1] : vector<256x20xf32> to vector<256xf32>
    %7 = vector.shape_cast %6 : vector<256xf32> to vector<256x1xf32>
    %cst_6 = arith.constant 2.000000e+01 : f32
    %8 = vector.broadcast %cst_6 : f32 to vector<256x1xf32>
    %9 = arith.divf %7, %8 : vector<256x1xf32>
    %10 = vector.broadcast %9 : vector<256x1xf32> to vector<256x20xf32>
    %11 = arith.subf %5, %10 : vector<256x20xf32>
    %12 = arith.mulf %11, %11 : vector<256x20xf32>
    %cst_7 = arith.constant dense<0.000000e+00> : vector<256xf32>
    %13 = vector.multi_reduction <add>, %12, %cst_7 [1] : vector<256x20xf32> to vector<256xf32>
    %14 = vector.shape_cast %13 : vector<256xf32> to vector<256x1xf32>
    %cst_8 = arith.constant 0.0526315793 : f32
    %15 = vector.broadcast %cst_8 : f32 to vector<256x1xf32>
    %16 = arith.mulf %14, %15 : vector<256x1xf32>
    %17 = math.sqrt %16 : vector<256x1xf32>
    %cst_9 = arith.constant 9.99999997E-7 : f32
    %18 = vector.broadcast %cst_9 : f32 to vector<256x1xf32>
    %19 = arith.addf %17, %18 : vector<256x1xf32>
    %20 = tpu.reciprocal %19 {approx = true} : vector<256x1xf32> -> vector<256x1xf32>
    %21 = arith.mulf %19, %20 : vector<256x1xf32>
    %cst_10 = arith.constant 2.000000e+00 : f32
    %22 = vector.broadcast %cst_10 : f32 to vector<256x1xf32>
    %23 = arith.subf %22, %21 : vector<256x1xf32>
    %24 = arith.mulf %20, %23 : vector<256x1xf32>
    %c0_11 = arith.constant 0 : index
    %c0_12 = arith.constant 0 : index
    %25 = vector.load %arg4[%c0_11, %c0_12] : memref<1x20xf32, #tpu.memory_space<vmem>>, vector<1x20xf32>
    %26 = vector.broadcast %24 : vector<256x1xf32> to vector<256x20xf32>
    %27 = arith.mulf %11, %26 : vector<256x20xf32>
    %28 = vector.broadcast %25 : vector<1x20xf32> to vector<256x20xf32>
    %29 = arith.mulf %28, %27 : vector<256x20xf32>
    %c0_13 = arith.constant 0 : index
    %c0_14 = arith.constant 0 : index
    %30 = vector.load %arg5[%c0_13, %c0_14] : memref<1x20xf32, #tpu.memory_space<vmem>>, vector<1x20xf32>
    %31 = vector.broadcast %30 : vector<1x20xf32> to vector<256x20xf32>
    %32 = arith.addf %29, %31 : vector<256x20xf32>
    %c0_15 = arith.constant 0 : index
    %c0_16 = arith.constant 0 : index
    %33 = vector.load %arg6[%c0_15, %c0_16] : memref<256x20xf32, #tpu.memory_space<vmem>>, vector<256x20xf32>
    tpu.vector_store %arg6[%c0_15, %c0_16], %32 {strides = array<i32>} : memref<256x20xf32, #tpu.memory_space<vmem>>, vector<256x20xf32>,
    return
  }
  func.func @transform_0(%arg0: i32) -> (i32, i32) {
    %c0_i32 = arith.constant 0 : i32
    %c0_i32_0 = arith.constant 0 : i32
    return %arg0, %c0_i32 : i32, i32
  }
  func.func @transform_1(%arg0: i32) -> (i32, i32) {
    %c0_i32 = arith.constant 0 : i32
    %c0_i32_0 = arith.constant 0 : i32
    %c0_i32_1 = arith.constant 0 : i32
    return %c0_i32, %c0_i32_0 : i32, i32
  }
  func.func @transform_2(%arg0: i32) -> (i32, i32) {
    %c0_i32 = arith.constant 0 : i32
    %c0_i32_0 = arith.constant 0 : i32
    %c0_i32_1 = arith.constant 0 : i32
    return %c0_i32, %c0_i32_0 : i32, i32
  }
  func.func @transform_3(%arg0: i32) -> (i32, i32) {
    %c0_i32 = arith.constant 0 : i32
    %c0_i32_0 = arith.constant 0 : i32
    %c0_i32_1 = arith.constant 0 : i32
    return %c0_i32, %c0_i32_0 : i32, i32
  }
  func.func @transform_4(%arg0: i32) -> (i32, i32) {
    %c0_i32 = arith.constant 0 : i32
    %c0_i32_0 = arith.constant 0 : i32
    %c0_i32_1 = arith.constant 0 : i32
    return %c0_i32, %c0_i32_0 : i32, i32
  }
  func.func @transform_5(%arg0: i32) -> (i32, i32) {
    %c0_i32 = arith.constant 0 : i32
    %c0_i32_0 = arith.constant 0 : i32
    return %arg0, %c0_i32 : i32, i32
  }
}

</mosaic_0001>

<bundles_post_ra>
// kernel: tpu_custom_call.1
= control target key start
LH: loop header
LB: loop body
LE: loop exit
PB: predicated region body
PF: predicated region fallthrough
CT: control target
= control target key end

     0   :  { %10 = vsyncpa [#allocation3], 0  ;;  %s7275_s0 = inlined_call_operand.hbm [shape: f32[1000,1406], index: 0, kind: input, shape index: {}]   ;;  %s7276_s1 = inlined_call_operand.vmem [shape: f32[1406,20], index: 1, kind: input, shape index: {}]   ;;  %s7277_s2 = inlined_call_operand.hbm [shape: f32[1,20], index: 2, kind: input, shape index: {}]   ;;  %s7278_s3 = inlined_call_operand.hbm [shape: f32[1,20], index: 3, kind: input, shape index: {}]   ;;  %s7279_s4 = inlined_call_operand.hbm [shape: f32[1,20], index: 4, kind: input, shape index: {}]   ;;  %s7280_s5 = inlined_call_operand.vmem [shape: f32[1000,20], index: 5, kind: output, shape index: {}]  }
   0x1   :  { %12 = vsyncpa [#allocation3 + $0x1], 0 }
   0x2   :  { %13 = vsyncpa [#allocation5], 0 }
   0x3   :  { %14 = vsyncpa [#allocation8], 0  ;;  %s4795_s18 = smov 0   ;;  %s4797_s19 = smov 0  }
   0x4   :  { %s4799_s20 = smov 0   ;;  %s4801_s21 = smov 0  }
   0x5 LB: > { %s4814_s22 = sadd.s32 4294967295, %s4723_s21   ;;  %s4817_s23 = sadd.s32 1, %s4723_s21   ;;  %s4723_s21 = sphi %s4801_s21, %s7306_s21   ;;  %s4719_s20 = sphi %s4799_s20, %s7305_s20   ;;  %s4715_s19 = sphi %s4797_s19, %s7304_s19   ;;  %s4711_s18 = sphi %s4795_s18, %s7303_s18  }
   0x6   : > { %s24_s24 = ssub.s32 %s4723_s21, %s4817_s23  ;;  %s27_s25 = sadd.s32 1, %s4719_s20 }
   0x7   : > { %p25_p0 = scmp.eq.s32.totalorder %s24_s24, 0  ;;  %p34_p1 = scmp.ne.s32.totalorder %s4719_s20, %s4715_s19 }
   0x8   : > { %p35_p2 = scmp.eq.s32.totalorder %s4723_s21, 0  ;;  %p40_p3 = scmp.ne.s32.totalorder %s4715_s19, %s4711_s18 }
   0x9   : > { %s4827_s26 = scalar_select %p25_p0, %s4719_s20, %s27_s25  }
   0xa   : > { %p4829_p4 = por %p35_p2, %p34_p1  ;;  %p7281_p5 = scmp.eq.s32.totalorder %s4814_s22, 0 }
   0xb   : > { %p148_p6 = scmp.eq.s32.totalorder %s4814_s22, 3  ;;  %p3510_p7 = scmp.ge.s32.totalorder %s4723_s21, 1 }
   0xc   : > { %s7284_s27 = scalar_select %p4829_p4, 1, 0 }
   0xd   : > { %p4838_p8 = por %p7281_p5, %p40_p3  ;;  %p161_p9 = scmp.lt.s32.totalorder %s4723_s21, 5 }
   0xe   : > { %p4843_p10 = por %p148_p6, %p34_p1  ;;  %s4757_s6 = smov [#allocation4]  }
   0xf   : > { %s7285_s28 = scalar_select %p4838_p8, 1, 0 }
  0x10   : > { %s7286_s29 = scalar_select %p4843_p10, 1, 0 }
  0x11   : > { %p4847_p11 = pnand %p3510_p7, %p161_p9  ;;  %s177_s7 = sshll.u32 %s4757_s6, 4  ;;  %s178_s7 = int_to_ptr.vmem [resolvable:$true] %s177_s7 }
  0x12   : > { %s4758_s8 = smov [#allocation6]   ;;  %s4759_s11 = smov [#allocation7]  }
  0x13   : > { %s7287_s30 = scalar_select %p4847_p11, 1, 0 }
  0x14   : > { %p4289_p12 = pneg %p4847_p11  ;;  %s188_s9 = sshll.u32 %s4758_s8, 4  ;;  %s4859_s9 = int_to_ptr.vmem [resolvable:$true] %s188_s9 }
  0x15   : > { %s199_s12 = sshll.u32 %s4759_s11, 4  ;;  %s4537_s15 = scalar_lea.hbm %s7277_s2, 16  ;;  %s4861_s12 = int_to_ptr.vmem [resolvable:$true] %s199_s12 }
  0x16   : > { %p4855_p13 = pnand %p4289_p12, %p7281_p5  ;;  %p4538_p0 = scmp.ne.s32.totalorder %s7277_s2, %s4537_s15 }
  0x17   : > { %p4544_p6 = scmp.lt.u32.totalorder %s4537_s15, %s7277_s2 }
  0x18   : > { %p4871_p1 = pneg %p4855_p13 }
  0x1a   : > { %p4540_p2 = pnand %p4871_p1, %p4538_p0 }
  0x1c   : > { %p4541_p3 = pneg %p4540_p2 }
  0x1e   : > { %p4546_p7 = pnand %p4544_p6, %p4541_p3 }
  0x20   : > { %4549 = shalt.err (!%p4546_p7)
}
  0x21   : > { %s4550_s6 = scalar_lea.vmem %s178_s7, 16  ;;  %s4557_s8 = scalar_lea.vmem %s178_s7, 32 }
  0x22   : > { %p4551_p9 = scmp.ne.s32.totalorder %s178_s7, %s4550_s6  ;;  %p4558_p10 = scmp.lt.s32.totalorder %s178_s7, %s178_s7 }
  0x23   : > { %p4559_p8 = scmp.lt.s32.totalorder %s4557_s8, %s4550_s6 }
  0x24   : > { %p4553_p12 = pnand %p4551_p9, %p4871_p1 }
  0x25   : > { %p4560_p11 = por %p4559_p8, %p4558_p10 }
  0x26   : > { %p4554_p5 = pneg %p4553_p12 }
  0x28   : > { %p4561_p4 = pnand %p4560_p11, %p4554_p5 }
  0x2a   : > { %4564 = shalt.err (!%p4561_p4)
}
  0x2b   : > { %4292 = dma.hbm_to_vmem [thread:$0]  (!%p4855_p13), %s7277_s2, 16, %s178_s7, [#allocation5]  }
  0x2c   : > { %s4565_s16 = scalar_lea.hbm %s7278_s3, 16 }
  0x2d   : > { %p4566_p0 = scmp.ne.s32.totalorder %s7278_s3, %s4565_s16  ;;  %p4572_p4 = scmp.lt.u32.totalorder %s4565_s16, %s7278_s3 }
  0x2f   : > { %p4568_p2 = pnand %p4566_p0, %p4871_p1 }
  0x31   : > { %p4569_p8 = pneg %p4568_p2 }
  0x33   : > { %p4574_p5 = pnand %p4572_p4, %p4569_p8 }
  0x35   : > { %4577 = shalt.err (!%p4574_p5)
}
  0x36   : > { %s4578_s7 = scalar_lea.vmem %s4859_s9, 16  ;;  %s4585_s8 = scalar_lea.vmem %s4859_s9, 32 }
  0x37   : > { %p4579_p10 = scmp.ne.s32.totalorder %s4859_s9, %s4578_s7  ;;  %p4586_p6 = scmp.lt.s32.totalorder %s4859_s9, %s4859_s9 }
  0x38   : > { %p4587_p7 = scmp.lt.s32.totalorder %s4585_s8, %s4578_s7 }
  0x39   : > { %p4581_p11 = pnand %p4579_p10, %p4871_p1 }
  0x3a   : > { %p4588_p9 = por %p4587_p7, %p4586_p6 }
  0x3b   : > { %p4582_p3 = pneg %p4581_p11 }
  0x3d   : > { %p4589_p12 = pnand %p4588_p9, %p4582_p3 }
  0x3f   : > { %4592 = shalt.err (!%p4589_p12)
}
  0x40   : > { %4295 = dma.hbm_to_vmem [thread:$0]  (!%p4855_p13), %s7278_s3, 16, %s4859_s9, [#allocation5]  }
  0x41   : > { %s4593_s16 = scalar_lea.hbm %s7279_s4, 16 }
  0x42   : > { %p4594_p0 = scmp.ne.s32.totalorder %s7279_s4, %s4593_s16  ;;  %p4600_p4 = scmp.lt.u32.totalorder %s4593_s16, %s7279_s4 }
  0x44   : > { %p4596_p2 = pnand %p4594_p0, %p4871_p1 }
  0x46   : > { %p4597_p8 = pneg %p4596_p2 }
  0x48   : > { %p4602_p5 = pnand %p4600_p4, %p4597_p8 }
  0x4a   : > { %4605 = shalt.err (!%p4602_p5)
}
  0x4b   : > { %s4606_s9 = scalar_lea.vmem %s4861_s12, 16  ;;  %s4613_s7 = scalar_lea.vmem %s4861_s12, 32 }
  0x4c   : > { %p4607_p10 = scmp.ne.s32.totalorder %s4861_s12, %s4606_s9  ;;  %p4614_p6 = scmp.lt.s32.totalorder %s4861_s12, %s4861_s12 }
  0x4d   : > { %p4615_p7 = scmp.lt.s32.totalorder %s4613_s7, %s4606_s9 }
  0x4e   : > { %p4609_p11 = pnand %p4607_p10, %p4871_p1 }
  0x4f   : > { %p4616_p9 = por %p4615_p7, %p4614_p6 }
  0x50   : > { %p4610_p3 = pneg %p4609_p11 }
  0x52   : > { %p4617_p12 = pnand %p4616_p9, %p4610_p3 }
  0x54   : > { %4620 = shalt.err (!%p4617_p12)
}
  0x55   : > { %4298 = dma.hbm_to_vmem [thread:$0]  (!%p4855_p13), %s7279_s4, 16, %s4861_s12, [#allocation8]  }
  0x56   : > { %p3514_p0 = scmp.ge.s32.totalorder %s4723_s21, 4 }
  0x57   : > { %p7290_p1 = scmp.ne.s32.totalorder (!%p3514_p0), %s7284_s27, 0 }
  0x58   : > { %206 = sbr.rel (%p3514_p0) target bundleno = 131 (0x83), region = 32 }
  0x5f   : > { %209 = sbr.rel (!%p7290_p1) target bundleno = 131 (0x83), region = 36  ;;  %s210_s18 = sand.u32 (%p7290_p1), 1, %s4719_s20  }
  0x60   : > { %s3515_s13 = sshll.u32 (%p7290_p1), %s4723_s21, 5  ;;  %s4273_s14 = smul.u32 (%p7290_p1), 2816, %s210_s18 }
  0x61   : > { %s216_s15 = ssub.s32 (%p7290_p1), 125, %s3515_s13  ;;  %s4943_s17 = scalar_lea.sflag (%p7290_p1), [#allocation3], %s210_s18 }
  0x62   : > { %p217_p2 = scmp.lt.s32.totalorder (%p7290_p1), %s216_s15, 32  ;;  %s214_s12 = scalar_lea.vmem (%p7290_p1), [#allocation2], %s4273_s14 }
  0x66   : > { %s7308_s15 = smov (!%p217_p2, %s216_s15), 32 }
  0x67   : > { %s4940_s10 = smul.u32 1408, %s7308_s15 }
  0x69   : > { %s222_s16 = ssub.s32 45056, %s4940_s10 }
  0x6a   : > { %223 = vsyncadd %s4943_s17, %s222_s16  ;;  %p3518_p13 = scmp.ne.s32.totalorder %s4940_s10, 0  ;;  %s4274_s27 = smul.u32 45056, %s4723_s21 }
  0x6b   : > { %s229_s24 = sshll.u32 %s214_s12, 4  ;;  %s4625_s21 = scalar_lea.hbm %s7275_s0, 176000  ;;  %s4953_s24 = int_to_ptr.vmem [resolvable:$true] %s229_s24 }
  0x6c   : > { %s4951_s9 = scalar_lea.hbm %s7275_s0, %s4274_s27 }
  0x6d   : > { %s4621_s7 = scalar_lea.hbm %s4951_s9, %s4940_s10  ;;  %p4626_p10 = scmp.lt.u32.totalorder %s4951_s9, %s7275_s0 }
  0x6e   : > { %p4622_p8 = scmp.ne.s32.totalorder %s4951_s9, %s4621_s7  ;;  %p4627_p11 = scmp.lt.u32.totalorder %s4625_s21, %s4621_s7 }
  0x6f   : > { %p4629_p6 = scmp.lt.u32.totalorder %s4621_s7, %s4951_s9 }
  0x70   : > { %p4623_p4 = pnand %p4622_p8, %p3518_p13  ;;  %p4628_p3 = por %p4627_p11, %p4626_p10 }
  0x72   : > { %p4624_p5 = pneg %p4623_p4  ;;  %p4630_p7 = por %p4629_p6, %p4628_p3 }
  0x74   : > { %p4631_p9 = pnand %p4630_p7, %p4624_p5 }
  0x76   : > { %4634 = shalt.err (!%p4631_p9)
}
  0x77   : > { %s4635_s14 = scalar_lea.vmem %s4953_s24, %s4940_s10  ;;  %s4760_s15 = smov [#allocation2]  }
  0x78   : > { %p4636_p12 = scmp.ne.s32.totalorder %s4953_s24, %s4635_s14  ;;  %s4639_s16 = sshll.u32 %s4760_s15, 4  ;;  %s4640_s16 = int_to_ptr.vmem [resolvable:$false] %s4639_s16 }
  0x79   : > { %s4641_s12 = scalar_lea.vmem %s4640_s16, 90112  ;;  %p4642_p2 = scmp.lt.s32.totalorder %s4953_s24, %s4640_s16 }
  0x7a   : > { %p4637_p0 = pnand %p4636_p12, %p3518_p13  ;;  %p4643_p8 = scmp.lt.s32.totalorder %s4641_s12, %s4635_s14 }
  0x7c   : > { %p4638_p1 = pneg %p4637_p0  ;;  %p4644_p4 = por %p4643_p8, %p4642_p2 }
  0x7e   : > { %p4645_p10 = pnand %p4644_p4, %p4638_p1 }
  0x80   : > { %4648 = shalt.err (!%p4645_p10)
}
  0x81   : > { %s4761_s27 = smov 1408   ;;  %s4762_s25 = smov 88  }
  0x82   : > { %235 = dma.hbm_to_vmem [thread:$0]  (%p3518_p13), %s4951_s9, %s4940_s10, %s4953_s24, %s4943_s17, %s4761_s27, %s4761_s27, %s4762_s25  }
  0x83 PF: > { %p7291_p5 = scmp.ne.s32.totalorder %s7287_s30, 0 }
  0x84   : > { %s4983_s6 = sand.u32 (!%p7291_p5), 1, %s4715_s19   ;;  %p7292_p11 = scmp.ne.s32.totalorder (!%p7291_p5), %s7285_s28, 0 }
  0x85   : > { %241 = sbr.rel (%p7291_p5) target bundleno = 1225 (0x4c9), region = 40  ;;  %s244_s8 = scalar_lea.sflag (!%p7291_p5), [#allocation3], %s4983_s6 }
  0x86   : > { %s4275_s7 = smul.u32 (!%p7291_p5), 2816, %s4983_s6 }
  0x88   : > { %s4987_s11 = scalar_lea.vmem (!%p7291_p5), [#allocation2], %s4275_s7 }
  0x8c   : > { %4698 = dma.done.wait (%p7292_p11), %s244_s8, 45056  }
  0x8d   : > { %4700 = vsyncadd (%p7292_p11), %s244_s8, 4294922240  ;;  %p7293_p13 = scmp.eq.s32.totalorder %s4814_s22, 0 }
  0x8f   : > { %4702 = dma.done.wait (%p7293_p13), [#allocation5], 32   ;;  %p7294_p3 = pmov %p7293_p13 }
  0x91   : > { %4704 = vsyncadd (%p7294_p3), [#allocation5], 4294967264  ;;  %p7295_p6 = pmov %p7294_p3 }
  0x92   : > { %p7296_p7 = pmov %p7294_p3 }
  0x93   : > { %4706 = dma.done.wait (%p7295_p6), [#allocation8], 16  }
  0x94   : > { %4708 = vsyncadd (%p7296_p7), [#allocation8], 4294967280  ;;  %v4763_v0 = vmov 0.0|0.0   ;;  %v648_v1 = vld [vmem:[%s7276_s1] sm:$0xff]  ;;  %v649_v2 = vld [vmem:[%s7276_s1 + $0x8] sm:$0xff]  ;;  %vm928_vm0 = vcmask 1045504  }
  0x95   : > { %3711 = vmatprep.subr.bf16.mxu1 %v4763_v0  ;;  %3807 = vmatprep.subr.bf16.mxu0 %v4763_v0  ;;  %v712_v3 = vld [vmem:[%s7276_s1 + $0x200] sm:$0xff]  ;;  %v3712_v4 = vpack.c.bf16 %v649_v2, %v648_v1  ;;  %v713_v5 = vld [vmem:[%s7276_s1 + $0x208] sm:$0xff]  ;;  %v650_v6 = vld [vmem:[%s7276_s1 + $0x10] sm:$0xff]  ;;  %vm4764_vm1 = vmmov 1   ;;  %vm831_vm3 = vcmask 1031168   ;;  %vm2282_vm4 = vcmask 162816  }
  0x96   : > { %v651_v7 = vld [vmem:[%s7276_s1 + $0x18] sm:$0xff]  ;;  %v5021_v8 = vpack.c.bf16 %v713_v5, %v712_v3  ;;  %v714_v9 = vld [vmem:[%s7276_s1 + $0x210] sm:$0xff]  ;;  %v652_v13 = vld [vmem:[%s7276_s1 + $0x20] sm:$0xff]  ;;  %p7297_p9 = scmp.ne.s32.totalorder %s7286_s29, 0 }
  0x97   : > { %v715_v10 = vld [vmem:[%s7276_s1 + $0x218] sm:$0xff]  ;;  %3713 = vmatpush1.bf16.msra.mxu1 %v3712_v4  ;;  %v3715_v11 = vpack.c.bf16 %v651_v7, %v650_v6  ;;  %v653_v14 = vld [vmem:[%s7276_s1 + $0x28] sm:$0xff]  ;;  %v716_v15 = vld [vmem:[%s7276_s1 + $0x220] sm:$0xff]  ;;  %s3580_s27 = sshll.u32 (%p7297_p9), %s4814_s22, 8 }
  0x98   : > { %3809 = vmatpush1.bf16.msra.mxu0 %v5021_v8  ;;  %3714 = vmatprep.subr.bf16.mxu1 %v4763_v0  ;;  %v5031_v12 = vpack.c.bf16 %v715_v10, %v714_v9  ;;  %v717_v16 = vld [vmem:[%s7276_s1 + $0x228] sm:$0xff]  ;;  %v3718_v17 = vpack.c.bf16 %v653_v14, %v652_v13  ;;  %v654_v19 = vld [vmem:[%s7276_s1 + $0x30] sm:$0xff]  ;;  %v655_v20 = vld [vmem:[%s7276_s1 + $0x38] sm:$0xff]  ;;  %s7140_s30 = scalar_lea.vmem (%p7297_p9), %s7280_s5, %s3580_s27  }
  0x99   : > { %3810 = vmatprep.subr.bf16.mxu0 %v4763_v0  ;;  %v5048_v18 = vpack.c.bf16 %v717_v16, %v716_v15  ;;  %v718_v21 = vld [vmem:[%s7276_s1 + $0x230] sm:$0xff]  ;;  %v719_v22 = vld [vmem:[%s7276_s1 + $0x238] sm:$0xff]  ;;  %v3721_v23 = vpack.c.bf16 %v655_v20, %v654_v19  ;;  %v656_v25 = vld [vmem:[%s7276_s1 + $0x40] sm:$0xff] }
  0x9a   : > { %v5065_v24 = vpack.c.bf16 %v719_v22, %v718_v21  ;;  %v657_v26 = vld [vmem:[%s7276_s1 + $0x48] sm:$0xff]  ;;  %v720_v27 = vld [vmem:[%s7276_s1 + $0x240] sm:$0xff]  ;;  %v658_v31 = vld [vmem:[%s7276_s1 + $0x50] sm:$0xff] }
  0x9b   : > { %3716 = vmatpush1.bf16.msra.mxu1 %v3715_v11  ;;  %v721_v28 = vld [vmem:[%s7276_s1 + $0x248] sm:$0xff]  ;;  %v3724_v29 = vpack.c.bf16 %v657_v26, %v656_v25  ;;  %v659_v32 = vld [vmem:[%s7276_s1 + $0x58] sm:$0xff]  ;;  %v722_v33 = vld [vmem:[%s7276_s1 + $0x250] sm:$0xff] }
  0x9c   : > { %3812 = vmatpush1.bf16.msra.mxu0 %v5031_v12  ;;  %3717 = vmatprep.subr.bf16.mxu1 %v4763_v0  ;;  %v5082_v30 = vpack.c.bf16 %v721_v28, %v720_v27  ;;  %v723_v34 = vld [vmem:[%s7276_s1 + $0x258] sm:$0xff]  ;;  %v3727_v35 = vpack.c.bf16 %v659_v32, %v658_v31  ;;  %v660_v37 = vld [vmem:[%s7276_s1 + $0x60] sm:$0xff]  ;;  %v661_v38 = vld [vmem:[%s7276_s1 + $0x68] sm:$0xff] }
  0x9d   : > { %3813 = vmatprep.subr.bf16.mxu0 %v4763_v0  ;;  %v5099_v36 = vpack.c.bf16 %v723_v34, %v722_v33  ;;  %v724_v39 = vld [vmem:[%s7276_s1 + $0x260] sm:$0xff]  ;;  %v725_v40 = vld [vmem:[%s7276_s1 + $0x268] sm:$0xff]  ;;  %v3730_v43 = vpack.c.bf16 %v661_v38, %v660_v37  ;;  %v662_v45 = vld [vmem:[%s7276_s1 + $0x70] sm:$0xff] }
  0x9e   : > { %v297_v41 = vld [vmem:[%s4987_s11 + $0x8] sm:$0xff]  ;;  %v5118_v44 = vpack.c.bf16 %v725_v40, %v724_v39  ;;  %v663_v46 = vld [vmem:[%s7276_s1 + $0x78] sm:$0xff]  ;;  %v726_v47 = vld [vmem:[%s7276_s1 + $0x270] sm:$0xff] }
  0x9f   : > { %3719 = vmatpush1.bf16.msra.mxu1 %v3718_v17  ;;  %v301_v42 = vld [vmem:[%s4987_s11 + $0x28] sm:$0xff]  ;;  %996 = vmatprep.mubr.f32.mxu1 %v297_v41  ;;  %v727_v48 = vld [vmem:[%s7276_s1 + $0x278] sm:$0xff]  ;;  %v3733_v49 = vpack.c.bf16 %v663_v46, %v662_v45  ;;  %v664_v51 = vld [vmem:[%s7276_s1 + $0x80] sm:$0xff] }
  0xa0   : > { %3815 = vmatpush1.bf16.msra.mxu0 %v5048_v18  ;;  %3720 = vmatprep.subr.bf16.mxu1 %v4763_v0  ;;  %v5135_v50 = vpack.c.bf16 %v727_v48, %v726_v47  ;;  %v665_v52 = vld [vmem:[%s7276_s1 + $0x88] sm:$0xff]  ;;  %v728_v53 = vld [vmem:[%s7276_s1 + $0x280] sm:$0xff]  ;;  %v666_v57 = vld [vmem:[%s7276_s1 + $0x90] sm:$0xff] }
  0xa1   : > { %3816 = vmatprep.subr.bf16.mxu0 %v4763_v0  ;;  %1446 = vmatprep.mubr.f32.mxu0 %v301_v42  ;;  %v729_v54 = vld [vmem:[%s7276_s1 + $0x288] sm:$0xff]  ;;  %v3736_v55 = vpack.c.bf16 %v665_v52, %v664_v51  ;;  %v667_v58 = vld [vmem:[%s7276_s1 + $0x98] sm:$0xff]  ;;  %v730_v59 = vld [vmem:[%s7276_s1 + $0x290] sm:$0xff] }
  0xa2   : > { %v5152_v56 = vpack.c.bf16 %v729_v54, %v728_v53  ;;  %v731_v60 = vld [vmem:[%s7276_s1 + $0x298] sm:$0xff]  ;;  %v3739_v61 = vpack.c.bf16 %v667_v58, %v666_v57  ;;  %v668_v63 = vld [vmem:[%s7276_s1 + $0xa0] sm:$0xff]  ;;  %v669_v1 = vld [vmem:[%s7276_s1 + $0xa8] sm:$0xff] }
  0xa3   : > { %3722 = vmatpush1.bf16.msra.mxu1 %v3721_v23  ;;  %v5169_v62 = vpack.c.bf16 %v731_v60, %v730_v59  ;;  %v732_v2 = vld [vmem:[%s7276_s1 + $0x2a0] sm:$0xff]  ;;  %v733_v3 = vld [vmem:[%s7276_s1 + $0x2a8] sm:$0xff]  ;;  %v3742_v4 = vpack.c.bf16 %v669_v1, %v668_v63  ;;  %v670_v6 = vld [vmem:[%s7276_s1 + $0xb0] sm:$0xff] }
  0xa4   : > { %3818 = vmatpush1.bf16.msra.mxu0 %v5065_v24  ;;  %3723 = vmatprep.subr.bf16.mxu1 %v4763_v0  ;;  %v5186_v5 = vpack.c.bf16 %v733_v3, %v732_v2  ;;  %v671_v7 = vld [vmem:[%s7276_s1 + $0xb8] sm:$0xff]  ;;  %v734_v9 = vld [vmem:[%s7276_s1 + $0x2b0] sm:$0xff]  ;;  %v672_v14 = vld [vmem:[%s7276_s1 + $0xc0] sm:$0xff] }
  0xa5   : > { %3819 = vmatprep.subr.bf16.mxu0 %v4763_v0  ;;  %v735_v10 = vld [vmem:[%s7276_s1 + $0x2b8] sm:$0xff]  ;;  %v3745_v11 = vpack.c.bf16 %v671_v7, %v670_v6  ;;  %v673_v15 = vld [vmem:[%s7276_s1 + $0xc8] sm:$0xff]  ;;  %v736_v16 = vld [vmem:[%s7276_s1 + $0x2c0] sm:$0xff] }
  0xa6   : > { %v5203_v13 = vpack.c.bf16 %v735_v10, %v734_v9  ;;  %v737_v17 = vld [vmem:[%s7276_s1 + $0x2c8] sm:$0xff]  ;;  %v3748_v19 = vpack.c.bf16 %v673_v15, %v672_v14  ;;  %v674_v21 = vld [vmem:[%s7276_s1 + $0xd0] sm:$0xff]  ;;  %v675_v22 = vld [vmem:[%s7276_s1 + $0xd8] sm:$0xff] }
  0xa7   : > { %3725 = vmatpush1.bf16.msra.mxu1 %v3724_v29  ;;  %v5220_v20 = vpack.c.bf16 %v737_v17, %v736_v16  ;;  %v738_v23 = vld [vmem:[%s7276_s1 + $0x2d0] sm:$0xff]  ;;  %v739_v25 = vld [vmem:[%s7276_s1 + $0x2d8] sm:$0xff]  ;;  %v3751_v26 = vpack.c.bf16 %v675_v22, %v674_v21  ;;  %v676_v28 = vld [vmem:[%s7276_s1 + $0xe0] sm:$0xff] }
  0xa8   : > { %3821 = vmatpush1.bf16.msra.mxu0 %v5082_v30  ;;  %3726 = vmatprep.subr.bf16.mxu1 %v4763_v0  ;;  %v5237_v27 = vpack.c.bf16 %v739_v25, %v738_v23  ;;  %v677_v29 = vld [vmem:[%s7276_s1 + $0xe8] sm:$0xff]  ;;  %v740_v31 = vld [vmem:[%s7276_s1 + $0x2e0] sm:$0xff]  ;;  %v679_v37 = vld [vmem:[%s7276_s1 + $0xf8] sm:$0xff] }
  0xa9   : > { %3822 = vmatprep.subr.bf16.mxu0 %v4763_v0  ;;  %v741_v32 = vld [vmem:[%s7276_s1 + $0x2e8] sm:$0xff]  ;;  %v3754_v33 = vpack.c.bf16 %v677_v29, %v676_v28  ;;  %v742_v38 = vld [vmem:[%s7276_s1 + $0x2f0] sm:$0xff]  ;;  %v743_v39 = vld [vmem:[%s7276_s1 + $0x2f8] sm:$0xff] }
  0xaa   : > { %v5254_v34 = vpack.c.bf16 %v741_v32, %v740_v31  ;;  %v5271_v41 = vpack.c.bf16 %v743_v39, %v742_v38  ;;  %v680_v42 = vld [vmem:[%s7276_s1 + $0x100] sm:$0xff]  ;;  %v745_v46 = vld [vmem:[%s7276_s1 + $0x308] sm:$0xff]  ;;  %v682_v54 = vld [vmem:[%s7276_s1 + $0x110] sm:$0xff] }
  0xab   : > { %3728 = vmatpush1.bf16.msra.mxu1 %v3727_v35  ;;  %v678_v35 = vld [vmem:[%s7276_s1 + $0xf0] sm:$0xff]  ;;  %v744_v45 = vld [vmem:[%s7276_s1 + $0x300] sm:$0xff]  ;;  %v747_v58 = vld [vmem:[%s7276_s1 + $0x318] sm:$0xff] }
  0xac   : > { %3824 = vmatpush1.bf16.msra.mxu0 %v5099_v36  ;;  %3729 = vmatprep.subr.bf16.mxu1 %v4763_v0  ;;  %v3757_v40 = vpack.c.bf16 %v679_v37, %v678_v35  ;;  %v296_v47 = vld [vmem:[%s4987_s11] sm:$0xff]  ;;  %v3856_v53 = vpack.c.bf16 %v745_v46, %v744_v45  ;;  %v746_v57 = vld [vmem:[%s7276_s1 + $0x310] sm:$0xff]  ;;  %v307_v59 = vld [vmem:[%s4987_s11 + $0x58] sm:$0xff] }
  0xad   : > { %3825 = vmatprep.subr.bf16.mxu0 %v4763_v0  ;;  %v308_v51 = vld [vmem:[%s4987_s11 + $0x60] sm:$0xff]  ;;  %v311_v60 = vld [vmem:[%s4987_s11 + $0x78] sm:$0xff]  ;;  %v3859_v2 = vpack.c.bf16 %v747_v58, %v746_v57  ;;  %v749_v7 = vld [vmem:[%s7276_s1 + $0x328] sm:$0xff] }
  0xae   : > { %v312_v52 = vld [vmem:[%s4987_s11 + $0x80] sm:$0xff]  ;;  %v323_v1 = vld [vmem:[%s4987_s11 + $0xd8] sm:$0xff]  ;;  %v318_v9 = vld [vmem:[%s4987_s11 + $0xb0] sm:$0xff] }
  0xaf   : > { %3731 = vmatpush1.bf16.msra.mxu1 %v3730_v43  ;;  %v681_v43 = vld [vmem:[%s7276_s1 + $0x108] sm:$0xff]  ;;  %v684_v3 = vld [vmem:[%s7276_s1 + $0x120] sm:$0xff]  ;;  %v322_v10 = vld [vmem:[%s4987_s11 + $0xd0] sm:$0xff] }
  0xb0   : > { %3827 = vmatpush1.bf16.msra.mxu0 %v5118_v44  ;;  %3732 = vmatprep.subr.bf16.mxu1 %v4763_v0  ;;  %v3760_v48 = vpack.c.bf16 %v681_v43, %v680_v42  ;;  %v748_v6 = vld [vmem:[%s7276_s1 + $0x320] sm:$0xff]  ;;  %v334_v15 = vld [vmem:[%s4987_s11 + $0x130] sm:$0xff]  ;;  %v751_v22 = vld [vmem:[%s7276_s1 + $0x338] sm:$0xff] }
  0xb1   : > { %3828 = vmatprep.subr.bf16.mxu0 %v4763_v0  ;;  %v3862_v16 = vpack.c.bf16 %v749_v7, %v748_v6  ;;  %v686_v17 = vld [vmem:[%s7276_s1 + $0x130] sm:$0xff]  ;;  %v329_v23 = vld [vmem:[%s4987_s11 + $0x108] sm:$0xff]  ;;  %v688_v32 = vld [vmem:[%s7276_s1 + $0x140] sm:$0xff] }
  0xb2   : > { %v750_v21 = vld [vmem:[%s7276_s1 + $0x330] sm:$0xff]  ;;  %v333_v25 = vld [vmem:[%s4987_s11 + $0x128] sm:$0xff]  ;;  %v752_v35 = vld [vmem:[%s7276_s1 + $0x340] sm:$0xff] }
  0xb3   : > { %3734 = vmatpush1.bf16.msra.mxu1 %v3733_v49  ;;  %v300_v49 = vld [vmem:[%s4987_s11 + $0x20] sm:$0xff]  ;;  %v345_v29 = vld [vmem:[%s4987_s11 + $0x188] sm:$0xff]  ;;  %v3865_v31 = vpack.c.bf16 %v751_v22, %v750_v21  ;;  %v690_v46 = vld [vmem:[%s7276_s1 + $0x150] sm:$0xff] }
  0xb4   : > { %3830 = vmatpush1.bf16.msra.mxu0 %v5135_v50  ;;  %3735 = vmatprep.subr.bf16.mxu1 %v4763_v0  ;;  %v753_v37 = vld [vmem:[%s7276_s1 + $0x348] sm:$0xff]  ;;  %v340_v38 = vld [vmem:[%s4987_s11 + $0x160] sm:$0xff]  ;;  %v694_v7 = vld [vmem:[%s7276_s1 + $0x170] sm:$0xff] }
  0xb5   : > { %3831 = vmatprep.subr.bf16.mxu0 %v4763_v0  ;;  %v344_v39 = vld [vmem:[%s4987_s11 + $0x180] sm:$0xff]  ;;  %v3868_v45 = vpack.c.bf16 %v753_v37, %v752_v35  ;;  %v698_v37 = vld [vmem:[%s7276_s1 + $0x190] sm:$0xff]  ;;  %vm3980_vm2 = vmpackc.low %vm928_vm0, %vm4764_vm1 }
  0xb6   : > { %v356_v43 = vld [vmem:[%s4987_s11 + $0x1e0] sm:$0xff] }
  0xb7   : > { %3737 = vmatpush1.bf16.msra.mxu1 %v3736_v55  ;;  %v683_v55 = vld [vmem:[%s7276_s1 + $0x118] sm:$0xff]  ;;  %v692_v58 = vld [vmem:[%s7276_s1 + $0x160] sm:$0xff] }
  0xb8   : > { %3833 = vmatpush1.bf16.msra.mxu0 %v5152_v56  ;;  %3738 = vmatprep.subr.bf16.mxu1 %v4763_v0  ;;  %v3763_v63 = vpack.c.bf16 %v683_v55, %v682_v54  ;;  %v367_v55 = vld [vmem:[%s4987_s11 + $0x238] sm:$0xff]  ;;  %v696_v22 = vld [vmem:[%s7276_s1 + $0x180] sm:$0xff] }
  0xb9   : > { %3834 = vmatprep.subr.bf16.mxu0 %v4763_v0 }
  0xbb   : > { %3740 = vmatpush1.bf16.msra.mxu1 %v3739_v61  ;;  %v319_v61 = vld [vmem:[%s4987_s11 + $0xb8] sm:$0xff] }
  0xbc   : > { %3836 = vmatpush1.bf16.msra.mxu0 %v5169_v62  ;;  %3741 = vmatprep.subr.bf16.mxu1 %v4763_v0 }
  0xbd   : > { %3837 = vmatprep.subr.bf16.mxu0 %v4763_v0 }
  0xbf   : > { %3743 = vmatpush1.bf16.msra.mxu1 %v3742_v4  ;;  %v685_v4 = vld [vmem:[%s7276_s1 + $0x128] sm:$0xff] }
  0xc0   : > { %3839 = vmatpush1.bf16.msra.mxu0 %v5186_v5  ;;  %3744 = vmatprep.subr.bf16.mxu1 %v4763_v0  ;;  %v3766_v14 = vpack.c.bf16 %v685_v4, %v684_v3  ;;  %v378_v4 = vld [vmem:[%s4987_s11 + $0x290] sm:$0xff] }
  0xc1   : > { %3840 = vmatprep.subr.bf16.mxu0 %v4763_v0 }
  0xc3   : > { %3746 = vmatpush1.bf16.msra.mxu1 %v3745_v11  ;;  %v330_v11 = vld [vmem:[%s4987_s11 + $0x110] sm:$0xff] }
  0xc4   : > { %3842 = vmatpush1.bf16.msra.mxu0 %v5203_v13  ;;  %3747 = vmatprep.subr.bf16.mxu1 %v4763_v0 }
  0xc5   : > { %3843 = vmatprep.subr.bf16.mxu0 %v4763_v0 }
  0xc7   : > { %3749 = vmatpush1.bf16.msra.mxu1 %v3748_v19  ;;  %v687_v19 = vld [vmem:[%s7276_s1 + $0x138] sm:$0xff] }
  0xc8   : > { %3845 = vmatpush1.bf16.msra.mxu0 %v5220_v20  ;;  %3750 = vmatprep.subr.bf16.mxu1 %v4763_v0  ;;  %v3769_v28 = vpack.c.bf16 %v687_v19, %v686_v17  ;;  %v389_v19 = vld [vmem:[%s4987_s11 + $0x2e8] sm:$0xff] }
  0xc9   : > { %3846 = vmatprep.subr.bf16.mxu0 %v4763_v0 }
  0xcb   : > { %3752 = vmatpush1.bf16.msra.mxu1 %v3751_v26  ;;  %v341_v26 = vld [vmem:[%s4987_s11 + $0x168] sm:$0xff] }
  0xcc   : > { %3848 = vmatpush1.bf16.msra.mxu0 %v5237_v27  ;;  %3753 = vmatprep.subr.bf16.mxu1 %v4763_v0 }
  0xcd   : > { %3849 = vmatprep.subr.bf16.mxu0 %v4763_v0 }
  0xcf   : > { %3755 = vmatpush1.bf16.msra.mxu1 %v3754_v33  ;;  %v689_v33 = vld [vmem:[%s7276_s1 + $0x148] sm:$0xff] }
  0xd0   : > { %3851 = vmatpush1.bf16.msra.mxu0 %v5254_v34  ;;  %3756 = vmatprep.subr.bf16.mxu1 %v4763_v0  ;;  %v3772_v42 = vpack.c.bf16 %v689_v33, %v688_v32  ;;  %v400_v33 = vld [vmem:[%s4987_s11 + $0x340] sm:$0xff] }
  0xd1   : > { %3852 = vmatprep.subr.bf16.mxu0 %v4763_v0 }
  0xd3   : > { %3758 = vmatpush1.bf16.msra.mxu1 %v3757_v40  ;;  %v352_v40 = vld [vmem:[%s4987_s11 + $0x1c0] sm:$0xff] }
  0xd4   : > { %3854 = vmatpush1.bf16.msra.mxu0 %v5271_v41  ;;  %3759 = vmatprep.subr.bf16.mxu1 %v4763_v0 }
  0xd5   : > { %3855 = vmatprep.subr.bf16.mxu0 %v4763_v0 }
  0xd6   : > { %997 = vmatmul.mubr.f32.vlgmr.msra.gmra.mrb[0].mxu1 %v296_v47  ;;  %v691_v47 = vld [vmem:[%s7276_s1 + $0x158] sm:$0xff] }
  0xd7   : > { %1447 = vmatmul.mubr.f32.vlgmr.msra.gmra.mrb[0].mxu0 %v300_v49  ;;  %3761 = vmatpush1.bf16.msra.mxu1 %v3760_v48  ;;  %v754_v48 = vld [vmem:[%s7276_s1 + $0x350] sm:$0xff]  ;;  %v755_v49 = vld [vmem:[%s7276_s1 + $0x358] sm:$0xff]  ;;  %v3775_v54 = vpack.c.bf16 %v691_v47, %v690_v46 }
  0xd8   : > { %1001 = vmatprep.mubr.f32.mxu1 %v308_v51  ;;  %1451 = vmatprep.mubr.f32.mxu0 %v312_v52  ;;  %v351_v51 = vld [vmem:[%s4987_s11 + $0x1b8] sm:$0xff]  ;;  %v3871_v57 = vpack.c.bf16 %v755_v49, %v754_v48  ;;  %v700_v49 = vld [vmem:[%s7276_s1 + $0x1a0] sm:$0xff] }
  0xd9   : > { %3857 = vmatpush1.bf16.msra.mxu0 %v3856_v53  ;;  %3762 = vmatprep.subr.bf16.mxu1 %v4763_v0  ;;  %v355_v52 = vld [vmem:[%s4987_s11 + $0x1d8] sm:$0xff] }
  0xda   : > { %1002 = vmatmul.mubr.f32.gmra.mrb[2].mxu1 %v307_v59  ;;  %3858 = vmatprep.subr.bf16.mxu0 %v4763_v0  ;;  %v363_v53 = vld [vmem:[%s4987_s11 + $0x218] sm:$0xff]  ;;  %v693_v59 = vld [vmem:[%s7276_s1 + $0x168] sm:$0xff] }
  0xdb   : > { %1452 = vmatmul.mubr.f32.gmra.mrb[2].mxu0 %v311_v60  ;;  %1006 = vmatprep.mubr.f32.mxu1 %v319_v61  ;;  %v756_v60 = vld [vmem:[%s7276_s1 + $0x360] sm:$0xff]  ;;  %v757_v61 = vld [vmem:[%s7276_s1 + $0x368] sm:$0xff]  ;;  %v3778_v3 = vpack.c.bf16 %v693_v59, %v692_v58  ;;  %v411_v47 = vld [vmem:[%s4987_s11 + $0x398] sm:$0xff] }
  0xdc   : > { %1456 = vmatprep.mubr.f32.mxu0 %v323_v1  ;;  %3764 = vmatpush1.bf16.msra.mxu1 %v3763_v63  ;;  %v362_v63 = vld [vmem:[%s4987_s11 + $0x210] sm:$0xff]  ;;  %v3874_v6 = vpack.c.bf16 %v757_v61, %v756_v60 }
  0xdd   : > { %3860 = vmatpush1.bf16.msra.mxu0 %v3859_v2  ;;  %3765 = vmatprep.subr.bf16.mxu1 %v4763_v0  ;;  %v366_v1 = vld [vmem:[%s4987_s11 + $0x230] sm:$0xff] }
  0xde   : > { %1007 = vmatmul.mubr.f32.gmra.mrb[4].mxu1 %v318_v9  ;;  %3861 = vmatprep.subr.bf16.mxu0 %v4763_v0  ;;  %v374_v2 = vld [vmem:[%s4987_s11 + $0x270] sm:$0xff]  ;;  %v695_v9 = vld [vmem:[%s7276_s1 + $0x178] sm:$0xff] }
  0xdf   : > { %1457 = vmatmul.mubr.f32.gmra.mrb[4].mxu0 %v322_v10  ;;  %1011 = vmatprep.mubr.f32.mxu1 %v330_v11  ;;  %v758_v10 = vld [vmem:[%s7276_s1 + $0x370] sm:$0xff]  ;;  %v759_v11 = vld [vmem:[%s7276_s1 + $0x378] sm:$0xff]  ;;  %v3781_v17 = vpack.c.bf16 %v695_v9, %v694_v7  ;;  %v433_v9 = vld [vmem:[%s4987_s11 + $0x448] sm:$0xff] }
  0xe0   : > { %1461 = vmatprep.mubr.f32.mxu0 %v334_v15  ;;  %3767 = vmatpush1.bf16.msra.mxu1 %v3766_v14  ;;  %v373_v14 = vld [vmem:[%s4987_s11 + $0x268] sm:$0xff]  ;;  %v3877_v21 = vpack.c.bf16 %v759_v11, %v758_v10  ;;  %v422_v59 = vld [vmem:[%s4987_s11 + $0x3f0] sm:$0xff]  ;;  %v704_v11 = vld [vmem:[%s7276_s1 + $0x1c0] sm:$0xff] }
  0xe1   : > { %3863 = vmatpush1.bf16.msra.mxu0 %v3862_v16  ;;  %3768 = vmatprep.subr.bf16.mxu1 %v4763_v0  ;;  %v377_v15 = vld [vmem:[%s4987_s11 + $0x288] sm:$0xff]  ;;  %v702_v61 = vld [vmem:[%s7276_s1 + $0x1b0] sm:$0xff] }
  0xe2   : > { %1012 = vmatmul.mubr.f32.gmra.mrb[6].mxu1 %v329_v23  ;;  %3864 = vmatprep.subr.bf16.mxu0 %v4763_v0  ;;  %v385_v16 = vld [vmem:[%s4987_s11 + $0x2c8] sm:$0xff] }
  0xe3   : > { %1462 = vmatmul.mubr.f32.gmra.mrb[6].mxu0 %v333_v25  ;;  %1016 = vmatprep.mubr.f32.mxu1 %v341_v26  ;;  %v697_v23 = vld [vmem:[%s7276_s1 + $0x188] sm:$0xff]  ;;  %v760_v25 = vld [vmem:[%s7276_s1 + $0x380] sm:$0xff] }
  0xe4   : > { %1466 = vmatprep.mubr.f32.mxu0 %v345_v29  ;;  %3770 = vmatpush1.bf16.msra.mxu1 %v3769_v28  ;;  %v761_v26 = vld [vmem:[%s7276_s1 + $0x388] sm:$0xff]  ;;  %v384_v28 = vld [vmem:[%s4987_s11 + $0x2c0] sm:$0xff]  ;;  %v3784_v32 = vpack.c.bf16 %v697_v23, %v696_v22 }
  0xe5   : > { %3866 = vmatpush1.bf16.msra.mxu0 %v3865_v31  ;;  %3771 = vmatprep.subr.bf16.mxu1 %v4763_v0  ;;  %v388_v29 = vld [vmem:[%s4987_s11 + $0x2e0] sm:$0xff]  ;;  %v3880_v35 = vpack.c.bf16 %v761_v26, %v760_v25  ;;  %v706_v26 = vld [vmem:[%s7276_s1 + $0x1d0] sm:$0xff] }
  0xe6   : > { %1017 = vmatmul.mubr.f32.gmra.mrb[8].mxu1 %v340_v38  ;;  %3867 = vmatprep.subr.bf16.mxu0 %v4763_v0  ;;  %v396_v31 = vld [vmem:[%s4987_s11 + $0x320] sm:$0xff]  ;;  %v699_v38 = vld [vmem:[%s7276_s1 + $0x198] sm:$0xff] }
  0xe7   : > { %1467 = vmatmul.mubr.f32.gmra.mrb[8].mxu0 %v344_v39  ;;  %1021 = vmatprep.mubr.f32.mxu1 %v352_v40  ;;  %v762_v39 = vld [vmem:[%s7276_s1 + $0x390] sm:$0xff]  ;;  %v763_v40 = vld [vmem:[%s7276_s1 + $0x398] sm:$0xff]  ;;  %v3787_v46 = vpack.c.bf16 %v699_v38, %v698_v37  ;;  %v444_v23 = vld [vmem:[%s4987_s11 + $0x4a0] sm:$0xff] }
  0xe8   : > { %1471 = vmatprep.mubr.f32.mxu0 %v356_v43  ;;  %3773 = vmatpush1.bf16.msra.mxu1 %v3772_v42  ;;  %v395_v42 = vld [vmem:[%s4987_s11 + $0x318] sm:$0xff]  ;;  %v3883_v48 = vpack.c.bf16 %v763_v40, %v762_v39  ;;  %v708_v40 = vld [vmem:[%s7276_s1 + $0x1e0] sm:$0xff] }
  0xe9   : > { %3869 = vmatpush1.bf16.msra.mxu0 %v3868_v45  ;;  %3774 = vmatprep.subr.bf16.mxu1 %v4763_v0  ;;  %v399_v43 = vld [vmem:[%s4987_s11 + $0x338] sm:$0xff] }
  0xea   : > { %1022 = vmatmul.mubr.f32.gmra.mrb[10].mxu1 %v351_v51  ;;  %3870 = vmatprep.subr.bf16.mxu0 %v4763_v0  ;;  %v407_v45 = vld [vmem:[%s4987_s11 + $0x378] sm:$0xff]  ;;  %v701_v51 = vld [vmem:[%s7276_s1 + $0x1a8] sm:$0xff] }
  0xeb   : > { %1472 = vmatmul.mubr.f32.gmra.mrb[10].mxu0 %v355_v52  ;;  %1026 = vmatprep.mubr.f32.mxu1 %v363_v53  ;;  %v764_v52 = vld [vmem:[%s7276_s1 + $0x3a0] sm:$0xff]  ;;  %v765_v53 = vld [vmem:[%s7276_s1 + $0x3a8] sm:$0xff]  ;;  %v3790_v58 = vpack.c.bf16 %v701_v51, %v700_v49  ;;  %v455_v38 = vld [vmem:[%s4987_s11 + $0x4f8] sm:$0xff] }
  0xec   : > { %1476 = vmatprep.mubr.f32.mxu0 %v367_v55  ;;  %3776 = vmatpush1.bf16.msra.mxu1 %v3775_v54  ;;  %v406_v54 = vld [vmem:[%s4987_s11 + $0x370] sm:$0xff]  ;;  %v3886_v60 = vpack.c.bf16 %v765_v53, %v764_v52 }
  0xed   : > { %3872 = vmatpush1.bf16.msra.mxu0 %v3871_v57  ;;  %3777 = vmatprep.subr.bf16.mxu1 %v4763_v0  ;;  %v410_v55 = vld [vmem:[%s4987_s11 + $0x390] sm:$0xff] }
  0xee   : > { %1027 = vmatmul.mubr.f32.gmra.mrb[12].mxu1 %v362_v63  ;;  %3873 = vmatprep.subr.bf16.mxu0 %v4763_v0  ;;  %v418_v57 = vld [vmem:[%s4987_s11 + $0x3d0] sm:$0xff]  ;;  %v703_v63 = vld [vmem:[%s7276_s1 + $0x1b8] sm:$0xff] }
  0xef   : > { %1477 = vmatmul.mubr.f32.gmra.mrb[12].mxu0 %v366_v1  ;;  %1031 = vmatprep.mubr.f32.mxu1 %v374_v2  ;;  %v766_v1 = vld [vmem:[%s7276_s1 + $0x3b0] sm:$0xff]  ;;  %v767_v2 = vld [vmem:[%s7276_s1 + $0x3b8] sm:$0xff]  ;;  %v3793_v7 = vpack.c.bf16 %v703_v63, %v702_v61  ;;  %v477_v63 = vld [vmem:[%s4987_s11 + $0x5a8] sm:$0xff] }
  0xf0   : > { %1481 = vmatprep.mubr.f32.mxu0 %v378_v4  ;;  %3779 = vmatpush1.bf16.msra.mxu1 %v3778_v3  ;;  %v417_v3 = vld [vmem:[%s4987_s11 + $0x3c8] sm:$0xff]  ;;  %v3889_v10 = vpack.c.bf16 %v767_v2, %v766_v1  ;;  %v466_v51 = vld [vmem:[%s4987_s11 + $0x550] sm:$0xff]  ;;  %v472_v2 = vld [vmem:[%s4987_s11 + $0x580] sm:$0xff] }
  0xf1   : > { %3875 = vmatpush1.bf16.msra.mxu0 %v3874_v6  ;;  %3780 = vmatprep.subr.bf16.mxu1 %v4763_v0  ;;  %v421_v4 = vld [vmem:[%s4987_s11 + $0x3e8] sm:$0xff]  ;;  %v710_v53 = vld [vmem:[%s7276_s1 + $0x1f0] sm:$0xff] }
  0xf2   : > { %1032 = vmatmul.mubr.f32.gmra.mrb[14].mxu1 %v373_v14  ;;  %3876 = vmatprep.subr.bf16.mxu0 %v4763_v0  ;;  %v429_v6 = vld [vmem:[%s4987_s11 + $0x428] sm:$0xff] }
  0xf3   : > { %1482 = vmatmul.mubr.f32.gmra.mrb[14].mxu0 %v377_v15  ;;  %1036 = vmatprep.mubr.f32.mxu1 %v385_v16  ;;  %v705_v14 = vld [vmem:[%s7276_s1 + $0x1c8] sm:$0xff]  ;;  %v768_v15 = vld [vmem:[%s7276_s1 + $0x3c0] sm:$0xff] }
  0xf4   : > { %1486 = vmatprep.mubr.f32.mxu0 %v389_v19  ;;  %3782 = vmatpush1.bf16.msra.mxu1 %v3781_v17  ;;  %v769_v16 = vld [vmem:[%s7276_s1 + $0x3c8] sm:$0xff]  ;;  %v428_v17 = vld [vmem:[%s4987_s11 + $0x420] sm:$0xff]  ;;  %v3796_v22 = vpack.c.bf16 %v705_v14, %v704_v11  ;;  %v499_v11 = vld [vmem:[%s4987_s11 + $0x658] sm:$0xff] }
  0xf5   : > { %3878 = vmatpush1.bf16.msra.mxu0 %v3877_v21  ;;  %3783 = vmatprep.subr.bf16.mxu1 %v4763_v0  ;;  %v432_v19 = vld [vmem:[%s4987_s11 + $0x440] sm:$0xff]  ;;  %v3892_v25 = vpack.c.bf16 %v769_v16, %v768_v15  ;;  %v494_v14 = vld [vmem:[%s4987_s11 + $0x630] sm:$0xff] }
  0xf6   : > { %1037 = vmatmul.mubr.f32.gmra.mrb[16].mxu1 %v384_v28  ;;  %3879 = vmatprep.subr.bf16.mxu0 %v4763_v0  ;;  %v440_v21 = vld [vmem:[%s4987_s11 + $0x480] sm:$0xff]  ;;  %v707_v28 = vld [vmem:[%s7276_s1 + $0x1d8] sm:$0xff]  ;;  %v498_v15 = vld [vmem:[%s4987_s11 + $0x650] sm:$0xff] }
  0xf7   : > { %1487 = vmatmul.mubr.f32.gmra.mrb[16].mxu0 %v388_v29  ;;  %1041 = vmatprep.mubr.f32.mxu1 %v396_v31  ;;  %v770_v29 = vld [vmem:[%s7276_s1 + $0x3d0] sm:$0xff]  ;;  %v771_v31 = vld [vmem:[%s7276_s1 + $0x3d8] sm:$0xff]  ;;  %v3799_v37 = vpack.c.bf16 %v707_v28, %v706_v26  ;;  %v520_v26 = vld [vmem:[%s4987_s11 + $0x700] sm:$0xff] }
  0xf8   : > { %1491 = vmatprep.mubr.f32.mxu0 %v400_v33  ;;  %3785 = vmatpush1.bf16.msra.mxu1 %v3784_v32  ;;  %v439_v32 = vld [vmem:[%s4987_s11 + $0x478] sm:$0xff]  ;;  %v3895_v39 = vpack.c.bf16 %v771_v31, %v770_v29  ;;  %v506_v16 = vld [vmem:[%s4987_s11 + $0x690] sm:$0xff]  ;;  %v528_v28 = vld [vmem:[%s4987_s11 + $0x740] sm:$0xff] }
  0xf9   : > { %3881 = vmatpush1.bf16.msra.mxu0 %v3880_v35  ;;  %3786 = vmatprep.subr.bf16.mxu1 %v4763_v0  ;;  %v443_v33 = vld [vmem:[%s4987_s11 + $0x498] sm:$0xff]  ;;  %v532_v29 = vld [vmem:[%s4987_s11 + $0x760] sm:$0xff] }
  0xfa   : > { %1042 = vmatmul.mubr.f32.gmra.mrb[18].mxu1 %v395_v42  ;;  %3882 = vmatprep.subr.bf16.mxu0 %v4763_v0  ;;  %v451_v35 = vld [vmem:[%s4987_s11 + $0x4d8] sm:$0xff]  ;;  %v709_v42 = vld [vmem:[%s7276_s1 + $0x1e8] sm:$0xff] }
  0xfb   : > { %1492 = vmatmul.mubr.f32.gmra.mrb[18].mxu0 %v399_v43  ;;  %1046 = vmatprep.mubr.f32.mxu1 %v407_v45  ;;  %v772_v43 = vld [vmem:[%s7276_s1 + $0x3e0] sm:$0xff]  ;;  %v773_v45 = vld [vmem:[%s7276_s1 + $0x3e8] sm:$0xff]  ;;  %v3802_v49 = vpack.c.bf16 %v709_v42, %v708_v40  ;;  %v527_v31 = vld [vmem:[%s4987_s11 + $0x738] sm:$0xff] }
  0xfc   : > { %1496 = vmatprep.mubr.f32.mxu0 %v411_v47  ;;  %3788 = vmatpush1.bf16.msra.mxu1 %v3787_v46  ;;  %v450_v46 = vld [vmem:[%s4987_s11 + $0x4d0] sm:$0xff]  ;;  %v3898_v52 = vpack.c.bf16 %v773_v45, %v772_v43  ;;  %v549_v42 = vld [vmem:[%s4987_s11 + $0x7e8] sm:$0xff] }
  0xfd   : > { %3884 = vmatpush1.bf16.msra.mxu0 %v3883_v48  ;;  %3789 = vmatprep.subr.bf16.mxu1 %v4763_v0  ;;  %v454_v47 = vld [vmem:[%s4987_s11 + $0x4f0] sm:$0xff]  ;;  %v553_v43 = vld [vmem:[%s4987_s11 + $0x808] sm:$0xff] }
  0xfe   : > { %1047 = vmatmul.mubr.f32.gmra.mrb[20].mxu1 %v406_v54  ;;  %3885 = vmatprep.subr.bf16.mxu0 %v4763_v0  ;;  %v462_v48 = vld [vmem:[%s4987_s11 + $0x530] sm:$0xff]  ;;  %v711_v54 = vld [vmem:[%s7276_s1 + $0x1f8] sm:$0xff]  ;;  %v561_v45 = vld [vmem:[%s4987_s11 + $0x848] sm:$0xff] }
  0xff   : > { %1497 = vmatmul.mubr.f32.gmra.mrb[20].mxu0 %v410_v55  ;;  %1051 = vmatprep.mubr.f32.mxu1 %v418_v57  ;;  %v774_v55 = vld [vmem:[%s7276_s1 + $0x3f0] sm:$0xff]  ;;  %v775_v57 = vld [vmem:[%s7276_s1 + $0x3f8] sm:$0xff]  ;;  %v3805_v61 = vpack.c.bf16 %v711_v54, %v710_v53 }
 0x100   : > { %1501 = vmatprep.mubr.f32.mxu0 %v422_v59  ;;  %3791 = vmatpush1.bf16.msra.mxu1 %v3790_v58  ;;  %v461_v58 = vld [vmem:[%s4987_s11 + $0x528] sm:$0xff]  ;;  %v3901_v1 = vpack.c.bf16 %v775_v57, %v774_v55  ;;  %v554_v40 = vld [vmem:[%s4987_s11 + $0x810] sm:$0xff]  ;;  %v779_v57 = vld [vmem:[%s7276_s1 + $0x418] sm:$0xff] }
 0x101   : > { %3887 = vmatpush1.bf16.msra.mxu0 %v3886_v60  ;;  %3792 = vmatprep.subr.bf16.mxu1 %v4763_v0  ;;  %v465_v59 = vld [vmem:[%s4987_s11 + $0x548] sm:$0xff]  ;;  %v314_v54 = vld [vmem:[%s4987_s11 + $0x90] sm:$0xff] }
 0x102   : > { %1052 = vmatmul.mubr.f32.gmra.mrb[22].mxu1 %v417_v3  ;;  %3888 = vmatprep.subr.bf16.mxu0 %v4763_v0  ;;  %v473_v60 = vld [vmem:[%s4987_s11 + $0x588] sm:$0xff]  ;;  %v476_v3 = vld [vmem:[%s4987_s11 + $0x5a0] sm:$0xff]  ;;  %v778_v55 = vld [vmem:[%s7276_s1 + $0x410] sm:$0xff] }
 0x103   : > { %1502 = vmatmul.mubr.f32.gmra.mrb[22].mxu0 %v421_v4  ;;  %1056 = vmatprep.mubr.f32.mxu1 %v429_v6  ;;  %v484_v4 = vld [vmem:[%s4987_s11 + $0x5e0] sm:$0xff] }
 0x104   : > { %1506 = vmatprep.mubr.f32.mxu0 %v433_v9  ;;  %3794 = vmatpush1.bf16.msra.mxu1 %v3793_v7  ;;  %v488_v6 = vld [vmem:[%s4987_s11 + $0x600] sm:$0xff]  ;;  %v483_v7 = vld [vmem:[%s4987_s11 + $0x5d8] sm:$0xff] }
 0x105   : > { %3890 = vmatpush1.bf16.msra.mxu0 %v3889_v10  ;;  %3795 = vmatprep.subr.bf16.mxu1 %v4763_v0  ;;  %v487_v9 = vld [vmem:[%s4987_s11 + $0x5f8] sm:$0xff] }
 0x106   : > { %1057 = vmatmul.mubr.f32.gmra.mrb[24].mxu1 %v428_v17  ;;  %3891 = vmatprep.subr.bf16.mxu0 %v4763_v0  ;;  %v495_v10 = vld [vmem:[%s4987_s11 + $0x638] sm:$0xff]  ;;  %v510_v17 = vld [vmem:[%s4987_s11 + $0x6b0] sm:$0xff] }
 0x107   : > { %1507 = vmatmul.mubr.f32.gmra.mrb[24].mxu0 %v432_v19  ;;  %1061 = vmatprep.mubr.f32.mxu1 %v440_v21  ;;  %v505_v19 = vld [vmem:[%s4987_s11 + $0x688] sm:$0xff] }
 0x108   : > { %1511 = vmatprep.mubr.f32.mxu0 %v444_v23  ;;  %3797 = vmatpush1.bf16.msra.mxu1 %v3796_v22  ;;  %v509_v21 = vld [vmem:[%s4987_s11 + $0x6a8] sm:$0xff] }
 0x109   : > { %3893 = vmatpush1.bf16.msra.mxu0 %v3892_v25  ;;  %3798 = vmatprep.subr.bf16.mxu1 %v4763_v0  ;;  %v517_v22 = vld [vmem:[%s4987_s11 + $0x6e8] sm:$0xff]  ;;  %v516_v25 = vld [vmem:[%s4987_s11 + $0x6e0] sm:$0xff] }
 0x10a   : > { %1062 = vmatmul.mubr.f32.gmra.mrb[26].mxu1 %v439_v32  ;;  %3894 = vmatprep.subr.bf16.mxu0 %v4763_v0  ;;  %v521_v23 = vld [vmem:[%s4987_s11 + $0x708] sm:$0xff]  ;;  %v531_v32 = vld [vmem:[%s4987_s11 + $0x758] sm:$0xff] }
 0x10b   : > { %1512 = vmatmul.mubr.f32.gmra.mrb[26].mxu0 %v443_v33  ;;  %1066 = vmatprep.mubr.f32.mxu1 %v451_v35  ;;  %v539_v33 = vld [vmem:[%s4987_s11 + $0x798] sm:$0xff] }
 0x10c   : > { %1516 = vmatprep.mubr.f32.mxu0 %v455_v38  ;;  %3800 = vmatpush1.bf16.msra.mxu1 %v3799_v37  ;;  %v543_v35 = vld [vmem:[%s4987_s11 + $0x7b8] sm:$0xff]  ;;  %v538_v37 = vld [vmem:[%s4987_s11 + $0x790] sm:$0xff] }
 0x10d   : > { %3896 = vmatpush1.bf16.msra.mxu0 %v3895_v39  ;;  %3801 = vmatprep.subr.bf16.mxu1 %v4763_v0  ;;  %v542_v38 = vld [vmem:[%s4987_s11 + $0x7b0] sm:$0xff] }
 0x10e   : > { %1067 = vmatmul.mubr.f32.gmra.mrb[28].mxu1 %v450_v46  ;;  %3897 = vmatprep.subr.bf16.mxu0 %v4763_v0  ;;  %v550_v39 = vld [vmem:[%s4987_s11 + $0x7f0] sm:$0xff]  ;;  %v303_v46 = vld [vmem:[%s4987_s11 + $0x38] sm:$0xff] }
 0x10f   : > { %1517 = vmatmul.mubr.f32.gmra.mrb[28].mxu0 %v454_v47  ;;  %1071 = vmatprep.mubr.f32.mxu1 %v462_v48  ;;  %v776_v47 = vld [vmem:[%s7276_s1 + $0x400] sm:$0xff]  ;;  %v777_v48 = vld [vmem:[%s7276_s1 + $0x408] sm:$0xff] }
 0x110   : > { %1521 = vmatprep.mubr.f32.mxu0 %v466_v51  ;;  %3803 = vmatpush1.bf16.msra.mxu1 %v3802_v49  ;;  %v560_v49 = vld [vmem:[%s4987_s11 + $0x840] sm:$0xff]  ;;  %v302_v51 = vld [vmem:[%s4987_s11 + $0x30] sm:$0xff]  ;;  %v3904_v53 = vpack.c.bf16 %v777_v48, %v776_v47 }
 0x111   : > { %3899 = vmatpush1.bf16.msra.mxu0 %v3898_v52  ;;  %3804 = vmatprep.subr.bf16.mxu1 %v4763_v0  ;;  %v572_v52 = vld [vmem:[%s4987_s11 + $0x8a0] sm:$0xff] }
 0x112   : > { %1072 = vmatmul.mubr.f32.gmra.mrb[30].mxu1 %v461_v58  ;;  %3900 = vmatprep.subr.bf16.mxu0 %v4763_v0  ;;  %v571_v58 = vld [vmem:[%s4987_s11 + $0x898] sm:$0xff]  ;;  %v380_v48 = vld [vmem:[%s4987_s11 + $0x2a0] sm:$0xff] }
 0x113   : > { %1522 = vmatmul.mubr.f32.gmra.mrb[30].mxu0 %v465_v59  ;;  %1076 = vmatprep.mubr.f32.mxu1 %v473_v60  ;;  %v313_v59 = vld [vmem:[%s4987_s11 + $0x88] sm:$0xff]  ;;  %v583_v60 = vld [vmem:[%s4987_s11 + $0x8f8] sm:$0xff] }
 0x114   : > { %1526 = vmatprep.mubr.f32.mxu0 %v477_v63  ;;  %3806 = vmatpush1.bf16.msra.mxu1 %v3805_v61  ;;  %v3907_v61 = vpack.c.bf16 %v779_v57, %v778_v55  ;;  %v325_v63 = vld [vmem:[%s4987_s11 + $0xe8] sm:$0xff]  ;;  %v391_v57 = vld [vmem:[%s4987_s11 + $0x2f8] sm:$0xff] }
 0x115   : > { %3902 = vmatpush1.bf16.msra.mxu0 %v3901_v1  ;;  %3985 = vmatprep.subr.bf16.mxu1 %v4763_v0  ;;  %v780_v1 = vld [vmem:[%s7276_s1 + $0x420] sm:$0xff] }
 0x116   : > { %1077 = vmatmul.mubr.f32.gmra.mrb[32].mxu1 %v472_v2  ;;  %3903 = vmatprep.subr.bf16.mxu0 %v4763_v0  ;;  %v781_v2 = vld [vmem:[%s7276_s1 + $0x428] sm:$0xff] }
 0x117   : > { %1527 = vmatmul.mubr.f32.gmra.mrb[32].mxu0 %v476_v3  ;;  %1081 = vmatprep.mubr.f32.mxu1 %v484_v4  ;;  %v582_v3 = vld [vmem:[%s4987_s11 + $0x8f0] sm:$0xff]  ;;  %v324_v4 = vld [vmem:[%s4987_s11 + $0xe0] sm:$0xff] }
 0x118   : > { %1531 = vmatprep.mubr.f32.mxu0 %v488_v6  ;;  %v594_v6 = vld [vmem:[%s4987_s11 + $0x950] sm:$0xff] }
 0x11a   : > { %1082 = vmatmul.mubr.f32.gmra.mrb[34].mxu1 %v483_v7  ;;  %v3910_v7 = vpack.c.bf16 %v781_v2, %v780_v1  ;;  %v402_v1 = vld [vmem:[%s4987_s11 + $0x350] sm:$0xff] }
 0x11b   : > { %1532 = vmatmul.mubr.f32.gmra.mrb[34].mxu0 %v487_v9  ;;  %1086 = vmatprep.mubr.f32.mxu1 %v495_v10  ;;  %v336_v9 = vld [vmem:[%s4987_s11 + $0x140] sm:$0xff]  ;;  %v782_v10 = vld [vmem:[%s7276_s1 + $0x430] sm:$0xff] }
 0x11c   : > { %1536 = vmatprep.mubr.f32.mxu0 %v499_v11  ;;  %v783_v11 = vld [vmem:[%s7276_s1 + $0x438] sm:$0xff] }
 0x11e   : > { %1087 = vmatmul.mubr.f32.gmra.mrb[36].mxu1 %v494_v14  ;;  %v593_v14 = vld [vmem:[%s4987_s11 + $0x948] sm:$0xff] }
 0x11f   : > { %1537 = vmatmul.mubr.f32.gmra.mrb[36].mxu0 %v498_v15  ;;  %1091 = vmatprep.mubr.f32.mxu1 %v506_v16  ;;  %v335_v15 = vld [vmem:[%s4987_s11 + $0x138] sm:$0xff]  ;;  %v605_v16 = vld [vmem:[%s4987_s11 + $0x9a8] sm:$0xff] }
 0x120   : > { %1541 = vmatprep.mubr.f32.mxu0 %v510_v17  ;;  %v3913_v17 = vpack.c.bf16 %v783_v11, %v782_v10  ;;  %v413_v10 = vld [vmem:[%s4987_s11 + $0x3a8] sm:$0xff] }
 0x122   : > { %1092 = vmatmul.mubr.f32.gmra.mrb[38].mxu1 %v505_v19  ;;  %v347_v19 = vld [vmem:[%s4987_s11 + $0x198] sm:$0xff] }
 0x123   : > { %1542 = vmatmul.mubr.f32.gmra.mrb[38].mxu0 %v509_v21  ;;  %1096 = vmatprep.mubr.f32.mxu1 %v517_v22  ;;  %v784_v21 = vld [vmem:[%s7276_s1 + $0x440] sm:$0xff]  ;;  %v785_v22 = vld [vmem:[%s7276_s1 + $0x448] sm:$0xff] }
 0x124   : > { %1546 = vmatprep.mubr.f32.mxu0 %v521_v23  ;;  %v604_v23 = vld [vmem:[%s4987_s11 + $0x9a0] sm:$0xff] }
 0x126   : > { %1097 = vmatmul.mubr.f32.gmra.mrb[40].mxu1 %v516_v25  ;;  %v346_v25 = vld [vmem:[%s4987_s11 + $0x190] sm:$0xff] }
 0x127   : > { %1547 = vmatmul.mubr.f32.gmra.mrb[40].mxu0 %v520_v26  ;;  %1101 = vmatprep.mubr.f32.mxu1 %v528_v28  ;;  %v616_v26 = vld [vmem:[%s4987_s11 + $0xa00] sm:$0xff]  ;;  %v3916_v28 = vpack.c.bf16 %v785_v22, %v784_v21  ;;  %v798_v22 = vld [vmem:[%s7276_s1 + $0x4b0] sm:$0xff] }
 0x128   : > { %1551 = vmatprep.mubr.f32.mxu0 %v532_v29  ;;  %v358_v29 = vld [vmem:[%s4987_s11 + $0x1f0] sm:$0xff] }
 0x12a   : > { %1102 = vmatmul.mubr.f32.gmra.mrb[42].mxu1 %v527_v31  ;;  %v786_v31 = vld [vmem:[%s7276_s1 + $0x450] sm:$0xff] }
 0x12b   : > { %1552 = vmatmul.mubr.f32.gmra.mrb[42].mxu0 %v531_v32  ;;  %1106 = vmatprep.mubr.f32.mxu1 %v539_v33  ;;  %v787_v32 = vld [vmem:[%s7276_s1 + $0x458] sm:$0xff] }
 0x12c   : > { %1556 = vmatprep.mubr.f32.mxu0 %v543_v35  ;;  %v615_v33 = vld [vmem:[%s4987_s11 + $0x9f8] sm:$0xff]  ;;  %v357_v35 = vld [vmem:[%s4987_s11 + $0x1e8] sm:$0xff] }
 0x12e   : > { %1107 = vmatmul.mubr.f32.gmra.mrb[44].mxu1 %v538_v37  ;;  %v627_v37 = vld [vmem:[%s4987_s11 + $0xa58] sm:$0xff] }
 0x12f   : > { %1557 = vmatmul.mubr.f32.gmra.mrb[44].mxu0 %v542_v38  ;;  %1111 = vmatprep.mubr.f32.mxu1 %v550_v39  ;;  %v3919_v38 = vpack.c.bf16 %v787_v32, %v786_v31  ;;  %v369_v39 = vld [vmem:[%s4987_s11 + $0x248] sm:$0xff]  ;;  %v800_v31 = vld [vmem:[%s7276_s1 + $0x4c0] sm:$0xff] }
 0x130   : > { %1561 = vmatprep.mubr.f32.mxu0 %v554_v40  ;;  %v788_v40 = vld [vmem:[%s7276_s1 + $0x460] sm:$0xff]  ;;  %v801_v32 = vld [vmem:[%s7276_s1 + $0x4c8] sm:$0xff] }
 0x132   : > { %1112 = vmatmul.mubr.f32.gmra.mrb[46].mxu1 %v549_v42  ;;  %v789_v42 = vld [vmem:[%s7276_s1 + $0x468] sm:$0xff] }
 0x133   : > { %1562 = vmatmul.mubr.f32.gmra.mrb[46].mxu0 %v553_v43  ;;  %1116 = vmatprep.mubr.f32.mxu1 %v561_v45  ;;  %v626_v43 = vld [vmem:[%s4987_s11 + $0xa50] sm:$0xff]  ;;  %v368_v45 = vld [vmem:[%s4987_s11 + $0x240] sm:$0xff]  ;;  %v3922_v47 = vpack.c.bf16 %v789_v42, %v788_v40  ;;  %v803_v40 = vld [vmem:[%s7276_s1 + $0x4d8] sm:$0xff] }
 0x134   : > { %1671 = vmatprep.mubr.f32.mxu0 %v303_v46  ;;  %v638_v46 = vld [vmem:[%s4987_s11 + $0xab0] sm:$0xff]  ;;  %v445_v42 = vld [vmem:[%s4987_s11 + $0x4a8] sm:$0xff] }
 0x136   : > { %1117 = vmatmul.mubr.f32.gmra.mrb[48].mxu1 %v560_v49  ;;  %v790_v49 = vld [vmem:[%s7276_s1 + $0x470] sm:$0xff] }
 0x137   : > { %1672 = vmatmul.mubr.f32.vlgmr.msra.gmra.mrb[0].mxu0 %v302_v51  ;;  %1121 = vmatprep.mubr.f32.mxu1 %v572_v52  ;;  %v791_v51 = vld [vmem:[%s7276_s1 + $0x478] sm:$0xff]  ;;  %v637_v52 = vld [vmem:[%s4987_s11 + $0xaa8] sm:$0xff] }
 0x138   : > { %1676 = vmatprep.mubr.f32.mxu0 %v314_v54  ;;  %3905 = vmatpush1.bf16.msra.mxu0 %v3904_v53  ;;  %v379_v53 = vld [vmem:[%s4987_s11 + $0x298] sm:$0xff]  ;;  %v3925_v55 = vpack.c.bf16 %v791_v51, %v790_v49  ;;  %v456_v49 = vld [vmem:[%s4987_s11 + $0x500] sm:$0xff] }
 0x139   : > { %3906 = vmatprep.subr.bf16.mxu0 %v4763_v0  ;;  %v299_v54 = vld [vmem:[%s4987_s11 + $0x18] sm:$0xff]  ;;  %v376_v51 = vld [vmem:[%s4987_s11 + $0x280] sm:$0xff] }
 0x13a   : > { %1122 = vmatmul.mubr.f32.gmra.mrb[50].mxu1 %v571_v58  ;;  %v792_v58 = vld [vmem:[%s7276_s1 + $0x480] sm:$0xff] }
 0x13b   : > { %1677 = vmatmul.mubr.f32.gmra.mrb[2].mxu0 %v313_v59  ;;  %1126 = vmatprep.mubr.f32.mxu1 %v583_v60  ;;  %v793_v59 = vld [vmem:[%s7276_s1 + $0x488] sm:$0xff]  ;;  %v298_v60 = vld [vmem:[%s4987_s11 + $0x10] sm:$0xff] }
 0x13c   : > { %1681 = vmatprep.mubr.f32.mxu0 %v325_v63  ;;  %3908 = vmatpush1.bf16.msra.mxu0 %v3907_v61  ;;  %v390_v61 = vld [vmem:[%s4987_s11 + $0x2f0] sm:$0xff]  ;;  %v3928_v2 = vpack.c.bf16 %v793_v59, %v792_v58  ;;  %v387_v58 = vld [vmem:[%s4987_s11 + $0x2d8] sm:$0xff] }
 0x13d   : > { %3909 = vmatprep.subr.bf16.mxu0 %v4763_v0  ;;  %v310_v63 = vld [vmem:[%s4987_s11 + $0x70] sm:$0xff]  ;;  %v479_v59 = vld [vmem:[%s4987_s11 + $0x5b8] sm:$0xff] }
 0x13e   : > { %1127 = vmatmul.mubr.f32.gmra.mrb[52].mxu1 %v582_v3  ;;  %v794_v3 = vld [vmem:[%s7276_s1 + $0x490] sm:$0xff] }
 0x13f   : > { %1682 = vmatmul.mubr.f32.gmra.mrb[4].mxu0 %v324_v4  ;;  %1131 = vmatprep.mubr.f32.mxu1 %v594_v6  ;;  %v795_v4 = vld [vmem:[%s7276_s1 + $0x498] sm:$0xff]  ;;  %v309_v6 = vld [vmem:[%s4987_s11 + $0x68] sm:$0xff] }
 0x140   : > { %1686 = vmatprep.mubr.f32.mxu0 %v336_v9  ;;  %3911 = vmatpush1.bf16.msra.mxu0 %v3910_v7  ;;  %v401_v7 = vld [vmem:[%s4987_s11 + $0x348] sm:$0xff]  ;;  %v3931_v11 = vpack.c.bf16 %v795_v4, %v794_v3 }
 0x141   : > { %3912 = vmatprep.subr.bf16.mxu0 %v4763_v0  ;;  %v321_v9 = vld [vmem:[%s4987_s11 + $0xc8] sm:$0xff] }
 0x142   : > { %1132 = vmatmul.mubr.f32.gmra.mrb[54].mxu1 %v593_v14  ;;  %v797_v14 = vld [vmem:[%s7276_s1 + $0x4a8] sm:$0xff] }
 0x143   : > { %1687 = vmatmul.mubr.f32.gmra.mrb[6].mxu0 %v335_v15  ;;  %1136 = vmatprep.mubr.f32.mxu1 %v605_v16  ;;  %v320_v15 = vld [vmem:[%s4987_s11 + $0xc0] sm:$0xff]  ;;  %v489_v3 = vld [vmem:[%s4987_s11 + $0x608] sm:$0xff] }
 0x144   : > { %1691 = vmatprep.mubr.f32.mxu0 %v347_v19  ;;  %3914 = vmatpush1.bf16.msra.mxu0 %v3913_v17  ;;  %v412_v16 = vld [vmem:[%s4987_s11 + $0x3a0] sm:$0xff]  ;;  %v409_v4 = vld [vmem:[%s4987_s11 + $0x388] sm:$0xff] }
 0x145   : > { %3915 = vmatprep.subr.bf16.mxu0 %v4763_v0  ;;  %v332_v17 = vld [vmem:[%s4987_s11 + $0x120] sm:$0xff] }
 0x146   : > { %1137 = vmatmul.mubr.f32.gmra.mrb[56].mxu1 %v604_v23  ;;  %v424_v19 = vld [vmem:[%s4987_s11 + $0x400] sm:$0xff]  ;;  %v799_v23 = vld [vmem:[%s7276_s1 + $0x4b8] sm:$0xff] }
 0x147   : > { %1692 = vmatmul.mubr.f32.gmra.mrb[8].mxu0 %v346_v25  ;;  %1141 = vmatprep.mubr.f32.mxu1 %v616_v26  ;;  %v423_v25 = vld [vmem:[%s4987_s11 + $0x3f8] sm:$0xff] }
 0x148   : > { %1696 = vmatprep.mubr.f32.mxu0 %v358_v29  ;;  %3917 = vmatpush1.bf16.msra.mxu0 %v3916_v28  ;;  %v343_v26 = vld [vmem:[%s4987_s11 + $0x178] sm:$0xff]  ;;  %v3937_v29 = vpack.c.bf16 %v799_v23, %v798_v22  ;;  %v545_v22 = vld [vmem:[%s4987_s11 + $0x7c8] sm:$0xff]  ;;  %v544_v23 = vld [vmem:[%s4987_s11 + $0x7c0] sm:$0xff] }
 0x149   : > { %3918 = vmatprep.subr.bf16.mxu0 %v4763_v0  ;;  %v435_v28 = vld [vmem:[%s4987_s11 + $0x458] sm:$0xff] }
 0x14a   : > { %1142 = vmatmul.mubr.f32.gmra.mrb[58].mxu1 %v615_v33  ;;  %v434_v33 = vld [vmem:[%s4987_s11 + $0x450] sm:$0xff] }
 0x14b   : > { %1697 = vmatmul.mubr.f32.gmra.mrb[10].mxu0 %v357_v35  ;;  %1146 = vmatprep.mubr.f32.mxu1 %v627_v37  ;;  %v354_v35 = vld [vmem:[%s4987_s11 + $0x1d0] sm:$0xff] }
 0x14c   : > { %1701 = vmatprep.mubr.f32.mxu0 %v369_v39  ;;  %3920 = vmatpush1.bf16.msra.mxu0 %v3919_v38  ;;  %v446_v37 = vld [vmem:[%s4987_s11 + $0x4b0] sm:$0xff]  ;;  %v3940_v38 = vpack.c.bf16 %v801_v32, %v800_v31  ;;  %v567_v31 = vld [vmem:[%s4987_s11 + $0x878] sm:$0xff] }
 0x14d   : > { %3921 = vmatprep.subr.bf16.mxu0 %v4763_v0  ;;  %v802_v39 = vld [vmem:[%s7276_s1 + $0x4d0] sm:$0xff] }
 0x14e   : > { %1147 = vmatmul.mubr.f32.gmra.mrb[60].mxu1 %v626_v43  ;;  %v365_v43 = vld [vmem:[%s4987_s11 + $0x228] sm:$0xff] }
 0x14f   : > { %1702 = vmatmul.mubr.f32.gmra.mrb[12].mxu0 %v368_v45  ;;  %1151 = vmatprep.mubr.f32.mxu1 %v638_v46  ;;  %v457_v45 = vld [vmem:[%s4987_s11 + $0x508] sm:$0xff]  ;;  %v3943_v46 = vpack.c.bf16 %v803_v40, %v802_v39  ;;  %v588_v40 = vld [vmem:[%s4987_s11 + $0x920] sm:$0xff] }
 0x150   : > { %1706 = vmatprep.mubr.f32.mxu0 %v380_v48  ;;  %3923 = vmatpush1.bf16.msra.mxu0 %v3922_v47  ;;  %v804_v47 = vld [vmem:[%s7276_s1 + $0x4e0] sm:$0xff]  ;;  %v805_v48 = vld [vmem:[%s7276_s1 + $0x4e8] sm:$0xff] }
 0x151   : > { %3924 = vmatprep.subr.bf16.mxu0 %v4763_v0  ;;  %v589_v39 = vld [vmem:[%s4987_s11 + $0x928] sm:$0xff] }
 0x152   : > { %1152 = vmatmul.mubr.f32.gmra.mrb[62].mxu1 %v637_v52  ;;  %v468_v52 = vld [vmem:[%s4987_s11 + $0x560] sm:$0xff] }
 0x153   : > { %1707 = vmatmul.mubr.f32.gmra.mrb[14].mxu0 %v379_v53  ;;  %1221 = vmatprep.mubr.f32.mxu1 %v299_v54  ;;  %v3946_v53 = vpack.c.bf16 %v805_v48, %v804_v47  ;;  %v806_v54 = vld [vmem:[%s7276_s1 + $0x4f0] sm:$0xff]  ;;  %v611_v47 = vld [vmem:[%s4987_s11 + $0x9d8] sm:$0xff] }
 0x154   : > { %1711 = vmatprep.mubr.f32.mxu0 %v391_v57  ;;  %3926 = vmatpush1.bf16.msra.mxu0 %v3925_v55  ;;  %v807_v55 = vld [vmem:[%s7276_s1 + $0x4f8] sm:$0xff]  ;;  %v518_v48 = vld [vmem:[%s4987_s11 + $0x6f0] sm:$0xff] }
 0x155   : > { %3927 = vmatprep.subr.bf16.mxu0 %v4763_v0  ;;  %v467_v57 = vld [vmem:[%s4987_s11 + $0x558] sm:$0xff] }
 0x156   : > { %1222 = vmatmul.mubr.f32.vlgmr.msra.gmra.mrb[0].mxu1 %v298_v60  ;;  %v3949_v60 = vpack.c.bf16 %v807_v55, %v806_v54  ;;  %v541_v54 = vld [vmem:[%s4987_s11 + $0x7a8] sm:$0xff] }
 0x157   : > { %1712 = vmatmul.mubr.f32.gmra.mrb[16].mxu0 %v390_v61  ;;  %4001 = vmatpush1.bf16.msra.mxu1 %v5021_v8  ;;  %v796_v8 = vld [vmem:[%s7276_s1 + $0x4a0] sm:$0xff]  ;;  %v386_v61 = vld [vmem:[%s4987_s11 + $0x2d0] sm:$0xff]  ;;  %v633_v55 = vld [vmem:[%s4987_s11 + $0xa88] sm:$0xff] }
 0x158   : > { %1226 = vmatprep.mubr.f32.mxu1 %v310_v63  ;;  %1716 = vmatprep.mubr.f32.mxu0 %v402_v1  ;;  %v3934_v21 = vpack.c.bf16 %v797_v14, %v796_v8  ;;  %v478_v63 = vld [vmem:[%s4987_s11 + $0x5b0] sm:$0xff]  ;;  %v431_v8 = vld [vmem:[%s4987_s11 + $0x438] sm:$0xff] }
 0x159   : > { %3986 = vmatprep.subr.bf16.mxu1 %v4763_v0  ;;  %3929 = vmatpush1.bf16.msra.mxu0 %v3928_v2  ;;  %v398_v1 = vld [vmem:[%s4987_s11 + $0x330] sm:$0xff]  ;;  %v397_v2 = vld [vmem:[%s4987_s11 + $0x328] sm:$0xff]  ;;  %v523_v14 = vld [vmem:[%s4987_s11 + $0x718] sm:$0xff] }
 0x15a   : > { %1227 = vmatmul.mubr.f32.gmra.mrb[2].mxu1 %v309_v6  ;;  %3930 = vmatprep.subr.bf16.mxu0 %v4763_v0  ;;  %v501_v6 = vld [vmem:[%s4987_s11 + $0x668] sm:$0xff] }
 0x15b   : > { %1717 = vmatmul.mubr.f32.gmra.mrb[18].mxu0 %v401_v7  ;;  %1231 = vmatprep.mubr.f32.mxu1 %v321_v9  ;;  %v500_v7 = vld [vmem:[%s4987_s11 + $0x660] sm:$0xff] }
 0x15c   : > { %1721 = vmatprep.mubr.f32.mxu0 %v413_v10  ;;  %4002 = vmatpush1.bf16.msra.mxu1 %v5031_v12  ;;  %v331_v12 = vld [vmem:[%s4987_s11 + $0x118] sm:$0xff]  ;;  %v420_v9 = vld [vmem:[%s4987_s11 + $0x3e0] sm:$0xff] }
 0x15d   : > { %3987 = vmatprep.subr.bf16.mxu1 %v4763_v0  ;;  %3932 = vmatpush1.bf16.msra.mxu0 %v3931_v11  ;;  %v512_v10 = vld [vmem:[%s4987_s11 + $0x6c0] sm:$0xff]  ;;  %v511_v11 = vld [vmem:[%s4987_s11 + $0x6b8] sm:$0xff] }
 0x15e   : > { %1232 = vmatmul.mubr.f32.gmra.mrb[4].mxu1 %v320_v15  ;;  %3933 = vmatprep.subr.bf16.mxu0 %v4763_v0  ;;  %v522_v15 = vld [vmem:[%s4987_s11 + $0x710] sm:$0xff] }
 0x15f   : > { %1722 = vmatmul.mubr.f32.gmra.mrb[20].mxu0 %v412_v16  ;;  %1236 = vmatprep.mubr.f32.mxu1 %v332_v17  ;;  %v442_v16 = vld [vmem:[%s4987_s11 + $0x490] sm:$0xff] }
 0x160   : > { %1726 = vmatprep.mubr.f32.mxu0 %v424_v19  ;;  %4003 = vmatpush1.bf16.msra.mxu1 %v5048_v18  ;;  %v342_v18 = vld [vmem:[%s4987_s11 + $0x170] sm:$0xff]  ;;  %v533_v19 = vld [vmem:[%s4987_s11 + $0x768] sm:$0xff] }
 0x161   : > { %3988 = vmatprep.subr.bf16.mxu1 %v4763_v0  ;;  %3935 = vmatpush1.bf16.msra.mxu0 %v3934_v21  ;;  %v534_v17 = vld [vmem:[%s4987_s11 + $0x770] sm:$0xff]  ;;  %v453_v21 = vld [vmem:[%s4987_s11 + $0x4e8] sm:$0xff] }
 0x162   : > { %1237 = vmatmul.mubr.f32.gmra.mrb[6].mxu1 %v331_v12  ;;  %3936 = vmatprep.subr.bf16.mxu0 %v4763_v0  ;;  %v464_v12 = vld [vmem:[%s4987_s11 + $0x540] sm:$0xff] }
 0x163   : > { %1727 = vmatmul.mubr.f32.gmra.mrb[22].mxu0 %v423_v25  ;;  %1241 = vmatprep.mubr.f32.mxu1 %v343_v26  ;;  %v556_v25 = vld [vmem:[%s4987_s11 + $0x820] sm:$0xff]  ;;  %v809_v26 = vld [vmem:[%s7276_s1 + $0x508] sm:$0xff] }
 0x164   : > { %1731 = vmatprep.mubr.f32.mxu0 %v435_v28  ;;  %4004 = vmatpush1.bf16.msra.mxu1 %v5065_v24  ;;  %v353_v24 = vld [vmem:[%s4987_s11 + $0x1c8] sm:$0xff]  ;;  %v463_v28 = vld [vmem:[%s4987_s11 + $0x538] sm:$0xff] }
 0x165   : > { %3989 = vmatprep.subr.bf16.mxu1 %v4763_v0  ;;  %3938 = vmatpush1.bf16.msra.mxu0 %v3937_v29  ;;  %v475_v29 = vld [vmem:[%s4987_s11 + $0x598] sm:$0xff] }
 0x166   : > { %1242 = vmatmul.mubr.f32.gmra.mrb[8].mxu1 %v342_v18  ;;  %3939 = vmatprep.subr.bf16.mxu0 %v4763_v0  ;;  %v474_v18 = vld [vmem:[%s4987_s11 + $0x590] sm:$0xff] }
 0x167   : > { %1732 = vmatmul.mubr.f32.gmra.mrb[24].mxu0 %v434_v33  ;;  %1246 = vmatprep.mubr.f32.mxu1 %v354_v35  ;;  %v566_v33 = vld [vmem:[%s4987_s11 + $0x870] sm:$0xff] }
 0x168   : > { %1736 = vmatprep.mubr.f32.mxu0 %v446_v37  ;;  %4005 = vmatpush1.bf16.msra.mxu1 %v5082_v30  ;;  %v364_v30 = vld [vmem:[%s4987_s11 + $0x220] sm:$0xff]  ;;  %v486_v35 = vld [vmem:[%s4987_s11 + $0x5f0] sm:$0xff]  ;;  %v577_v37 = vld [vmem:[%s4987_s11 + $0x8c8] sm:$0xff] }
 0x169   : > { %3990 = vmatprep.subr.bf16.mxu1 %v4763_v0  ;;  %3941 = vmatpush1.bf16.msra.mxu0 %v3940_v38  ;;  %v497_v38 = vld [vmem:[%s4987_s11 + $0x648] sm:$0xff] }
 0x16a   : > { %1247 = vmatmul.mubr.f32.gmra.mrb[10].mxu1 %v353_v24  ;;  %3942 = vmatprep.subr.bf16.mxu0 %v4763_v0  ;;  %v508_v24 = vld [vmem:[%s4987_s11 + $0x6a0] sm:$0xff] }
 0x16b   : > { %1737 = vmatmul.mubr.f32.gmra.mrb[26].mxu0 %v445_v42  ;;  %1251 = vmatprep.mubr.f32.mxu1 %v365_v43  ;;  %v600_v42 = vld [vmem:[%s4987_s11 + $0x980] sm:$0xff]  ;;  %v507_v43 = vld [vmem:[%s4987_s11 + $0x698] sm:$0xff] }
 0x16c   : > { %1741 = vmatprep.mubr.f32.mxu0 %v457_v45  ;;  %4006 = vmatpush1.bf16.msra.mxu1 %v5099_v36  ;;  %v375_v36 = vld [vmem:[%s4987_s11 + $0x278] sm:$0xff] }
 0x16d   : > { %3991 = vmatprep.subr.bf16.mxu1 %v4763_v0  ;;  %3944 = vmatpush1.bf16.msra.mxu0 %v3943_v46  ;;  %v599_v45 = vld [vmem:[%s4987_s11 + $0x978] sm:$0xff] }
 0x16e   : > { %1252 = vmatmul.mubr.f32.gmra.mrb[12].mxu1 %v364_v30  ;;  %3945 = vmatprep.subr.bf16.mxu0 %v4763_v0  ;;  %v519_v46 = vld [vmem:[%s4987_s11 + $0x6f8] sm:$0xff]  ;;  %v610_v30 = vld [vmem:[%s4987_s11 + $0x9d0] sm:$0xff] }
 0x16f   : > { %1742 = vmatmul.mubr.f32.gmra.mrb[28].mxu0 %v456_v49  ;;  %1256 = vmatprep.mubr.f32.mxu1 %v376_v51  ;;  %v530_v49 = vld [vmem:[%s4987_s11 + $0x750] sm:$0xff] }
 0x170   : > { %1746 = vmatprep.mubr.f32.mxu0 %v468_v52  ;;  %4007 = vmatpush1.bf16.msra.mxu1 %v5118_v44  ;;  %v490_v44 = vld [vmem:[%s4987_s11 + $0x610] sm:$0xff]  ;;  %v529_v52 = vld [vmem:[%s4987_s11 + $0x748] sm:$0xff] }
 0x171   : > { %3992 = vmatprep.subr.bf16.mxu1 %v4763_v0  ;;  %3947 = vmatpush1.bf16.msra.mxu0 %v3946_v53  ;;  %v622_v51 = vld [vmem:[%s4987_s11 + $0xa30] sm:$0xff]  ;;  %v621_v53 = vld [vmem:[%s4987_s11 + $0xa28] sm:$0xff] }
 0x172   : > { %1257 = vmatmul.mubr.f32.gmra.mrb[14].mxu1 %v375_v36  ;;  %3948 = vmatprep.subr.bf16.mxu0 %v4763_v0  ;;  %v540_v36 = vld [vmem:[%s4987_s11 + $0x7a0] sm:$0xff] }
 0x173   : > { %1747 = vmatmul.mubr.f32.gmra.mrb[30].mxu0 %v467_v57  ;;  %1261 = vmatprep.mubr.f32.mxu1 %v387_v58  ;;  %v632_v57 = vld [vmem:[%s4987_s11 + $0xa80] sm:$0xff] }
 0x174   : > { %1751 = vmatprep.mubr.f32.mxu0 %v479_v59  ;;  %4008 = vmatpush1.bf16.msra.mxu1 %v5135_v50  ;;  %v408_v50 = vld [vmem:[%s4987_s11 + $0x380] sm:$0xff] }
 0x175   : > { %3993 = vmatprep.subr.bf16.mxu1 %v4763_v0  ;;  %3950 = vmatpush1.bf16.msra.mxu0 %v3949_v60  ;;  %v552_v58 = vld [vmem:[%s4987_s11 + $0x800] sm:$0xff]  ;;  %v551_v60 = vld [vmem:[%s4987_s11 + $0x7f8] sm:$0xff] }
 0x176   : > { %1262 = vmatmul.mubr.f32.gmra.mrb[16].mxu1 %v386_v61  ;;  %v644_v59 = vld [vmem:[%s4987_s11 + $0xae0] sm:$0xff]  ;;  %v643_v61 = vld [vmem:[%s4987_s11 + $0xad8] sm:$0xff] }
 0x177   : > { %1752 = vmatmul.mubr.f32.gmra.mrb[32].mxu0 %v478_v63  ;;  %1266 = vmatprep.mubr.f32.mxu1 %v398_v1  ;;  %v563_v63 = vld [vmem:[%s4987_s11 + $0x858] sm:$0xff]  ;;  %v305_v1 = vld [vmem:[%s4987_s11 + $0x48] sm:$0xff] }
 0x178   : > { %1756 = vmatprep.mubr.f32.mxu0 %v490_v44  ;;  %4009 = vmatpush1.bf16.msra.mxu1 %v5152_v56  ;;  %v419_v56 = vld [vmem:[%s4987_s11 + $0x3d8] sm:$0xff]  ;;  %v562_v44 = vld [vmem:[%s4987_s11 + $0x850] sm:$0xff] }
 0x179   : > { %3994 = vmatprep.subr.bf16.mxu1 %v4763_v0 }
 0x17a   : > { %1267 = vmatmul.mubr.f32.gmra.mrb[18].mxu1 %v397_v2  ;;  %v304_v2 = vld [vmem:[%s4987_s11 + $0x40] sm:$0xff] }
 0x17b   : > { %1757 = vmatmul.mubr.f32.gmra.mrb[34].mxu0 %v489_v3  ;;  %1271 = vmatprep.mubr.f32.mxu1 %v409_v4  ;;  %v574_v3 = vld [vmem:[%s4987_s11 + $0x8b0] sm:$0xff]  ;;  %v316_v4 = vld [vmem:[%s4987_s11 + $0xa0] sm:$0xff] }
 0x17c   : > { %1761 = vmatprep.mubr.f32.mxu0 %v501_v6  ;;  %4010 = vmatpush1.bf16.msra.mxu1 %v5169_v62  ;;  %v430_v62 = vld [vmem:[%s4987_s11 + $0x430] sm:$0xff]  ;;  %v573_v6 = vld [vmem:[%s4987_s11 + $0x8a8] sm:$0xff] }
 0x17d   : > { %3995 = vmatprep.subr.bf16.mxu1 %v4763_v0 }
 0x17e   : > { %1272 = vmatmul.mubr.f32.gmra.mrb[20].mxu1 %v408_v50  ;;  %v315_v50 = vld [vmem:[%s4987_s11 + $0x98] sm:$0xff] }
 0x17f   : > { %1762 = vmatmul.mubr.f32.gmra.mrb[36].mxu0 %v500_v7  ;;  %1276 = vmatprep.mubr.f32.mxu1 %v420_v9  ;;  %v585_v7 = vld [vmem:[%s4987_s11 + $0x908] sm:$0xff]  ;;  %v327_v9 = vld [vmem:[%s4987_s11 + $0xf8] sm:$0xff] }
 0x180   : > { %1766 = vmatprep.mubr.f32.mxu0 %v512_v10  ;;  %4011 = vmatpush1.bf16.msra.mxu1 %v5186_v5  ;;  %v441_v5 = vld [vmem:[%s4987_s11 + $0x488] sm:$0xff]  ;;  %v584_v10 = vld [vmem:[%s4987_s11 + $0x900] sm:$0xff] }
 0x181   : > { %3996 = vmatprep.subr.bf16.mxu1 %v4763_v0 }
 0x182   : > { %1277 = vmatmul.mubr.f32.gmra.mrb[22].mxu1 %v419_v56  ;;  %v326_v56 = vld [vmem:[%s4987_s11 + $0xf0] sm:$0xff] }
 0x183   : > { %1767 = vmatmul.mubr.f32.gmra.mrb[38].mxu0 %v511_v11  ;;  %1281 = vmatprep.mubr.f32.mxu1 %v431_v8  ;;  %v596_v11 = vld [vmem:[%s4987_s11 + $0x960] sm:$0xff]  ;;  %v338_v8 = vld [vmem:[%s4987_s11 + $0x150] sm:$0xff] }
 0x184   : > { %1771 = vmatprep.mubr.f32.mxu0 %v523_v14  ;;  %4012 = vmatpush1.bf16.msra.mxu1 %v5203_v13  ;;  %v452_v13 = vld [vmem:[%s4987_s11 + $0x4e0] sm:$0xff]  ;;  %v595_v14 = vld [vmem:[%s4987_s11 + $0x958] sm:$0xff] }
 0x185   : > { %3997 = vmatprep.subr.bf16.mxu1 %v4763_v0 }
 0x186   : > { %1282 = vmatmul.mubr.f32.gmra.mrb[24].mxu1 %v430_v62  ;;  %v337_v62 = vld [vmem:[%s4987_s11 + $0x148] sm:$0xff] }
 0x187   : > { %1772 = vmatmul.mubr.f32.gmra.mrb[40].mxu0 %v522_v15  ;;  %1286 = vmatprep.mubr.f32.mxu1 %v442_v16  ;;  %v607_v15 = vld [vmem:[%s4987_s11 + $0x9b8] sm:$0xff]  ;;  %v349_v16 = vld [vmem:[%s4987_s11 + $0x1a8] sm:$0xff] }
 0x188   : > { %1776 = vmatprep.mubr.f32.mxu0 %v534_v17  ;;  %4013 = vmatpush1.bf16.msra.mxu1 %v5220_v20  ;;  %v808_v20 = vld [vmem:[%s7276_s1 + $0x500] sm:$0xff]  ;;  %v606_v17 = vld [vmem:[%s4987_s11 + $0x9b0] sm:$0xff] }
 0x189   : > { %3998 = vmatprep.subr.bf16.mxu1 %v4763_v0  ;;  %v5840_v32 = vpack.c.bf16 %v809_v26, %v808_v20  ;;  %v370_v20 = vld [vmem:[%s4987_s11 + $0x250] sm:$0xff]  ;;  %v640_v26 = vld [vmem:[%s4987_s11 + $0xac0] sm:$0xff] }
 0x18a   : > { %1287 = vmatmul.mubr.f32.gmra.mrb[26].mxu1 %v441_v5  ;;  %v348_v5 = vld [vmem:[%s4987_s11 + $0x1a0] sm:$0xff] }
 0x18b   : > { %1777 = vmatmul.mubr.f32.gmra.mrb[42].mxu0 %v533_v19  ;;  %1291 = vmatprep.mubr.f32.mxu1 %v453_v21  ;;  %v618_v19 = vld [vmem:[%s4987_s11 + $0xa10] sm:$0xff]  ;;  %v360_v21 = vld [vmem:[%s4987_s11 + $0x200] sm:$0xff] }
 0x18c   : > { %1781 = vmatprep.mubr.f32.mxu0 %v545_v22  ;;  %4014 = vmatpush1.bf16.msra.mxu1 %v5237_v27  ;;  %v555_v27 = vld [vmem:[%s4987_s11 + $0x818] sm:$0xff]  ;;  %v617_v22 = vld [vmem:[%s4987_s11 + $0xa08] sm:$0xff] }
 0x18d   : > { %3999 = vmatprep.subr.bf16.mxu1 %v4763_v0 }
 0x18e   : > { %1292 = vmatmul.mubr.f32.gmra.mrb[28].mxu1 %v452_v13  ;;  %v359_v13 = vld [vmem:[%s4987_s11 + $0x1f8] sm:$0xff] }
 0x18f   : > { %1782 = vmatmul.mubr.f32.gmra.mrb[44].mxu0 %v544_v23  ;;  %1296 = vmatprep.mubr.f32.mxu1 %v464_v12  ;;  %v629_v23 = vld [vmem:[%s4987_s11 + $0xa68] sm:$0xff]  ;;  %v371_v12 = vld [vmem:[%s4987_s11 + $0x258] sm:$0xff] }
 0x190   : > { %1786 = vmatprep.mubr.f32.mxu0 %v556_v25  ;;  %4015 = vmatpush1.bf16.msra.mxu1 %v5254_v34  ;;  %v578_v34 = vld [vmem:[%s4987_s11 + $0x8d0] sm:$0xff]  ;;  %v628_v25 = vld [vmem:[%s4987_s11 + $0xa60] sm:$0xff] }
 0x191   : > { %4000 = vmatprep.subr.bf16.mxu1 %v4763_v0  ;;  %v485_v0 = vld [vmem:[%s4987_s11 + $0x5e8] sm:$0xff] }
 0x192   : > { %1297 = vmatmul.mubr.f32.gmra.mrb[30].mxu1 %v463_v28  ;;  %v382_v28 = vld [vmem:[%s4987_s11 + $0x2b0] sm:$0xff] }
 0x193   : > { %1787 = vmatmul.mubr.f32.gmra.mrb[46].mxu0 %v555_v27  ;;  %1301 = vmatprep.mubr.f32.mxu1 %v475_v29  ;;  %v639_v27 = vld [vmem:[%s4987_s11 + $0xab8] sm:$0xff]  ;;  %v381_v29 = vld [vmem:[%s4987_s11 + $0x2a8] sm:$0xff] }
 0x194   : > { %1791 = vmatprep.mubr.f32.mxu0 %v567_v31  ;;  %4016 = vmatpush1.bf16.msra.mxu1 %v5271_v41  ;;  %v496_v41 = vld [vmem:[%s4987_s11 + $0x640] sm:$0xff]  ;;  %v565_v31 = vld [vmem:[%s4987_s11 + $0x868] sm:$0xff] }
 0x195   : > { %3952 = vmatprep.subr.bf16.mxu1 %v5840_v32 }
 0x196   : > { %1302 = vmatmul.mubr.f32.gmra.mrb[32].mxu1 %v474_v18  ;;  %v393_v18 = vld [vmem:[%s4987_s11 + $0x308] sm:$0xff] }
 0x197   : > { %1792 = vmatmul.mubr.f32.gmra.mrb[48].mxu0 %v566_v33  ;;  %1306 = vmatprep.mubr.f32.mxu1 %v486_v35  ;;  %v810_v33 = vld [vmem:[%s7276_s1 + $0x510] sm:$0xff]  ;;  %v811_v35 = vld [vmem:[%s7276_s1 + $0x518] sm:$0xff] }
 0x198   : > { %1796 = vmatprep.mubr.f32.mxu0 %v578_v34  ;;  %v564_v34 = vld [vmem:[%s4987_s11 + $0x860] sm:$0xff] }
 0x19a   : > { %1307 = vmatmul.mubr.f32.gmra.mrb[34].mxu1 %v485_v0  ;;  %v392_v0 = vld [vmem:[%s4987_s11 + $0x300] sm:$0xff] }
 0x19b   : > { %1797 = vmatmul.mubr.f32.gmra.mrb[50].mxu0 %v577_v37  ;;  %1311 = vmatprep.mubr.f32.mxu1 %v497_v38  ;;  %v576_v37 = vld [vmem:[%s4987_s11 + $0x8c0] sm:$0xff] }
 0x19c   : > { %1801 = vmatprep.mubr.f32.mxu0 %v589_v39  ;;  %v404_v38 = vld [vmem:[%s4987_s11 + $0x360] sm:$0xff]  ;;  %v3955_v39 = vpack.c.bf16 %v811_v35, %v810_v33  ;;  %v514_v33 = vld [vmem:[%s4987_s11 + $0x6d0] sm:$0xff]  ;;  %v383_v35 = vld [vmem:[%s4987_s11 + $0x2b8] sm:$0xff] }
 0x19e   : > { %1312 = vmatmul.mubr.f32.gmra.mrb[36].mxu1 %v496_v41  ;;  %v812_v41 = vld [vmem:[%s7276_s1 + $0x520] sm:$0xff] }
 0x19f   : > { %1802 = vmatmul.mubr.f32.gmra.mrb[52].mxu0 %v588_v40  ;;  %1316 = vmatprep.mubr.f32.mxu1 %v508_v24  ;;  %v813_v40 = vld [vmem:[%s7276_s1 + $0x528] sm:$0xff]  ;;  %v575_v24 = vld [vmem:[%s4987_s11 + $0x8b8] sm:$0xff] }
 0x1a0   : > { %1806 = vmatprep.mubr.f32.mxu0 %v600_v42  ;;  %v403_v42 = vld [vmem:[%s4987_s11 + $0x358] sm:$0xff] }
 0x1a2   : > { %1317 = vmatmul.mubr.f32.gmra.mrb[38].mxu1 %v507_v43  ;;  %v587_v43 = vld [vmem:[%s4987_s11 + $0x918] sm:$0xff] }
 0x1a3   : > { %1807 = vmatmul.mubr.f32.gmra.mrb[54].mxu0 %v599_v45  ;;  %1321 = vmatprep.mubr.f32.mxu1 %v519_v46  ;;  %v415_v45 = vld [vmem:[%s4987_s11 + $0x3b8] sm:$0xff]  ;;  %v3959_v46 = vpack.c.bf16 %v813_v40, %v812_v41  ;;  %v416_v41 = vld [vmem:[%s4987_s11 + $0x3c0] sm:$0xff] }
 0x1a4   : > { %1811 = vmatprep.mubr.f32.mxu0 %v611_v47  ;;  %v814_v47 = vld [vmem:[%s7276_s1 + $0x530] sm:$0xff]  ;;  %v536_v40 = vld [vmem:[%s4987_s11 + $0x780] sm:$0xff] }
 0x1a6   : > { %1322 = vmatmul.mubr.f32.gmra.mrb[40].mxu1 %v518_v48  ;;  %v586_v48 = vld [vmem:[%s4987_s11 + $0x910] sm:$0xff] }
 0x1a7   : > { %1812 = vmatmul.mubr.f32.gmra.mrb[56].mxu0 %v610_v30  ;;  %1326 = vmatprep.mubr.f32.mxu1 %v530_v49  ;;  %v414_v30 = vld [vmem:[%s4987_s11 + $0x3b0] sm:$0xff] }
 0x1a8   : > { %1816 = vmatprep.mubr.f32.mxu0 %v622_v51  ;;  %v598_v49 = vld [vmem:[%s4987_s11 + $0x970] sm:$0xff] }
 0x1a9   : > { %v426_v51 = vld [vmem:[%s4987_s11 + $0x410] sm:$0xff] }
 0x1aa   : > { %1327 = vmatmul.mubr.f32.gmra.mrb[42].mxu1 %v529_v52 }
 0x1ab   : > { %1817 = vmatmul.mubr.f32.gmra.mrb[58].mxu0 %v621_v53  ;;  %1331 = vmatprep.mubr.f32.mxu1 %v541_v54  ;;  %v816_v53 = vld [vmem:[%s7276_s1 + $0x540] sm:$0xff]  ;;  %v817_v54 = vld [vmem:[%s7276_s1 + $0x548] sm:$0xff] }
 0x1ac   : > { %1821 = vmatprep.mubr.f32.mxu0 %v633_v55  ;;  %v597_v55 = vld [vmem:[%s4987_s11 + $0x968] sm:$0xff] }
 0x1ae   : > { %1332 = vmatmul.mubr.f32.gmra.mrb[44].mxu1 %v540_v36  ;;  %v425_v36 = vld [vmem:[%s4987_s11 + $0x408] sm:$0xff] }
 0x1af   : > { %1822 = vmatmul.mubr.f32.gmra.mrb[60].mxu0 %v632_v57  ;;  %1336 = vmatprep.mubr.f32.mxu1 %v552_v58  ;;  %v609_v57 = vld [vmem:[%s4987_s11 + $0x9c8] sm:$0xff] }
 0x1b0   : > { %1826 = vmatprep.mubr.f32.mxu0 %v644_v59  ;;  %v437_v58 = vld [vmem:[%s4987_s11 + $0x468] sm:$0xff]  ;;  %v3967_v59 = vpack.c.bf16 %v817_v54, %v816_v53  ;;  %v568_v54 = vld [vmem:[%s4987_s11 + $0x880] sm:$0xff] }
 0x1b1   : > { %v493_v53 = vld [vmem:[%s4987_s11 + $0x628] sm:$0xff] }
 0x1b2   : > { %1337 = vmatmul.mubr.f32.gmra.mrb[46].mxu1 %v551_v60  ;;  %v818_v60 = vld [vmem:[%s7276_s1 + $0x550] sm:$0xff] }
 0x1b3   : > { %1827 = vmatmul.mubr.f32.gmra.mrb[62].mxu0 %v643_v61  ;;  %1341 = vmatprep.mubr.f32.mxu1 %v563_v63  ;;  %v819_v61 = vld [vmem:[%s7276_s1 + $0x558] sm:$0xff]  ;;  %v608_v63 = vld [vmem:[%s4987_s11 + $0x9c0] sm:$0xff] }
 0x1b4   : > { %1896 = vmatprep.mubr.f32.mxu0 %v305_v1  ;;  %v436_v1 = vld [vmem:[%s4987_s11 + $0x460] sm:$0xff] }
 0x1b6   : > { %1342 = vmatmul.mubr.f32.gmra.mrb[48].mxu1 %v562_v44  ;;  %v620_v44 = vld [vmem:[%s4987_s11 + $0xa20] sm:$0xff] }
 0x1b7   : > { %1897 = vmatmul.mubr.f32.vlgmr.msra.gmra.mrb[0].mxu0 %v304_v2  ;;  %1346 = vmatprep.mubr.f32.mxu1 %v574_v3  ;;  %v448_v2 = vld [vmem:[%s4987_s11 + $0x4c0] sm:$0xff]  ;;  %v3971_v3 = vpack.c.bf16 %v819_v61, %v818_v60  ;;  %v591_v60 = vld [vmem:[%s4987_s11 + $0x938] sm:$0xff]  ;;  %v537_v61 = vld [vmem:[%s4987_s11 + $0x788] sm:$0xff] }
 0x1b8   : > { %1901 = vmatprep.mubr.f32.mxu0 %v316_v4  ;;  %v820_v4 = vld [vmem:[%s7276_s1 + $0x560] sm:$0xff] }
 0x1ba   : > { %1347 = vmatmul.mubr.f32.gmra.mrb[50].mxu1 %v573_v6  ;;  %v821_v6 = vld [vmem:[%s7276_s1 + $0x568] sm:$0xff] }
 0x1bb   : > { %1902 = vmatmul.mubr.f32.gmra.mrb[2].mxu0 %v315_v50  ;;  %1351 = vmatprep.mubr.f32.mxu1 %v585_v7  ;;  %v619_v50 = vld [vmem:[%s4987_s11 + $0xa18] sm:$0xff] }
 0x1bc   : > { %1906 = vmatprep.mubr.f32.mxu0 %v327_v9  ;;  %v447_v7 = vld [vmem:[%s4987_s11 + $0x4b8] sm:$0xff] }
 0x1bd   : > { %v631_v9 = vld [vmem:[%s4987_s11 + $0xa78] sm:$0xff] }
 0x1be   : > { %1352 = vmatmul.mubr.f32.gmra.mrb[52].mxu1 %v584_v10  ;;  %v459_v10 = vld [vmem:[%s4987_s11 + $0x518] sm:$0xff] }
 0x1bf   : > { %1907 = vmatmul.mubr.f32.gmra.mrb[4].mxu0 %v326_v56  ;;  %1356 = vmatprep.mubr.f32.mxu1 %v596_v11  ;;  %v3975_v56 = vpack.c.bf16 %v821_v6, %v820_v4  ;;  %v822_v11 = vld [vmem:[%s7276_s1 + $0x570] sm:$0xff]  ;;  %v613_v6 = vld [vmem:[%s4987_s11 + $0x9e8] sm:$0xff] }
 0x1c0   : > { %1911 = vmatprep.mubr.f32.mxu0 %v338_v8  ;;  %v823_v8 = vld [vmem:[%s7276_s1 + $0x578] sm:$0x3f]  ;;  %v570_v4 = vld [vmem:[%s4987_s11 + $0x890] sm:$0xff] }
 0x1c2   : > { %1357 = vmatmul.mubr.f32.gmra.mrb[54].mxu1 %v595_v14  ;;  %v630_v14 = vld [vmem:[%s4987_s11 + $0xa70] sm:$0xff] }
 0x1c3   : > { %1912 = vmatmul.mubr.f32.gmra.mrb[6].mxu0 %v337_v62  ;;  %1361 = vmatprep.mubr.f32.mxu1 %v607_v15  ;;  %v458_v62 = vld [vmem:[%s4987_s11 + $0x510] sm:$0xff] }
 0x1c4   : > { %1916 = vmatprep.mubr.f32.mxu0 %v349_v16  ;;  %v642_v15 = vld [vmem:[%s4987_s11 + $0xad0] sm:$0xff] }
 0x1c5   : > { %v470_v16 = vld [vmem:[%s4987_s11 + $0x570] sm:$0xff] }
 0x1c6   : > { %1362 = vmatmul.mubr.f32.gmra.mrb[56].mxu1 %v606_v17  ;;  %v3979_v17 = vpack.c.bf16 %v823_v8, %v822_v11  ;;  %v623_v11 = vld [vmem:[%s4987_s11 + $0xa38] sm:$0xff]  ;;  %v614_v8 = vld [vmem:[%s4987_s11 + $0x9f0] sm:$0xff] }
 0x1c7   : > { %1917 = vmatmul.mubr.f32.gmra.mrb[8].mxu0 %v348_v5  ;;  %1366 = vmatprep.mubr.f32.mxu1 %v618_v19  ;;  %v641_v5 = vld [vmem:[%s4987_s11 + $0xac8] sm:$0xff] }
 0x1c8   : > { %1921 = vmatprep.mubr.f32.mxu0 %v360_v21  ;;  %v469_v19 = vld [vmem:[%s4987_s11 + $0x568] sm:$0xff] }
 0x1c9   : > { %v481_v21 = vld [vmem:[%s4987_s11 + $0x5c8] sm:$0xff] }
 0x1ca   : > { %1367 = vmatmul.mubr.f32.gmra.mrb[58].mxu1 %v617_v22  ;;  %v306_v22 = vld [vmem:[%s4987_s11 + $0x50] sm:$0xff] }
 0x1cb   : > { %1922 = vmatmul.mubr.f32.gmra.mrb[10].mxu0 %v359_v13  ;;  %1371 = vmatprep.mubr.f32.mxu1 %v629_v23  ;;  %v317_v13 = vld [vmem:[%s4987_s11 + $0xa8] sm:$0xff]  ;;  %v480_v23 = vld [vmem:[%s4987_s11 + $0x5c0] sm:$0xff] }
 0x1cc   : > { %1926 = vmatprep.mubr.f32.mxu0 %v371_v12  ;;  %v328_v12 = vld [vmem:[%s4987_s11 + $0x100] sm:$0xff] }
 0x1ce   : > { %1372 = vmatmul.mubr.f32.gmra.mrb[60].mxu1 %v628_v25  ;;  %v492_v25 = vld [vmem:[%s4987_s11 + $0x620] sm:$0xff] }
 0x1cf   : > { %1927 = vmatmul.mubr.f32.gmra.mrb[12].mxu0 %v370_v20  ;;  %1376 = vmatprep.mubr.f32.mxu1 %v640_v26  ;;  %v339_v20 = vld [vmem:[%s4987_s11 + $0x158] sm:$0xff] }
 0x1d0   : > { %1931 = vmatprep.mubr.f32.mxu0 %v382_v28  ;;  %v491_v26 = vld [vmem:[%s4987_s11 + $0x618] sm:$0xff]  ;;  %v350_v28 = vld [vmem:[%s4987_s11 + $0x1b0] sm:$0xff] }
 0x1d2   : > { %1377 = vmatmul.mubr.f32.gmra.mrb[62].mxu1 %v639_v27  ;;  %v503_v27 = vld [vmem:[%s4987_s11 + $0x678] sm:$0xff] }
 0x1d3   : > { %1932 = vmatmul.mubr.f32.gmra.mrb[14].mxu0 %v381_v29  ;;  %1566 = vmatprep.mubr.f32.mxu1 %v565_v31  ;;  %v361_v29 = vld [vmem:[%s4987_s11 + $0x208] sm:$0xff]  ;;  %v502_v31 = vld [vmem:[%s4987_s11 + $0x670] sm:$0xff] }
 0x1d4   : > { %1936 = vmatprep.mubr.f32.mxu0 %v393_v18  ;;  %v372_v18 = vld [vmem:[%s4987_s11 + $0x260] sm:$0xff] }
 0x1d6   : > { %1567 = vmatmul.mubr.f32.vlgmr.msra.gmra.mrb[48].mxu1 %v564_v34  ;;  %v513_v34 = vld [vmem:[%s4987_s11 + $0x6c8] sm:$0xff] }
 0x1d7   : > { %1937 = vmatmul.mubr.f32.gmra.mrb[16].mxu0 %v392_v0  ;;  %3954 = vmatpush3.bf16.msra.mxu1 %v5840_v32  ;;  %v815_v32 = vld [vmem:[%s7276_s1 + $0x538] sm:$0xff]  ;;  %v394_v0 = vld [vmem:[%s4987_s11 + $0x310] sm:$0xff] }
 0x1d8   : > { %1571 = vmatprep.mubr.f32.mxu1 %v576_v37  ;;  %1941 = vmatprep.mubr.f32.mxu0 %v404_v38  ;;  %v3963_v52 = vpack.c.bf16 %v815_v32, %v814_v47  ;;  %v525_v37 = vld [vmem:[%s4987_s11 + $0x728] sm:$0xff]  ;;  %v546_v47 = vld [vmem:[%s4987_s11 + $0x7d0] sm:$0xff]  ;;  %v460_v32 = vld [vmem:[%s4987_s11 + $0x520] sm:$0xff] }
 0x1d9   : > { %3956 = vmatprep.subr.bf16.mxu1 %v3955_v39  ;;  %v405_v38 = vld [vmem:[%s4987_s11 + $0x368] sm:$0xff] }
 0x1da   : > { %1572 = vmatmul.mubr.f32.gmra.mrb[50].mxu1 %v575_v24  ;;  %v427_v24 = vld [vmem:[%s4987_s11 + $0x418] sm:$0xff] }
 0x1db   : > { %1942 = vmatmul.mubr.f32.gmra.mrb[18].mxu0 %v403_v42  ;;  %3958 = vmatpush3.bf16.msra.mxu1 %v3955_v39  ;;  %v524_v39 = vld [vmem:[%s4987_s11 + $0x720] sm:$0xff]  ;;  %v535_v42 = vld [vmem:[%s4987_s11 + $0x778] sm:$0xff] }
 0x1dc   : > { %1576 = vmatprep.mubr.f32.mxu1 %v587_v43  ;;  %1946 = vmatprep.mubr.f32.mxu0 %v415_v45  ;;  %v438_v43 = vld [vmem:[%s4987_s11 + $0x470] sm:$0xff]  ;;  %v547_v45 = vld [vmem:[%s4987_s11 + $0x7d8] sm:$0xff] }
 0x1dd   : > { %3960 = vmatprep.subr.bf16.mxu1 %v3959_v46 }
 0x1de   : > { %1577 = vmatmul.mubr.f32.gmra.mrb[52].mxu1 %v586_v48  ;;  %v558_v48 = vld [vmem:[%s4987_s11 + $0x830] sm:$0xff] }
 0x1df   : > { %1947 = vmatmul.mubr.f32.gmra.mrb[20].mxu0 %v414_v30  ;;  %3962 = vmatpush3.bf16.msra.mxu1 %v3959_v46  ;;  %v449_v46 = vld [vmem:[%s4987_s11 + $0x4c8] sm:$0xff]  ;;  %v471_v30 = vld [vmem:[%s4987_s11 + $0x578] sm:$0xff] }
 0x1e0   : > { %1581 = vmatprep.mubr.f32.mxu1 %v598_v49  ;;  %1951 = vmatprep.mubr.f32.mxu0 %v426_v51  ;;  %v557_v49 = vld [vmem:[%s4987_s11 + $0x828] sm:$0xff]  ;;  %v482_v51 = vld [vmem:[%s4987_s11 + $0x5d0] sm:$0xff] }
 0x1e1   : > { %3964 = vmatprep.subr.bf16.mxu1 %v3963_v52 }
 0x1e2   : > { %1582 = vmatmul.mubr.f32.gmra.mrb[54].mxu1 %v597_v55  ;;  %v504_v55 = vld [vmem:[%s4987_s11 + $0x680] sm:$0xff] }
 0x1e3   : > { %1952 = vmatmul.mubr.f32.gmra.mrb[22].mxu0 %v425_v36  ;;  %3966 = vmatpush3.bf16.msra.mxu1 %v3963_v52  ;;  %v569_v52 = vld [vmem:[%s4987_s11 + $0x888] sm:$0xff]  ;;  %v580_v36 = vld [vmem:[%s4987_s11 + $0x8e0] sm:$0xff] }
 0x1e4   : > { %1586 = vmatprep.mubr.f32.mxu1 %v609_v57  ;;  %1956 = vmatprep.mubr.f32.mxu0 %v437_v58  ;;  %v515_v57 = vld [vmem:[%s4987_s11 + $0x6d8] sm:$0xff] }
 0x1e5   : > { %3968 = vmatprep.subr.bf16.mxu1 %v3967_v59  ;;  %v579_v58 = vld [vmem:[%s4987_s11 + $0x8d8] sm:$0xff] }
 0x1e6   : > { %1587 = vmatmul.mubr.f32.gmra.mrb[56].mxu1 %v608_v63  ;;  %v590_v63 = vld [vmem:[%s4987_s11 + $0x930] sm:$0xff] }
 0x1e7   : > { %1957 = vmatmul.mubr.f32.gmra.mrb[24].mxu0 %v436_v1  ;;  %3970 = vmatpush3.bf16.msra.mxu1 %v3967_v59  ;;  %v526_v59 = vld [vmem:[%s4987_s11 + $0x730] sm:$0xff]  ;;  %v548_v1 = vld [vmem:[%s4987_s11 + $0x7e0] sm:$0xff] }
 0x1e8   : > { %1591 = vmatprep.mubr.f32.mxu1 %v620_v44  ;;  %1961 = vmatprep.mubr.f32.mxu0 %v448_v2  ;;  %v602_v44 = vld [vmem:[%s4987_s11 + $0x990] sm:$0xff]  ;;  %v559_v2 = vld [vmem:[%s4987_s11 + $0x838] sm:$0xff] }
 0x1e9   : > { %3972 = vmatprep.subr.bf16.mxu1 %v3971_v3 }
 0x1ea   : > { %1592 = vmatmul.mubr.f32.gmra.mrb[58].mxu1 %v619_v50  ;;  %v581_v50 = vld [vmem:[%s4987_s11 + $0x8e8] sm:$0xff] }
 0x1eb   : > { %1962 = vmatmul.mubr.f32.gmra.mrb[26].mxu0 %v447_v7  ;;  %3974 = vmatpush3.bf16.msra.mxu1 %v3971_v3  ;;  %v601_v3 = vld [vmem:[%s4987_s11 + $0x988] sm:$0xff]  ;;  %v612_v7 = vld [vmem:[%s4987_s11 + $0x9e0] sm:$0xff] }
 0x1ec   : > { %1596 = vmatprep.mubr.f32.mxu1 %v631_v9  ;;  %1966 = vmatprep.mubr.f32.mxu0 %v459_v10  ;;  %v592_v9 = vld [vmem:[%s4987_s11 + $0x940] sm:$0xff] }
 0x1ed   : > { %3976 = vmatprep.subr.bf16.mxu1 %v3975_v56  ;;  %v624_v10 = vld [vmem:[%s4987_s11 + $0xa40] sm:$0xff] }
 0x1ee   : > { %1597 = vmatmul.mubr.f32.gmra.mrb[60].mxu1 %v630_v14 }
 0x1ef   : > { %1967 = vmatmul.mubr.f32.gmra.mrb[28].mxu0 %v458_v62  ;;  %3978 = vmatpush3.bf16.msra.mxu1 %v3975_v56  ;;  %v603_v56 = vld [vmem:[%s4987_s11 + $0x998] sm:$0xff] }
 0x1f0   : > { %1601 = vmatprep.mubr.f32.mxu1 %v642_v15  ;;  %1971 = vmatprep.mubr.f32.mxu0 %v470_v16  ;;  %v635_v62 = vld [vmem:[%s4987_s11 + $0xa98] sm:$0xff]  ;;  %v625_v16 = vld [vmem:[%s4987_s11 + $0xa48] sm:$0xff] }
 0x1f1   : > { %3981 = vmatprep.subr.msk.bf16.mxu1 %vm3980_vm2, %v3979_v17 }
 0x1f2   : > { %1602 = vmatmul.mubr.f32.gmra.mrb[62].mxu1 %v641_v5  ;;  %v636_v5 = vld [vmem:[%s4987_s11 + $0xaa0] sm:$0xff] }
 0x1f3   : > { %1972 = vmatmul.mubr.f32.gmra.mrb[30].mxu0 %v469_v19  ;;  %3984 = vmatpush3.bf16.msk.msra.mxu1 %vm3980_vm2, %v3979_v17  ;;  %v634_v17 = vld [vmem:[%s4987_s11 + $0xa90] sm:$0xff] }
 0x1f4   : > { %1976 = vmatprep.mubr.f32.mxu0 %v481_v21  ;;  %3663 = vmatprep.mubr.msk.f32.mxu1 %vm831_vm3, %v306_v22  ;;  %v646_v21 = vld [vmem:[%s4987_s11 + $0xaf0] sm:$0xff] }
 0x1f6   : > { %3664 = vmatmul.mubr.msk.f32.vlgmr.msra.gmra.mrb[64].mxu1 %vm831_vm3, %v317_v13  ;;  %v647_v13 = vld [vmem:[%s4987_s11 + $0xaf8] sm:$0xff] }
 0x1f7   : > { %1977 = vmatmul.mubr.f32.gmra.mrb[32].mxu0 %v480_v23  ;;  %3666 = vmatprep.mubr.msk.f32.mxu1 %vm831_vm3, %v328_v12  ;;  %v645_v23 = vld [vmem:[%s4987_s11 + $0xae8] sm:$0xff]  ;;  %s3526_s11 = sshll.u32 %s4983_s6, 8  ;;  %s3564_s6 = sshll.u32 (%p7297_p9), %s4814_s22, 5 }
 0x1f8   : > { %1981 = vmatprep.mubr.f32.mxu0 %v492_v25  ;;  %s6711_s12 = scalar_lea.vmem [#allocation9], %s3526_s11   ;;  %s3138_s25 = ssub.s32 (%p7297_p9), 125, %s3564_s6 }
 0x1f9   : > { %p3139_p12 = scmp.lt.s32.totalorder (%p7297_p9), %s3138_s25, 32 }
 0x1fa   : > { %3667 = vmatmul.mubr.msk.f32.gmra.mrb[66].mxu1 %vm831_vm3, %v339_v20 }
 0x1fb   : > { %1982 = vmatmul.mubr.f32.gmra.mrb[34].mxu0 %v491_v26  ;;  %3669 = vmatprep.mubr.msk.f32.mxu1 %vm831_vm3, %v350_v28 }
 0x1fc   : > { %1986 = vmatprep.mubr.f32.mxu0 %v503_v27 }
 0x1fe   : > { %3670 = vmatmul.mubr.msk.f32.gmra.mrb[68].mxu1 %vm831_vm3, %v361_v29 }
 0x1ff   : > { %1987 = vmatmul.mubr.f32.gmra.mrb[36].mxu0 %v502_v31  ;;  %3672 = vmatprep.mubr.msk.f32.mxu1 %vm831_vm3, %v372_v18 }
 0x200   : > { %1991 = vmatprep.mubr.f32.mxu0 %v514_v33 }
 0x202   : > { %3673 = vmatmul.mubr.msk.f32.gmra.mrb[70].mxu1 %vm831_vm3, %v383_v35 }
 0x203   : > { %1992 = vmatmul.mubr.f32.gmra.mrb[38].mxu0 %v513_v34  ;;  %3675 = vmatprep.mubr.msk.f32.mxu1 %vm831_vm3, %v394_v0 }
 0x204   : > { %1996 = vmatprep.mubr.f32.mxu0 %v525_v37 }
 0x206   : > { %3676 = vmatmul.mubr.msk.f32.gmra.mrb[72].mxu1 %vm831_vm3, %v405_v38 }
 0x207   : > { %1997 = vmatmul.mubr.f32.gmra.mrb[40].mxu0 %v524_v39  ;;  %3678 = vmatprep.mubr.msk.f32.mxu1 %vm831_vm3, %v416_v41 }
 0x208   : > { %2001 = vmatprep.mubr.f32.mxu0 %v536_v40 }
 0x20a   : > { %3679 = vmatmul.mubr.msk.f32.gmra.mrb[74].mxu1 %vm831_vm3, %v427_v24 }
 0x20b   : > { %2002 = vmatmul.mubr.f32.gmra.mrb[42].mxu0 %v535_v42  ;;  %3681 = vmatprep.mubr.msk.f32.mxu1 %vm831_vm3, %v438_v43 }
 0x20c   : > { %2006 = vmatprep.mubr.f32.mxu0 %v547_v45 }
 0x20e   : > { %3682 = vmatmul.mubr.msk.f32.gmra.mrb[76].mxu1 %vm831_vm3, %v449_v46 }
 0x20f   : > { %2007 = vmatmul.mubr.f32.gmra.mrb[44].mxu0 %v546_v47  ;;  %3684 = vmatprep.mubr.msk.f32.mxu1 %vm831_vm3, %v460_v32 }
 0x210   : > { %2011 = vmatprep.mubr.f32.mxu0 %v558_v48 }
 0x212   : > { %3685 = vmatmul.mubr.msk.f32.gmra.mrb[78].mxu1 %vm831_vm3, %v471_v30 }
 0x213   : > { %2012 = vmatmul.mubr.f32.gmra.mrb[46].mxu0 %v557_v49  ;;  %3687 = vmatprep.mubr.msk.f32.mxu1 %vm831_vm3, %v482_v51 }
 0x214   : > { %2016 = vmatprep.mubr.f32.mxu0 %v569_v52 }
 0x216   : > { %3688 = vmatmul.mubr.msk.f32.gmra.mrb[80].mxu1 %vm831_vm3, %v493_v53 }
 0x217   : > { %2017 = vmatmul.mubr.f32.gmra.mrb[48].mxu0 %v568_v54  ;;  %3690 = vmatprep.mubr.msk.f32.mxu1 %vm831_vm3, %v504_v55 }
 0x218   : > { %2021 = vmatprep.mubr.f32.mxu0 %v580_v36 }
 0x21a   : > { %3691 = vmatmul.mubr.msk.f32.gmra.mrb[82].mxu1 %vm831_vm3, %v515_v57 }
 0x21b   : > { %2022 = vmatmul.mubr.f32.gmra.mrb[50].mxu0 %v579_v58  ;;  %3693 = vmatprep.mubr.msk.f32.mxu1 %vm831_vm3, %v526_v59 }
 0x21c   : > { %2026 = vmatprep.mubr.f32.mxu0 %v591_v60 }
 0x21e   : > { %3694 = vmatmul.mubr.msk.f32.gmra.mrb[84].mxu1 %vm831_vm3, %v537_v61 }
 0x21f   : > { %2027 = vmatmul.mubr.f32.gmra.mrb[52].mxu0 %v590_v63  ;;  %3696 = vmatprep.mubr.msk.f32.mxu1 %vm831_vm3, %v548_v1 }
 0x220   : > { %2031 = vmatprep.mubr.f32.mxu0 %v602_v44 }
 0x222   : > { %3697 = vmatmul.mubr.msk.f32.gmra.mrb[86].mxu1 %vm831_vm3, %v559_v2 }
 0x223   : > { %2032 = vmatmul.mubr.f32.gmra.mrb[54].mxu0 %v601_v3  ;;  %3699 = vmatprep.mubr.msk.f32.mxu1 %vm831_vm3, %v570_v4  ;;  %v6113_v3 = vld [vmem:[#allocation4] ss:$0 sm:$0xff] }
 0x224   : > { %2036 = vmatprep.mubr.f32.mxu0 %v613_v6 }
 0x226   : > { %3700 = vmatmul.mubr.msk.f32.gmra.mrb[88].mxu1 %vm831_vm3, %v581_v50 }
 0x227   : > { %2037 = vmatmul.mubr.f32.gmra.mrb[56].mxu0 %v612_v7  ;;  %3702 = vmatprep.mubr.msk.f32.mxu1 %vm831_vm3, %v592_v9 }
 0x228   : > { %2041 = vmatprep.mubr.f32.mxu0 %v624_v10 }
 0x229   : > { %v6065_v14 = vpop.f32.mrb[0].mxu1 }
 0x22a   : > { %v1225_v15 = vpop.f32.mrb[1].mxu1  ;;  %3703 = vmatmul.mubr.msk.f32.gmra.mrb[90].mxu1 %vm831_vm3, %v603_v56  ;;  %v4017_v6 = vadd.f32 %v6113_v3, %v6065_v14 }
 0x22b   : > { %2042 = vmatmul.mubr.f32.gmra.mrb[58].mxu0 %v623_v11  ;;  %3705 = vmatprep.mubr.msk.f32.mxu1 %vm831_vm3, %v614_v8 }
 0x22c   : > { %2046 = vmatprep.mubr.f32.mxu0 %v635_v62 }
 0x22d   : > { %v1228_v19 = vpop.f32.mrb[2].mxu1 }
 0x22e   : > { %v1230_v22 = vpop.f32.mrb[3].mxu1  ;;  %3706 = vmatmul.mubr.msk.f32.gmra.mrb[92].mxu1 %vm831_vm3, %v625_v16  ;;  %v4019_v10 = vadd.f32 %v6113_v3, %v1228_v19 }
 0x22f   : > { %2047 = vmatmul.mubr.f32.gmra.mrb[60].mxu0 %v634_v17  ;;  %3708 = vmatprep.mubr.msk.f32.mxu1 %vm831_vm3, %v636_v5 }
 0x230   : > { %2051 = vmatprep.mubr.f32.mxu0 %v646_v21 }
 0x231   : > { %v1233_v12 = vpop.f32.mrb[4].mxu1 }
 0x232   : > { %v1235_v25 = vpop.f32.mrb[5].mxu1  ;;  %3709 = vmatmul.mubr.msk.f32.gmra.mrb[94].mxu1 %vm831_vm3, %v647_v13  ;;  %v4021_v62 = vadd.f32 %v6113_v3, %v1233_v12 }
 0x233   : > { %2052 = vmatmul.mubr.f32.gmra.mrb[62].mxu0 %v645_v23 }
 0x235   : > { %v1238_v20 = vpop.f32.mrb[6].mxu1 }
 0x236   : > { %v1240_v26 = vpop.f32.mrb[7].mxu1  ;;  %v4023_v5 = vadd.f32 %v6113_v3, %v1238_v20 }
 0x239   : > { %v1243_v28 = vpop.f32.mrb[8].mxu1 }
 0x23a   : > { %v1245_v27 = vpop.f32.mrb[9].mxu1  ;;  %v4025_v13 = vadd.f32 %v6113_v3, %v1243_v28 }
 0x23d   : > { %v1248_v29 = vpop.f32.mrb[10].mxu1 }
 0x23e   : > { %v1250_v31 = vpop.f32.mrb[11].mxu1  ;;  %v4027_v26 = vadd.f32 %v6113_v3, %v1248_v29 }
 0x241   : > { %v1253_v18 = vpop.f32.mrb[12].mxu1 }
 0x242   : > { %v1255_v33 = vpop.f32.mrb[13].mxu1 }
 0x243   : > { %v4029_v33 = vadd.f32 %v6113_v3, %v1253_v18 }
 0x245   : > { %v6079_v35 = vpop.f32.mrb[14].mxu1 }
 0x246   : > { %v1260_v34 = vpop.f32.mrb[15].mxu1 }
 0x249   : > { %v6081_v0 = vpop.f32.mrb[16].mxu1 }
 0x24a   : > { %v1265_v37 = vpop.f32.mrb[17].mxu1  ;;  %v4033_v29 = vadd.f32 %v6113_v3, %v6081_v0 }
 0x24d   : > { %v6083_v38 = vpop.f32.mrb[18].mxu1 }
 0x24e   : > { %v1270_v39 = vpop.f32.mrb[19].mxu1 }
 0x24f   : > { %v4031_v39 = vadd.f32 %v6113_v3, %v6079_v35 }
 0x251   : > { %v6085_v41 = vpop.f32.mrb[20].mxu1 }
 0x252   : > { %v1275_v40 = vpop.f32.mrb[21].mxu1  ;;  %v4037_v0 = vadd.f32 %v6113_v3, %v6085_v41 }
 0x255   : > { %v6087_v24 = vpop.f32.mrb[22].mxu1 }
 0x256   : > { %v1280_v42 = vpop.f32.mrb[23].mxu1 }
 0x259   : > { %v6089_v43 = vpop.f32.mrb[24].mxu1 }
 0x25a   : > { %v1285_v45 = vpop.f32.mrb[25].mxu1  ;;  %v4041_v41 = vadd.f32 %v6113_v3, %v6089_v43 }
 0x25d   : > { %v6091_v46 = vpop.f32.mrb[26].mxu1 }
 0x25e   : > { %v1290_v47 = vpop.f32.mrb[27].mxu1 }
 0x261   : > { %v6093_v32 = vpop.f32.mrb[28].mxu1 }
 0x262   : > { %v1295_v48 = vpop.f32.mrb[29].mxu1  ;;  %v4045_v43 = vadd.f32 %v6113_v3, %v6093_v32 }
 0x265   : > { %v6095_v30 = vpop.f32.mrb[30].mxu1 }
 0x266   : > { %v1300_v49 = vpop.f32.mrb[31].mxu1 }
 0x269   : > { %v6097_v51 = vpop.f32.mrb[32].mxu1 }
 0x26a   : > { %v1305_v52 = vpop.f32.mrb[33].mxu1  ;;  %v4049_v32 = vadd.f32 %v6113_v3, %v6097_v51 }
 0x26b   : > { %v4035_v52 = vadd.f32 %v6113_v3, %v6083_v38  ;;  %v4039_v38 = vadd.f32 %v6113_v3, %v6087_v24  ;;  %v4043_v24 = vadd.f32 %v6113_v3, %v6091_v46  ;;  %v4047_v46 = vadd.f32 %v6113_v3, %v6095_v30 }
 0x26d   : > { %v6099_v53 = vpop.f32.mrb[34].mxu1 }
 0x26e   : > { %v1310_v54 = vpop.f32.mrb[35].mxu1 }
 0x271   : > { %v6101_v55 = vpop.f32.mrb[36].mxu1 }
 0x272   : > { %v1315_v36 = vpop.f32.mrb[37].mxu1 }
 0x275   : > { %v6103_v57 = vpop.f32.mrb[38].mxu1 }
 0x276   : > { %v1320_v58 = vpop.f32.mrb[39].mxu1 }
 0x279   : > { %v6105_v59 = vpop.f32.mrb[40].mxu1 }
 0x27a   : > { %v1325_v60 = vpop.f32.mrb[41].mxu1 }
 0x27d   : > { %v6107_v61 = vpop.f32.mrb[42].mxu1 }
 0x27e   : > { %v1330_v63 = vpop.f32.mrb[43].mxu1 }
 0x281   : > { %v6109_v1 = vpop.f32.mrb[44].mxu1 }
 0x282   : > { %v1335_v44 = vpop.f32.mrb[45].mxu1 }
 0x285   : > { %v6111_v2 = vpop.f32.mrb[46].mxu1 }
 0x286   : > { %v1340_v4 = vpop.f32.mrb[47].mxu1 }
 0x28a   : > { %v1898_v50 = vpop.f32.mrb[0].mxu0 }
 0x28b   : > { %v6117_v7 = vadd.f32 %v4017_v6, %v1898_v50  ;;  %v1900_v9 = vpop.f32.mrb[1].mxu0 }
 0x28e   : > { %v1903_v56 = vpop.f32.mrb[2].mxu0 }
 0x28f   : > { %v6120_v11 = vadd.f32 %v4019_v10, %v1903_v56  ;;  %v1905_v8 = vpop.f32.mrb[3].mxu0 }
 0x292   : > { %v1908_v15 = vpop.f32.mrb[4].mxu0 }
 0x293   : > { %v6123_v16 = vadd.f32 %v4021_v62, %v1908_v15  ;;  %v1910_v17 = vpop.f32.mrb[5].mxu0 }
 0x296   : > { %v1913_v21 = vpop.f32.mrb[6].mxu0 }
 0x297   : > { %v6126_v14 = vadd.f32 %v4023_v5, %v1913_v21  ;;  %v1915_v22 = vpop.f32.mrb[7].mxu0 }
 0x29a   : > { %v1918_v23 = vpop.f32.mrb[8].mxu0 }
 0x29b   : > { %v6129_v19 = vadd.f32 %v4025_v13, %v1918_v23  ;;  %v1920_v25 = vpop.f32.mrb[9].mxu0 }
 0x29e   : > { %v1923_v27 = vpop.f32.mrb[10].mxu0 }
 0x29f   : > { %v6132_v12 = vadd.f32 %v4027_v26, %v1923_v27  ;;  %v1925_v31 = vpop.f32.mrb[11].mxu0 }
 0x2a2   : > { %v1928_v34 = vpop.f32.mrb[12].mxu0 }
 0x2a3   : > { %v6135_v20 = vadd.f32 %v4029_v33, %v1928_v34  ;;  %v1930_v37 = vpop.f32.mrb[13].mxu0 }
 0x2a6   : > { %v1933_v28 = vpop.f32.mrb[14].mxu0 }
 0x2a7   : > { %v6139_v40 = vadd.f32 %v4031_v39, %v1933_v28  ;;  %v1935_v42 = vpop.f32.mrb[15].mxu0 }
 0x2a9   : > { %v6143_v45 = vpop.f32.mrb[48].mxu1 }
 0x2aa   : > { %v1938_v47 = vpop.f32.mrb[16].mxu0  ;;  %v1570_v48 = vpop.f32.mrb[49].mxu1 }
 0x2ab   : > { %v6145_v49 = vadd.f32 %v4033_v29, %v1938_v47  ;;  %v1940_v18 = vpop.f32.mrb[17].mxu0 }
 0x2ad   : > { %v6149_v54 = vpop.f32.mrb[50].mxu1 }
 0x2ae   : > { %v1943_v35 = vpop.f32.mrb[18].mxu0  ;;  %v1575_v36 = vpop.f32.mrb[51].mxu1 }
 0x2af   : > { %v6151_v58 = vadd.f32 %v4035_v52, %v1943_v35  ;;  %v1945_v60 = vpop.f32.mrb[19].mxu0 }
 0x2b1   : > { %v6155_v63 = vpop.f32.mrb[52].mxu1 }
 0x2b2   : > { %v1948_v44 = vpop.f32.mrb[20].mxu0  ;;  %v1580_v4 = vpop.f32.mrb[53].mxu1 }
 0x2b3   : > { %v6157_v6 = vadd.f32 %v4037_v0, %v1948_v44  ;;  %v1950_v50 = vpop.f32.mrb[21].mxu0 }
 0x2b4   : > { %v4051_v50 = vadd.f32 %v6113_v3, %v6099_v53  ;;  %v4053_v53 = vadd.f32 %v6113_v3, %v6101_v55  ;;  %v4055_v55 = vadd.f32 %v6113_v3, %v6103_v57 }
 0x2b5   : > { %v6161_v9 = vpop.f32.mrb[54].mxu1 }
 0x2b6   : > { %v1953_v10 = vpop.f32.mrb[22].mxu0  ;;  %v1585_v56 = vpop.f32.mrb[55].mxu1 }
 0x2b7   : > { %v6163_v8 = vadd.f32 %v4039_v38, %v1953_v10  ;;  %v1955_v62 = vpop.f32.mrb[23].mxu0 }
 0x2b9   : > { %v6167_v15 = vpop.f32.mrb[56].mxu1 }
 0x2ba   : > { %v1958_v17 = vpop.f32.mrb[24].mxu0  ;;  %v1590_v5 = vpop.f32.mrb[57].mxu1 }
 0x2bb   : > { %v6169_v21 = vadd.f32 %v4041_v41, %v1958_v17  ;;  %v1960_v22 = vpop.f32.mrb[25].mxu0 }
 0x2bd   : > { %v6173_v13 = vpop.f32.mrb[58].mxu1 }
 0x2be   : > { %v1963_v23 = vpop.f32.mrb[26].mxu0  ;;  %v1595_v25 = vpop.f32.mrb[59].mxu1 }
 0x2bf   : > { %v6175_v26 = vadd.f32 %v4043_v24, %v1963_v23  ;;  %v1965_v27 = vpop.f32.mrb[27].mxu0 }
 0x2c1   : > { %v6179_v31 = vpop.f32.mrb[60].mxu1 }
 0x2c2   : > { %v1968_v33 = vpop.f32.mrb[28].mxu0  ;;  %v1600_v34 = vpop.f32.mrb[61].mxu1 }
 0x2c3   : > { %v6181_v37 = vadd.f32 %v4045_v43, %v1968_v33  ;;  %v1970_v39 = vpop.f32.mrb[29].mxu0 }
 0x2c5   : > { %v1603_v28 = vpop.f32.mrb[62].mxu1 }
 0x2c6   : > { %v6186_v42 = vadd.f32 %v6113_v3, %v1603_v28  ;;  %v1973_v29 = vpop.f32.mrb[30].mxu0  ;;  %v1605_v47 = vpop.f32.mrb[63].mxu1 }
 0x2c7   : > { %v6188_v48 = vadd.f32 %v4047_v46, %v1973_v29  ;;  %v1975_v18 = vpop.f32.mrb[31].mxu0  ;;  %v4057_v29 = vadd.f32 %v6113_v3, %v6105_v59 }
 0x2c9   : > { %v3665_v52 = vpop.f32.mrb[64].mxu1 }
 0x2ca   : > { %v1978_v35 = vpop.f32.mrb[32].mxu0  ;;  %v6193_v36 = vadd.f32 %v6120_v11, %v3665_v52  ;;  %v2123_v60 = vpop.f32.mrb[65].mxu1 }
 0x2cb   : > { %v6195_v30 = vadd.f32 %v4049_v32, %v1978_v35  ;;  %v1980_v0 = vpop.f32.mrb[33].mxu0  ;;  %v6198_v44 = vadd.f32 %v6117_v7, %v2123_v60 }
 0x2cc   : > { %v2286_v4 = vsel %vm2282_vm4, %v6193_v36, 0.0  ;;  %v4059_v0 = vadd.f32 %v6113_v3, %v6107_v61  ;;  %v4061_v61 = vadd.f32 %v6113_v3, %v6109_v1  ;;  %v4063_v1 = vadd.f32 %v6113_v3, %v6111_v2 }
 0x2cd   : > { %2287 = vadd.xlane.f32.xlu0 %v2286_v4  ;;  %v3668_v51 = vpop.f32.mrb[66].mxu1  ;;  %v2283_v17 = vsel %vm2282_vm4, %v6198_v44, 0.0  ;;  %v4065_v2 = vadd.f32 %v6113_v3, %v6143_v45  ;;  %v4067_v45 = vadd.f32 %v6113_v3, %v6149_v54  ;;  %v4069_v54 = vadd.f32 %v6113_v3, %v6155_v63 }
 0x2ce   : > { %v1983_v38 = vpop.f32.mrb[34].mxu0  ;;  %v6205_v10 = vadd.f32 %v6126_v14, %v3668_v51  ;;  %v2133_v11 = vpop.f32.mrb[67].mxu1  ;;  %v4071_v63 = vadd.f32 %v6113_v3, %v6161_v9  ;;  %v4073_v9 = vadd.f32 %v6113_v3, %v6167_v15  ;;  %v4075_v15 = vadd.f32 %v6113_v3, %v6173_v13 }
 0x2cf   : > { %v6207_v56 = vadd.f32 %v4051_v50, %v1983_v38  ;;  %v1985_v62 = vpop.f32.mrb[35].mxu0  ;;  %v6210_v41 = vadd.f32 %v6123_v16, %v2133_v11  ;;  %v4077_v13 = vadd.f32 %v6113_v3, %v6179_v31 }
 0x2d0   : > { %v2292_v7 = vsel %vm2282_vm4, %v6205_v10, 0.0 }
 0x2d1   : > { %2293 = vadd.xlane.f32.xlu1 %v2292_v7  ;;  %v3671_v5 = vpop.f32.mrb[68].mxu1  ;;  %2284 = vadd.xlane.f32.xlu0 %v2283_v17  ;;  %v2289_v27 = vsel %vm2282_vm4, %v6210_v41, 0.0 }
 0x2d2   : > { %v1988_v14 = vpop.f32.mrb[36].mxu0  ;;  %v6219_v22 = vadd.f32 %v6132_v12, %v3671_v5  ;;  %v2143_v24 = vpop.f32.mrb[69].mxu1 }
 0x2d3   : > { %v6221_v23 = vadd.f32 %v4053_v53, %v1988_v14  ;;  %v1990_v16 = vpop.f32.mrb[37].mxu0  ;;  %v6224_v25 = vadd.f32 %v6129_v19, %v2143_v24 }
 0x2d4   : > { %v2298_v57 = vsel %vm2282_vm4, %v6219_v22, 0.0 }
 0x2d5   : > { %v3674_v43 = vpop.f32.mrb[70].mxu1  ;;  %2290 = vadd.xlane.f32.xlu1 %v2289_v27  ;;  %v2295_v33 = vsel %vm2282_vm4, %v6224_v25, 0.0 }
 0x2d6   : > { %v1993_v12 = vpop.f32.mrb[38].mxu0  ;;  %v6233_v34 = vadd.f32 %v6139_v40, %v3674_v43  ;;  %v2153_v39 = vpop.f32.mrb[71].mxu1  ;;  %2296 = vadd.xlane.f32.xlu0 %v2295_v33 }
 0x2d7   : > { %v6235_v46 = vadd.f32 %v4055_v55, %v1993_v12  ;;  %v1995_v19 = vpop.f32.mrb[39].mxu0  ;;  %v6238_v28 = vadd.f32 %v6135_v20, %v2153_v39 }
 0x2d8   : > { %v2304_v59 = vsel %vm2282_vm4, %v6233_v34, 0.0 }
 0x2d9   : > { %v3677_v47 = vpop.f32.mrb[72].mxu1  ;;  %2299 = vadd.xlane.f32.xlu1 %v2298_v57  ;;  %v2301_v40 = vsel %vm2282_vm4, %v6238_v28, 0.0 }
 0x2da   : > { %v1998_v18 = vpop.f32.mrb[40].mxu0  ;;  %v6247_v32 = vadd.f32 %v6151_v58, %v3677_v47  ;;  %v2163_v52 = vpop.f32.mrb[73].mxu1  ;;  %2302 = vadd.xlane.f32.xlu0 %v2301_v40 }
 0x2db   : > { %v6249_v35 = vadd.f32 %v4057_v29, %v1998_v18  ;;  %v2000_v20 = vpop.f32.mrb[41].mxu0  ;;  %v6252_v60 = vadd.f32 %v6145_v49, %v2163_v52 }
 0x2dc   : > { %v2310_v7 = vsel %vm2282_vm4, %v6247_v32, 0.0 }
 0x2dd   : > { %v3680_v4 = vpop.f32.mrb[74].mxu1  ;;  %2305 = vadd.xlane.f32.xlu1 %v2304_v59  ;;  %v2307_v58 = vsel %vm2282_vm4, %v6252_v60, 0.0 }
 0x2de   : > { %v2003_v50 = vpop.f32.mrb[42].mxu0  ;;  %v6261_v51 = vadd.f32 %v6163_v8, %v3680_v4  ;;  %v2173_v38 = vpop.f32.mrb[75].mxu1  ;;  %2308 = vadd.xlane.f32.xlu0 %v2307_v58 }
 0x2df   : > { %v4060_v11 = vadd.f32 %v4059_v0, %v2003_v50  ;;  %v2005_v49 = vpop.f32.mrb[43].mxu0  ;;  %v6264_v62 = vadd.f32 %v6157_v6, %v2173_v38 }
 0x2e0   : > { %v2316_v27 = vsel %vm2282_vm4, %v6261_v51, 0.0 }
 0x2e1   : > { %v3683_v17 = vpop.f32.mrb[76].mxu1  ;;  %2311 = vadd.xlane.f32.xlu1 %v2310_v7  ;;  %v2313_v53 = vsel %vm2282_vm4, %v6264_v62, 0.0 }
 0x2e2   : > { %v2008_v8 = vpop.f32.mrb[44].mxu0  ;;  %v6273_v5 = vadd.f32 %v6175_v26, %v3683_v17  ;;  %v2183_v14 = vpop.f32.mrb[77].mxu1  ;;  %2314 = vadd.xlane.f32.xlu0 %v2313_v53 }
 0x2e3   : > { %v4062_v24 = vadd.f32 %v4061_v61, %v2008_v8  ;;  %v2010_v6 = vpop.f32.mrb[45].mxu0  ;;  %v6276_v16 = vadd.f32 %v6169_v21, %v2183_v14 }
 0x2e4   : > { %v2322_v57 = vsel %vm2282_vm4, %v6273_v5, 0.0 }
 0x2e5   : > { %v3686_v55 = vpop.f32.mrb[78].mxu1  ;;  %2317 = vadd.xlane.f32.xlu1 %v2316_v27  ;;  %v2319_v43 = vsel %vm2282_vm4, %v6276_v16, 0.0 }
 0x2e6   : > { %v2013_v26 = vpop.f32.mrb[46].mxu0  ;;  %v6285_v33 = vadd.f32 %v6188_v48, %v3686_v55  ;;  %v2193_v12 = vpop.f32.mrb[79].mxu1  ;;  %2320 = vadd.xlane.f32.xlu0 %v2319_v43 }
 0x2e7   : > { %v4064_v39 = vadd.f32 %v4063_v1, %v2013_v26  ;;  %v2015_v21 = vpop.f32.mrb[47].mxu0  ;;  %v6288_v19 = vadd.f32 %v6181_v37, %v2193_v12 }
 0x2e8   : > { %v2328_v59 = vsel %vm2282_vm4, %v6285_v33, 0.0 }
 0x2e9   : > { %v3689_v29 = vpop.f32.mrb[80].mxu1  ;;  %2323 = vadd.xlane.f32.xlu1 %v2322_v57  ;;  %v2325_v47 = vsel %vm2282_vm4, %v6288_v19, 0.0 }
 0x2ea   : > { %v2018_v48 = vpop.f32.mrb[48].mxu0  ;;  %v6297_v40 = vadd.f32 %v6207_v56, %v3689_v29  ;;  %v2203_v18 = vpop.f32.mrb[81].mxu1  ;;  %2326 = vadd.xlane.f32.xlu0 %v2325_v47 }
 0x2eb   : > { %v4066_v52 = vadd.f32 %v4065_v2, %v2018_v48  ;;  %v2020_v37 = vpop.f32.mrb[49].mxu0  ;;  %v6300_v20 = vadd.f32 %v6195_v30, %v2203_v18 }
 0x2ec   : > { %v2334_v7 = vsel %vm2282_vm4, %v6297_v40, 0.0 }
 0x2ed   : > { %v3692_v0 = vpop.f32.mrb[82].mxu1  ;;  %2329 = vadd.xlane.f32.xlu1 %v2328_v59  ;;  %v2331_v4 = vsel %vm2282_vm4, %v6300_v20, 0.0 }
 0x2ee   : > { %v2023_v56 = vpop.f32.mrb[50].mxu0  ;;  %v6309_v58 = vadd.f32 %v6235_v46, %v3692_v0  ;;  %v2213_v50 = vpop.f32.mrb[83].mxu1  ;;  %2332 = vadd.xlane.f32.xlu0 %v2331_v4 }
 0x2ef   : > { %v4068_v38 = vadd.f32 %v4067_v45, %v2023_v56  ;;  %v2025_v30 = vpop.f32.mrb[51].mxu0  ;;  %v6312_v49 = vadd.f32 %v6221_v23, %v2213_v50 }
 0x2f0   : > { %v2340_v27 = vsel %vm2282_vm4, %v6309_v58, 0.0 }
 0x2f1   : > { %v3695_v61 = vpop.f32.mrb[84].mxu1  ;;  %2335 = vadd.xlane.f32.xlu1 %v2334_v7  ;;  %v2337_v17 = vsel %vm2282_vm4, %v6312_v49, 0.0 }
 0x2f2   : > { %v2028_v46 = vpop.f32.mrb[52].mxu0  ;;  %v6320_v53 = vadd.f32 %v4060_v11, %v3695_v61  ;;  %v2223_v8 = vpop.f32.mrb[85].mxu1  ;;  %2338 = vadd.xlane.f32.xlu0 %v2337_v17 }
 0x2f3   : > { %v4070_v14 = vadd.f32 %v4069_v54, %v2028_v46  ;;  %v2030_v6 = vpop.f32.mrb[53].mxu0  ;;  %v6323_v23 = vadd.f32 %v6249_v35, %v2223_v8 }
 0x2f4   : > { %v2346_v57 = vsel %vm2282_vm4, %v6320_v53, 0.0 }
 0x2f5   : > { %v3698_v1 = vpop.f32.mrb[86].mxu1  ;;  %2341 = vadd.xlane.f32.xlu1 %v2340_v27  ;;  %v2343_v55 = vsel %vm2282_vm4, %v6323_v23, 0.0 }
 0x2f6   : > { %v2033_v11 = vpop.f32.mrb[54].mxu0  ;;  %v6331_v43 = vadd.f32 %v4064_v39, %v3698_v1  ;;  %v2233_v26 = vpop.f32.mrb[87].mxu1  ;;  %2344 = vadd.xlane.f32.xlu0 %v2343_v55 }
 0x2f7   : > { %v4072_v12 = vadd.f32 %v4071_v63, %v2033_v11  ;;  %v2035_v21 = vpop.f32.mrb[55].mxu0  ;;  %v6333_v35 = vadd.f32 %v4062_v24, %v2233_v26 }
 0x2f8   : > { %v2352_v59 = vsel %vm2282_vm4, %v6331_v43, 0.0 }
 0x2f9   : > { %v3701_v2 = vpop.f32.mrb[88].mxu1  ;;  %2347 = vadd.xlane.f32.xlu1 %v2346_v57  ;;  %v2349_v29 = vsel %vm2282_vm4, %v6333_v35, 0.0 }
 0x2fa   : > { %v2038_v47 = vpop.f32.mrb[56].mxu0  ;;  %v6341_v39 = vadd.f32 %v4068_v38, %v3701_v2  ;;  %v2243_v48 = vpop.f32.mrb[89].mxu1  ;;  %2350 = vadd.xlane.f32.xlu0 %v2349_v29 }
 0x2fb   : > { %v4074_v18 = vadd.f32 %v4073_v9, %v2038_v47  ;;  %v2040_v37 = vpop.f32.mrb[57].mxu0  ;;  %v6343_v24 = vadd.f32 %v4066_v52, %v2243_v48 }
 0x2fc   : > { %v2358_v7 = vsel %vm2282_vm4, %v6341_v39, 0.0 }
 0x2fd   : > { %v3704_v45 = vpop.f32.mrb[90].mxu1  ;;  %2353 = vadd.xlane.f32.xlu1 %v2352_v59  ;;  %v2355_v0 = vsel %vm2282_vm4, %v6343_v24, 0.0 }
 0x2fe   : > { %v2043_v4 = vpop.f32.mrb[58].mxu0  ;;  %v6351_v56 = vadd.f32 %v4072_v12, %v3704_v45  ;;  %v2253_v50 = vpop.f32.mrb[91].mxu1  ;;  %2356 = vadd.xlane.f32.xlu0 %v2355_v0 }
 0x2ff   : > { %v4076_v38 = vadd.f32 %v4075_v15, %v2043_v4  ;;  %v2045_v30 = vpop.f32.mrb[59].mxu0  ;;  %v6353_v52 = vadd.f32 %v4070_v14, %v2253_v50 }
 0x300   : > { %v2364_v63 = vsel %vm2282_vm4, %v6351_v56, 0.0 }
 0x301   : > { %v3707_v54 = vpop.f32.mrb[92].mxu1  ;;  %2359 = vadd.xlane.f32.xlu1 %v2358_v7  ;;  %v2361_v61 = vsel %vm2282_vm4, %v6353_v52, 0.0 }
 0x302   : > { %v2048_v17 = vpop.f32.mrb[60].mxu0  ;;  %v6361_v46 = vadd.f32 %v4076_v38, %v3707_v54  ;;  %v2263_v8 = vpop.f32.mrb[93].mxu1  ;;  %2362 = vadd.xlane.f32.xlu0 %v2361_v61 }
 0x303   : > { %v4078_v6 = vadd.f32 %v4077_v13, %v2048_v17  ;;  %v2050_v27 = vpop.f32.mrb[61].mxu0  ;;  %v6363_v14 = vadd.f32 %v4074_v18, %v2263_v8 }
 0x304   : > { %v2370_v21 = vsel %vm2282_vm4, %v6361_v46, 0.0 }
 0x305   : > { %v3710_v1 = vpop.f32.mrb[94].mxu1  ;;  %2365 = vadd.xlane.f32.xlu1 %v2364_v63  ;;  %v2367_v3 = vsel %vm2282_vm4, %v6363_v14, 0.0 }
 0x306   : > { %v2053_v31 = vpop.f32.mrb[62].mxu0  ;;  %v2273_v55 = vpop.f32.mrb[95].mxu1  ;;  %2368 = vadd.xlane.f32.xlu0 %v2367_v3 }
 0x307   : > { %v4080_v11 = vadd.f32 %v6186_v42, %v2053_v31  ;;  %v2055_v26 = vpop.f32.mrb[63].mxu0  ;;  %v6370_v12 = vadd.f32 %v4078_v6, %v2273_v55 }
 0x309   : > { %v6374_v57 = vadd.f32 %v4080_v11, %v3710_v1  ;;  %2371 = vadd.xlane.f32.xlu1 %v2370_v21  ;;  %v2373_v9 = vsel %vm2282_vm4, %v6370_v12, 0.0 }
 0x30a   : > { %2374 = vadd.xlane.f32.xlu0 %v2373_v9 }
 0x30b   : > { %v2376_v2 = vsel %vm2282_vm4, %v6374_v57, 0.0 }
 0x30d   : > { %2377 = vadd.xlane.f32.xlu1 %v2376_v2 }
 0x35a   : > { %v2288_v29 = vpop.xlane.xlu0 %2287 }
 0x35b   : > { %v2381_v47 = vmul.f32 0.05, %v2288_v29 }
 0x35d   : > { %v6381_v42 = vsub.f32 %v6193_v36, %v2381_v47 }
 0x35e   : > { %v2294_v48 = vpop.xlane.xlu1 %2293  ;;  %v2285_v18 = vpop.xlane.xlu0 %2284 }
 0x35f   : > { %v2383_v37 = vmul.f32 0.05, %v2294_v48  ;;  %v2380_v59 = vmul.f32 0.05, %v2285_v18  ;;  %v2445_v15 = vmul.f32 %v6381_v42, %v6381_v42 }
 0x361   : > { %v6386_v45 = vsub.f32 %v6205_v10, %v2383_v37  ;;  %v6389_v0 = vsub.f32 %v6198_v44, %v2380_v59  ;;  %v2479_v4 = vsel %vm2282_vm4, %v2445_v15, 0.0 }
 0x362   : > { %2480 = vadd.xlane.f32.xlu1 %v2479_v4  ;;  %v2291_v50 = vpop.xlane.xlu1 %2290 }
 0x363   : > { %v2382_v38 = vmul.f32 0.05, %v2291_v50  ;;  %v2297_v36 = vpop.xlane.xlu0 %2296  ;;  %v2447_v30 = vmul.f32 %v6386_v45, %v6386_v45  ;;  %v2444_v7 = vmul.f32 %v6389_v0, %v6389_v0 }
 0x364   : > { %v2384_v13 = vmul.f32 0.05, %v2297_v36 }
 0x365   : > { %v6397_v54 = vsub.f32 %v6210_v41, %v2382_v38  ;;  %v2485_v10 = vsel %vm2282_vm4, %v2447_v30, 0.0  ;;  %v2476_v44 = vsel %vm2282_vm4, %v2444_v7, 0.0 }
 0x366   : > { %v6402_v61 = vsub.f32 %v6224_v25, %v2384_v13  ;;  %2486 = vadd.xlane.f32.xlu1 %v2485_v10  ;;  %v2300_v17 = vpop.xlane.xlu1 %2299  ;;  %2477 = vadd.xlane.f32.xlu0 %v2476_v44 }
 0x367   : > { %v2385_v8 = vmul.f32 0.05, %v2300_v17  ;;  %v2303_v6 = vpop.xlane.xlu0 %2302  ;;  %v2446_v27 = vmul.f32 %v6397_v54, %v6397_v54 }
 0x368   : > { %v2386_v63 = vmul.f32 0.05, %v2303_v6  ;;  %v2448_v3 = vmul.f32 %v6402_v61, %v6402_v61 }
 0x369   : > { %v6407_v1 = vsub.f32 %v6219_v22, %v2385_v8  ;;  %v2482_v41 = vsel %vm2282_vm4, %v2446_v27, 0.0 }
 0x36a   : > { %v6413_v25 = vsub.f32 %v6238_v28, %v2386_v63  ;;  %v2306_v31 = vpop.xlane.xlu1 %2305  ;;  %2483 = vadd.xlane.f32.xlu0 %v2482_v41  ;;  %v2488_v2 = vsel %vm2282_vm4, %v2448_v3, 0.0 }
 0x36b   : > { %v2387_v55 = vmul.f32 0.05, %v2306_v31  ;;  %v2309_v11 = vpop.xlane.xlu0 %2308  ;;  %v2449_v26 = vmul.f32 %v6407_v1, %v6407_v1 }
 0x36c   : > { %v2388_v21 = vmul.f32 0.05, %v2309_v11  ;;  %v2450_v29 = vmul.f32 %v6413_v25, %v6413_v25 }
 0x36d   : > { %v6418_v9 = vsub.f32 %v6233_v34, %v2387_v55  ;;  %v2491_v22 = vsel %vm2282_vm4, %v2449_v26, 0.0 }
 0x36e   : > { %v6425_v28 = vsub.f32 %v6252_v60, %v2388_v21  ;;  %2492 = vadd.xlane.f32.xlu1 %v2491_v22  ;;  %v2312_v47 = vpop.xlane.xlu1 %2311  ;;  %2489 = vadd.xlane.f32.xlu0 %v2488_v2  ;;  %v2494_v4 = vsel %vm2282_vm4, %v2450_v29, 0.0 }
 0x36f   : > { %v2389_v48 = vmul.f32 0.05, %v2312_v47  ;;  %v2315_v18 = vpop.xlane.xlu0 %2314  ;;  %v2451_v37 = vmul.f32 %v6418_v9, %v6418_v9 }
 0x370   : > { %v2390_v34 = vmul.f32 0.05, %v2315_v18  ;;  %v2452_v60 = vmul.f32 %v6425_v28, %v6425_v28 }
 0x371   : > { %v6430_v59 = vsub.f32 %v6247_v32, %v2389_v48  ;;  %v2497_v15 = vsel %vm2282_vm4, %v2451_v37, 0.0 }
 0x372   : > { %v6437_v50 = vsub.f32 %v6264_v62, %v2390_v34  ;;  %2498 = vadd.xlane.f32.xlu1 %v2497_v15  ;;  %v2318_v38 = vpop.xlane.xlu1 %2317  ;;  %2495 = vadd.xlane.f32.xlu0 %v2494_v4  ;;  %v2500_v44 = vsel %vm2282_vm4, %v2452_v60, 0.0 }
 0x373   : > { %v2391_v36 = vmul.f32 0.05, %v2318_v38  ;;  %v2321_v30 = vpop.xlane.xlu0 %2320  ;;  %v2453_v7 = vmul.f32 %v6430_v59, %v6430_v59 }
 0x374   : > { %v2392_v32 = vmul.f32 0.05, %v2321_v30  ;;  %v2454_v62 = vmul.f32 %v6437_v50, %v6437_v50 }
 0x375   : > { %v6442_v13 = vsub.f32 %v6261_v51, %v2391_v36  ;;  %v2503_v10 = vsel %vm2282_vm4, %v2453_v7, 0.0 }
 0x376   : > { %v6449_v17 = vsub.f32 %v6276_v16, %v2392_v32  ;;  %2504 = vadd.xlane.f32.xlu1 %v2503_v10  ;;  %v2324_v8 = vpop.xlane.xlu1 %2323  ;;  %2501 = vadd.xlane.f32.xlu0 %v2500_v44  ;;  %v2506_v31 = vsel %vm2282_vm4, %v2454_v62, 0.0 }
 0x377   : > { %v2393_v6 = vmul.f32 0.05, %v2324_v8  ;;  %v2327_v27 = vpop.xlane.xlu0 %2326  ;;  %v2455_v63 = vmul.f32 %v6442_v13, %v6442_v13 }
 0x378   : > { %v2394_v51 = vmul.f32 0.05, %v2327_v27  ;;  %v2456_v16 = vmul.f32 %v6449_v17, %v6449_v17 }
 0x379   : > { %v6454_v41 = vsub.f32 %v6273_v5, %v2393_v6  ;;  %v2509_v3 = vsel %vm2282_vm4, %v2455_v63, 0.0 }
 0x37a   : > { %v6461_v55 = vsub.f32 %v6288_v19, %v2394_v51  ;;  %2510 = vadd.xlane.f32.xlu1 %v2509_v3  ;;  %v2330_v11 = vpop.xlane.xlu1 %2329  ;;  %2507 = vadd.xlane.f32.xlu0 %v2506_v31  ;;  %v2512_v47 = vsel %vm2282_vm4, %v2456_v16, 0.0 }
 0x37b   : > { %v2395_v26 = vmul.f32 0.05, %v2330_v11  ;;  %v2333_v21 = vpop.xlane.xlu0 %2332  ;;  %v2457_v22 = vmul.f32 %v6454_v41, %v6454_v41 }
 0x37c   : > { %v2396_v5 = vmul.f32 0.05, %v2333_v21  ;;  %v2458_v19 = vmul.f32 %v6461_v55, %v6461_v55 }
 0x37d   : > { %v6466_v2 = vsub.f32 %v6285_v33, %v2395_v26  ;;  %v2515_v29 = vsel %vm2282_vm4, %v2457_v22, 0.0 }
 0x37e   : > { %v6473_v48 = vsub.f32 %v6300_v20, %v2396_v5  ;;  %2516 = vadd.xlane.f32.xlu1 %v2515_v29  ;;  %v2336_v18 = vpop.xlane.xlu1 %2335  ;;  %2513 = vadd.xlane.f32.xlu0 %v2512_v47  ;;  %v2518_v38 = vsel %vm2282_vm4, %v2458_v19, 0.0 }
 0x37f   : > { %v2397_v37 = vmul.f32 0.05, %v2336_v18  ;;  %v2339_v34 = vpop.xlane.xlu0 %2338  ;;  %v2459_v15 = vmul.f32 %v6466_v2, %v6466_v2 }
 0x380   : > { %v2398_v33 = vmul.f32 0.05, %v2339_v34  ;;  %v2460_v20 = vmul.f32 %v6473_v48, %v6473_v48 }
 0x381   : > { %v6478_v4 = vsub.f32 %v6297_v40, %v2397_v37  ;;  %v2521_v60 = vsel %vm2282_vm4, %v2459_v15, 0.0 }
 0x382   : > { %v6485_v36 = vsub.f32 %v6312_v49, %v2398_v33  ;;  %2522 = vadd.xlane.f32.xlu1 %v2521_v60  ;;  %v2342_v30 = vpop.xlane.xlu1 %2341  ;;  %2519 = vadd.xlane.f32.xlu0 %v2518_v38  ;;  %v2524_v8 = vsel %vm2282_vm4, %v2460_v20, 0.0 }
 0x383   : > { %v2399_v7 = vmul.f32 0.05, %v2342_v30  ;;  %v2345_v32 = vpop.xlane.xlu0 %2344  ;;  %v2461_v10 = vmul.f32 %v6478_v4, %v6478_v4 }
 0x384   : > { %v2400_v40 = vmul.f32 0.05, %v2345_v32  ;;  %v2462_v49 = vmul.f32 %v6485_v36, %v6485_v36 }
 0x385   : > { %v6490_v44 = vsub.f32 %v6309_v58, %v2399_v7  ;;  %v2527_v62 = vsel %vm2282_vm4, %v2461_v10, 0.0 }
 0x386   : > { %v6497_v6 = vsub.f32 %v6323_v23, %v2400_v40  ;;  %2528 = vadd.xlane.f32.xlu1 %v2527_v62  ;;  %v2348_v27 = vpop.xlane.xlu1 %2347  ;;  %2525 = vadd.xlane.f32.xlu0 %v2524_v8  ;;  %v2530_v11 = vsel %vm2282_vm4, %v2462_v49, 0.0 }
 0x387   : > { %v2401_v63 = vmul.f32 0.05, %v2348_v27  ;;  %v2351_v51 = vpop.xlane.xlu0 %2350  ;;  %v2463_v3 = vmul.f32 %v6490_v44, %v6490_v44 }
 0x388   : > { %v2402_v58 = vmul.f32 0.05, %v2351_v51  ;;  %v2464_v23 = vmul.f32 %v6497_v6, %v6497_v6 }
 0x389   : > { %v6502_v31 = vsub.f32 %v6320_v53, %v2401_v63  ;;  %v2533_v16 = vsel %vm2282_vm4, %v2463_v3, 0.0 }
 0x38a   : > { %v6509_v26 = vsub.f32 %v6333_v35, %v2402_v58  ;;  %2534 = vadd.xlane.f32.xlu1 %v2533_v16  ;;  %v2354_v21 = vpop.xlane.xlu1 %2353  ;;  %2531 = vadd.xlane.f32.xlu0 %v2530_v11  ;;  %v2536_v18 = vsel %vm2282_vm4, %v2464_v23, 0.0 }
 0x38b   : > { %v2403_v22 = vmul.f32 0.05, %v2354_v21  ;;  %v2357_v5 = vpop.xlane.xlu0 %2356  ;;  %v2465_v29 = vmul.f32 %v6502_v31, %v6502_v31 }
 0x38c   : > { %v2404_v53 = vmul.f32 0.05, %v2357_v5  ;;  %v2466_v35 = vmul.f32 %v6509_v26, %v6509_v26 }
 0x38d   : > { %v6514_v47 = vsub.f32 %v6331_v43, %v2403_v22  ;;  %v2539_v19 = vsel %vm2282_vm4, %v2465_v29, 0.0 }
 0x38e   : > { %v6521_v37 = vsub.f32 %v6343_v24, %v2404_v53  ;;  %2540 = vadd.xlane.f32.xlu1 %v2539_v19  ;;  %v2360_v34 = vpop.xlane.xlu1 %2359  ;;  %2537 = vadd.xlane.f32.xlu0 %v2536_v18  ;;  %v2542_v30 = vsel %vm2282_vm4, %v2466_v35, 0.0 }
 0x38f   : > { %v2405_v15 = vmul.f32 0.05, %v2360_v34  ;;  %v2363_v33 = vpop.xlane.xlu0 %2362  ;;  %v2467_v60 = vmul.f32 %v6514_v47, %v6514_v47 }
 0x390   : > { %v2406_v43 = vmul.f32 0.05, %v2363_v33  ;;  %v2468_v24 = vmul.f32 %v6521_v37, %v6521_v37 }
 0x391   : > { %v6526_v38 = vsub.f32 %v6341_v39, %v2405_v15  ;;  %v2545_v20 = vsel %vm2282_vm4, %v2467_v60, 0.0 }
 0x392   : > { %v6533_v7 = vsub.f32 %v6353_v52, %v2406_v43  ;;  %2546 = vadd.xlane.f32.xlu1 %v2545_v20  ;;  %v2366_v32 = vpop.xlane.xlu1 %2365  ;;  %2543 = vadd.xlane.f32.xlu0 %v2542_v30  ;;  %v2548_v27 = vsel %vm2282_vm4, %v2468_v24, 0.0 }
 0x393   : > { %v2407_v10 = vmul.f32 0.05, %v2366_v32  ;;  %v2369_v40 = vpop.xlane.xlu0 %2368  ;;  %v2469_v62 = vmul.f32 %v6526_v38, %v6526_v38 }
 0x394   : > { %v2408_v39 = vmul.f32 0.05, %v2369_v40  ;;  %v2470_v52 = vmul.f32 %v6533_v7, %v6533_v7 }
 0x395   : > { %v6538_v8 = vsub.f32 %v6351_v56, %v2407_v10  ;;  %v2551_v49 = vsel %vm2282_vm4, %v2469_v62, 0.0 }
 0x396   : > { %v6545_v63 = vsub.f32 %v6363_v14, %v2408_v39  ;;  %2552 = vadd.xlane.f32.xlu1 %v2551_v49  ;;  %v2372_v51 = vpop.xlane.xlu1 %2371  ;;  %2549 = vadd.xlane.f32.xlu0 %v2548_v27  ;;  %v2554_v21 = vsel %vm2282_vm4, %v2470_v52, 0.0 }
 0x397   : > { %v2409_v3 = vmul.f32 0.05, %v2372_v51  ;;  %v2375_v58 = vpop.xlane.xlu0 %2374  ;;  %v2471_v16 = vmul.f32 %v6538_v8, %v6538_v8 }
 0x398   : > { %v2410_v56 = vmul.f32 0.05, %v2375_v58  ;;  %v2472_v14 = vmul.f32 %v6545_v63, %v6545_v63 }
 0x399   : > { %v6550_v11 = vsub.f32 %v6361_v46, %v2409_v3  ;;  %v2557_v23 = vsel %vm2282_vm4, %v2471_v16, 0.0 }
 0x39a   : > { %v6557_v22 = vsub.f32 %v6370_v12, %v2410_v56  ;;  %2558 = vadd.xlane.f32.xlu1 %v2557_v23  ;;  %v2378_v5 = vpop.xlane.xlu1 %2377  ;;  %2555 = vadd.xlane.f32.xlu0 %v2554_v21  ;;  %v2560_v18 = vsel %vm2282_vm4, %v2472_v14, 0.0 }
 0x39b   : > { %v2411_v29 = vmul.f32 0.05, %v2378_v5  ;;  %v2473_v53 = vmul.f32 %v6550_v11, %v6550_v11 }
 0x39c   : > { %v2474_v35 = vmul.f32 %v6557_v22, %v6557_v22 }
 0x39d   : > { %v6562_v46 = vsub.f32 %v6374_v57, %v2411_v29  ;;  %v2563_v19 = vsel %vm2282_vm4, %v2473_v53, 0.0 }
 0x39e   : > { %2564 = vadd.xlane.f32.xlu1 %v2563_v19  ;;  %2561 = vadd.xlane.f32.xlu0 %v2560_v18  ;;  %v2566_v15 = vsel %vm2282_vm4, %v2474_v35, 0.0 }
 0x39f   : > { %v2475_v12 = vmul.f32 %v6562_v46, %v6562_v46 }
 0x3a1   : > { %v2569_v34 = vsel %vm2282_vm4, %v2475_v12, 0.0 }
 0x3a2   : > { %2570 = vadd.xlane.f32.xlu1 %v2569_v34  ;;  %2567 = vadd.xlane.f32.xlu0 %v2566_v15 }
 0x3ef   : > { %v2481_v57 = vpop.xlane.xlu1 %2480 }
 0x3f0   : > { %v2573_v33 = vmul.f32 0.05263158, %v2481_v57 }
 0x3f2   : > { %4408 = vrsqrt.f32 %v2573_v33  ;;  %vm2613_vm5 = vcmp.eq.f32.partialorder %v2573_v33, inf  ;;  %vm2615_vm6 = vcmp.eq.f32.partialorder %v2573_v33, 0.0  ;;  %v2616_v52 = vand.u32 2147483648, %v2573_v33 }
 0x3f3   : > { %v2487_v60 = vpop.xlane.xlu1 %2486  ;;  %v2478_v43 = vpop.xlane.xlu0 %2477 }
 0x3f4   : > { %v2575_v20 = vmul.f32 0.05263158, %v2487_v60  ;;  %v2572_v30 = vmul.f32 0.05263158, %v2478_v43 }
 0x3f6   : > { %4410 = vrsqrt.f32 %v2575_v20  ;;  %vm2627_vm7 = vcmp.eq.f32.partialorder %v2575_v20, inf  ;;  %vm2629_vm8 = vcmp.eq.f32.partialorder %v2575_v20, 0.0  ;;  %v2630_v3 = vand.u32 2147483648, %v2575_v20 }
 0x3f7   : > { %4412 = vrsqrt.f32 %v2572_v30  ;;  %v2484_v24 = vpop.xlane.xlu0 %2483  ;;  %vm2606_vm9 = vcmp.eq.f32.partialorder %v2572_v30, inf  ;;  %vm2608_vm10 = vcmp.eq.f32.partialorder %v2572_v30, 0.0  ;;  %v2609_v19 = vand.u32 2147483648, %v2572_v30 }
 0x3f8   : > { %v2574_v32 = vmul.f32 0.05263158, %v2484_v24 }
 0x3fa   : > { %4414 = vrsqrt.f32 %v2574_v32  ;;  %vm2620_vm11 = vcmp.eq.f32.partialorder %v2574_v32, inf  ;;  %vm2622_vm12 = vcmp.eq.f32.partialorder %v2574_v32, 0.0  ;;  %v2623_v12 = vand.u32 2147483648, %v2574_v32 }
 0x3fb   : > { %v2493_v10 = vpop.xlane.xlu1 %2492  ;;  %v2490_v40 = vpop.xlane.xlu0 %2489 }
 0x3fc   : > { %v4409_v62 = vpop.eup %4408  ;;  %v6572_v39 = vmul.f32 0.05263158, %v2493_v10  ;;  %v6574_v49 = vmul.f32 0.05263158, %v2490_v40 }
 0x3fd   : > { %v2612_v27 = vmul.f32 %v4409_v62, %v2573_v33 }
 0x3fe   : > { %4416 = vrsqrt.f32 %v6572_v39  ;;  %vm2641_vm13 = vcmp.eq.f32.partialorder %v6572_v39, inf  ;;  %vm2643_vm14 = vcmp.eq.f32.partialorder %v6572_v39, 0.0  ;;  %v2644_v40 = vand.u32 2147483648, %v6572_v39 }
 0x3ff   : > { %v2614_v51 = vsel %vm2613_vm5, %v2573_v33, %v2612_v27  ;;  %4418 = vrsqrt.f32 %v6574_v49  ;;  %v2499_v58 = vpop.xlane.xlu1 %2498  ;;  %v2496_v16 = vpop.xlane.xlu0 %2495  ;;  %vm2634_vm15 = vcmp.eq.f32.partialorder %v6574_v49, inf  ;;  %vm2636_vm0 = vcmp.eq.f32.partialorder %v6574_v49, 0.0 }
 0x400   : > { %v4411_v56 = vpop.eup %4410  ;;  %v2617_v23 = vsel %vm2615_vm6, %v2616_v52, %v2614_v51  ;;  %v6578_v21 = vmul.f32 0.05263158, %v2499_v58  ;;  %v6580_v14 = vmul.f32 0.05263158, %v2496_v16  ;;  %v2637_v58 = vand.u32 2147483648, %v6574_v49 }
 0x401   : > { %v4413_v5 = vpop.eup %4412  ;;  %v6582_v29 = vadd.f32 1e-06, %v2617_v23  ;;  %v2626_v53 = vmul.f32 %v4411_v56, %v2575_v20 }
 0x402   : > { %v2605_v18 = vmul.f32 %v4413_v5, %v2572_v30  ;;  %4420 = vrsqrt.f32 %v6578_v21  ;;  %vm2655_vm1 = vcmp.eq.f32.partialorder %v6578_v21, inf  ;;  %vm2657_vm2 = vcmp.eq.f32.partialorder %v6578_v21, 0.0 }
 0x403   : > { %4422 = vrcp.f32 %v6582_v29  ;;  %v2628_v35 = vsel %vm2627_vm7, %v2575_v20, %v2626_v53  ;;  %v2505_v34 = vpop.xlane.xlu1 %2504  ;;  %v2502_v15 = vpop.xlane.xlu0 %2501  ;;  %vm2648_vm3 = vcmp.eq.f32.partialorder %v6580_v14, inf  ;;  %vm2650_vm5 = vcmp.eq.f32.partialorder %v6580_v14, 0.0 }
 0x404   : > { %v4415_v57 = vpop.eup %4414  ;;  %v2631_v33 = vsel %vm2629_vm8, %v2630_v3, %v2628_v35  ;;  %v2607_v60 = vsel %vm2606_vm9, %v2572_v30, %v2605_v18  ;;  %4424 = vrsqrt.f32 %v6580_v14  ;;  %v6598_v27 = vmul.f32 0.05263158, %v2505_v34 }
 0x405   : > { %v6592_v43 = vadd.f32 1e-06, %v2631_v33  ;;  %v2610_v24 = vsel %vm2608_vm10, %v2609_v19, %v2607_v60  ;;  %v2619_v10 = vmul.f32 %v4415_v57, %v2574_v32  ;;  %v6600_v52 = vmul.f32 0.05263158, %v2502_v15 }
 0x406   : > { %v6596_v62 = vadd.f32 1e-06, %v2610_v24  ;;  %v2658_v19 = vand.u32 2147483648, %v6578_v21  ;;  %v2651_v15 = vand.u32 2147483648, %v6580_v14  ;;  %vm2669_vm6 = vcmp.eq.f32.partialorder %v6598_v27, inf }
 0x407   : > { %4426 = vrcp.f32 %v6592_v43  ;;  %v2621_v20 = vsel %vm2620_vm11, %v2574_v32, %v2619_v10  ;;  %v2511_v51 = vpop.xlane.xlu1 %2510  ;;  %v2508_v5 = vpop.xlane.xlu0 %2507  ;;  %vm2671_vm7 = vcmp.eq.f32.partialorder %v6598_v27, 0.0  ;;  %vm2662_vm8 = vcmp.eq.f32.partialorder %v6600_v52, inf }
 0x408   : > { %v4417_v30 = vpop.eup %4416  ;;  %4428 = vrcp.f32 %v6596_v62  ;;  %v2624_v3 = vsel %vm2622_vm12, %v2623_v12, %v2621_v20  ;;  %v6624_v18 = vmul.f32 0.05263158, %v2511_v51  ;;  %v6632_v57 = vmul.f32 0.05263158, %v2508_v5 }
 0x409   : > { %v4419_v16 = vpop.eup %4418  ;;  %v6610_v56 = vadd.f32 1e-06, %v2624_v3  ;;  %v2640_v23 = vmul.f32 %v4417_v30, %v6572_v39  ;;  %4430 = vrsqrt.f32 %v6598_v27  ;;  %v2672_v30 = vand.u32 2147483648, %v6598_v27 }
 0x40a   : > { %v2633_v53 = vmul.f32 %v4419_v16, %v6574_v49  ;;  %4432 = vrsqrt.f32 %v6600_v52  ;;  %vm2664_vm9 = vcmp.eq.f32.partialorder %v6600_v52, 0.0  ;;  %vm2683_vm10 = vcmp.eq.f32.partialorder %v6624_v18, inf }
 0x40b   : > { %4434 = vrcp.f32 %v6610_v56  ;;  %v2642_v32 = vsel %vm2641_vm13, %v6572_v39, %v2640_v23  ;;  %v2517_v39 = vpop.xlane.xlu1 %2516  ;;  %vm2685_vm11 = vcmp.eq.f32.partialorder %v6624_v18, 0.0  ;;  %vm2676_vm12 = vcmp.eq.f32.partialorder %v6632_v57, inf }
 0x40c   : > { %v4421_v35 = vpop.eup %4420  ;;  %v2645_v12 = vsel %vm2643_vm14, %v2644_v40, %v2642_v32  ;;  %v2635_v34 = vsel %vm2634_vm15, %v6574_v49, %v2633_v53  ;;  %4436 = vrsqrt.f32 %v6624_v18  ;;  %v6656_v16 = vmul.f32 0.05263158, %v2517_v39 }
 0x40d   : > { %v4423_v33 = vpop.eup %4422  ;;  %v6634_v60 = vadd.f32 1e-06, %v2645_v12  ;;  %v2638_v24 = vsel %vm2636_vm0, %v2637_v58, %v2635_v34  ;;  %v2654_v10 = vmul.f32 %v4421_v35, %v6578_v21  ;;  %v2665_v32 = vand.u32 2147483648, %v6600_v52 }
 0x40e   : > { %v4425_v40 = vpop.eup %4424  ;;  %v2893_v20 = vmul.f32 %v4423_v33, %v6582_v29  ;;  %v6642_v51 = vadd.f32 1e-06, %v2638_v24  ;;  %v6669_v24 = vld [vmem:[#allocation6] ss:$0 sm:$0xff]  ;;  %vm2697_vm13 = vcmp.eq.f32.partialorder %v6656_v16, inf  ;;  %vm2678_vm14 = vcmp.eq.f32.partialorder %v6632_v57, 0.0 }
 0x40f   : > { %4438 = vrcp.f32 %v6634_v60  ;;  %v2656_v49 = vsel %vm2655_vm1, %v6578_v21, %v2654_v10  ;;  %v2647_v3 = vmul.f32 %v4425_v40, %v6580_v14  ;;  %vm2699_vm15 = vcmp.eq.f32.partialorder %v6656_v16, 0.0 }
 0x410   : > { %v2925_v58 = vsub.f32 2.0, %v2893_v20  ;;  %4440 = vrcp.f32 %v6642_v51  ;;  %v2659_v29 = vsel %vm2657_vm2, %v2658_v19, %v2656_v49  ;;  %v6680_v20 = vld [vmem:[#allocation7] ss:$0 sm:$0xff] }
 0x411   : > { %v4427_v23 = vpop.eup %4426  ;;  %v6658_v5 = vadd.f32 1e-06, %v2659_v29  ;;  %v2649_v53 = vsel %vm2648_vm3, %v6580_v14, %v2647_v3  ;;  %4442 = vrsqrt.f32 %v6632_v57  ;;  %v2686_v3 = vand.u32 2147483648, %v6624_v18 }
 0x412   : > { %v4429_v35 = vpop.eup %4428  ;;  %v2957_v12 = vmul.f32 %v4423_v33, %v2925_v58  ;;  %v2895_v21 = vmul.f32 %v4427_v23, %v6592_v43  ;;  %v2652_v19 = vsel %vm2650_vm5, %v2651_v15, %v2649_v53 }
 0x413   : > { %v4431_v34 = vpop.eup %4430  ;;  %v2892_v10 = vmul.f32 %v4429_v35, %v6596_v62  ;;  %4444 = vrcp.f32 %v6658_v5  ;;  %v6673_v39 = vadd.f32 1e-06, %v2652_v19 }
 0x414   : > { %v4433_v40 = vpop.eup %4432  ;;  %v2990_v43 = vmul.f32 %v2957_v12, %v6381_v42  ;;  %v2927_v33 = vsub.f32 2.0, %v2895_v21  ;;  %v2668_v14 = vmul.f32 %v4431_v34, %v6598_v27  ;;  %4446 = vrsqrt.f32 %v6656_v16  ;;  %v2514_v12 = vpop.xlane.xlu0 %2513 }
 0x415   : > { %v4435_v15 = vpop.eup %4434  ;;  %v2924_v49 = vsub.f32 2.0, %v2892_v10  ;;  %4448 = vrcp.f32 %v6673_v39  ;;  %v2661_v62 = vmul.f32 %v4433_v40, %v6600_v52  ;;  %v2679_v40 = vand.u32 2147483648, %v6632_v57 }
 0x416   : > { %v3028_v58 = vmul.f32 %v6669_v24, %v2990_v43  ;;  %v2959_v29 = vmul.f32 %v4427_v23, %v2927_v33  ;;  %v2894_v42 = vmul.f32 %v4435_v15, %v6610_v56  ;;  %v2670_v53 = vsel %vm2669_vm6, %v6598_v27, %v2668_v14  ;;  %v4437_v21 = vpop.eup %4436 }
 0x417   : > { %v2956_v19 = vmul.f32 %v4429_v35, %v2924_v49  ;;  %v2673_v34 = vsel %vm2671_vm7, %v2672_v30, %v2670_v53  ;;  %v2663_v10 = vsel %vm2662_vm8, %v6600_v52, %v2661_v62  ;;  %v2682_v14 = vmul.f32 %v4437_v21, %v6624_v18 }
 0x418   : > { %v3067_v23 = vadd.f32 %v6680_v20, %v3028_v58  ;;  %v2992_v56 = vmul.f32 %v2959_v29, %v6386_v45  ;;  %v2926_v43 = vsub.f32 2.0, %v2894_v42  ;;  %v6698_v33 = vadd.f32 1e-06, %v2673_v34 }
 0x419   : > { %v4439_v27 = vpop.eup %4438  ;;  %v2989_v30 = vmul.f32 %v2956_v19, %v6389_v0  ;;  %v2666_v35 = vsel %vm2664_vm9, %v2665_v32, %v2663_v10  ;;  %v6707_v49 = vmul.f32 0.05263158, %v2514_v12  ;;  %v2684_v53 = vsel %vm2683_vm10, %v6624_v18, %v2682_v14 }
 0x41a   : > { %v4441_v45 = vpop.eup %4440  ;;  %3099 = vst.msk [vmem:[%s6711_s12 + $0x8] sm:$0xff] %vm2282_vm4, %v3067_v23  ;;  %v3030_v62 = vmul.f32 %v6669_v24, %v2992_v56  ;;  %v2958_v58 = vmul.f32 %v4435_v15, %v2926_v43  ;;  %v2897_v0 = vmul.f32 %v4439_v27, %v6634_v60  ;;  %4450 = vrcp.f32 %v6698_v33 }
 0x41b   : > { %v4443_v52 = vpop.eup %4442  ;;  %v3027_v32 = vmul.f32 %v6669_v24, %v2989_v30  ;;  %v2896_v29 = vmul.f32 %v4441_v45, %v6642_v51  ;;  %v2836_v42 = vadd.f32 1e-06, %v2666_v35  ;;  %v2687_v21 = vsel %vm2685_vm11, %v2686_v3, %v2684_v53  ;;  %v2523_v35 = vpop.xlane.xlu1 %2522 }
 0x41c   : > { %v3069_v12 = vadd.f32 %v6680_v20, %v3030_v62  ;;  %v2991_v15 = vmul.f32 %v2958_v58, %v6397_v54  ;;  %v2929_v60 = vsub.f32 2.0, %v2897_v0  ;;  %v2839_v51 = vadd.f32 1e-06, %v2687_v21 }
 0x41d   : > { %v4445_v19 = vpop.eup %4444  ;;  %v3066_v34 = vadd.f32 %v6680_v20, %v3027_v32  ;;  %v2928_v10 = vsub.f32 2.0, %v2896_v29  ;;  %4452 = vrcp.f32 %v2836_v42  ;;  %v2675_v54 = vmul.f32 %v4443_v52, %v6632_v57 }
 0x41e   : > { %v4447_v23 = vpop.eup %4446  ;;  %3101 = vst.msk [vmem:[%s6711_s12 + $0x18] sm:$0xff] %vm2282_vm4, %v3069_v12  ;;  %v3029_v56 = vmul.f32 %v6669_v24, %v2991_v15  ;;  %v2961_v43 = vmul.f32 %v4439_v27, %v2929_v60  ;;  %v2899_v30 = vmul.f32 %v4445_v19, %v6658_v5  ;;  %4454 = vrcp.f32 %v2839_v51 }
 0x41f   : > { %v4449_v18 = vpop.eup %4448  ;;  %3098 = vst.msk [vmem:[%s6711_s12] sm:$0xff] %vm2282_vm4, %v3066_v34  ;;  %v2960_v3 = vmul.f32 %v4441_v45, %v2928_v10  ;;  %v2696_v14 = vmul.f32 %v4447_v23, %v6656_v16  ;;  %v2700_v62 = vand.u32 2147483648, %v6656_v16  ;;  %v2677_v32 = vsel %vm2676_vm12, %v6632_v57, %v2675_v54 }
 0x420   : > { %v3068_v58 = vadd.f32 %v6680_v20, %v3029_v56  ;;  %v2994_v0 = vmul.f32 %v2961_v43, %v6407_v1  ;;  %v2931_v27 = vsub.f32 2.0, %v2899_v30  ;;  %v2898_v5 = vmul.f32 %v4449_v18, %v6673_v39  ;;  %v2520_v39 = vpop.xlane.xlu0 %2519  ;;  %v2529_v56 = vpop.xlane.xlu1 %2528 }
 0x421   : > { %v2993_v52 = vmul.f32 %v2960_v3, %v6402_v61  ;;  %v2698_v45 = vsel %vm2697_vm13, %v6656_v16, %v2696_v14  ;;  %4456 = vrsqrt.f32 %v6707_v49  ;;  %v2680_v61 = vsel %vm2678_vm14, %v2679_v40, %v2677_v32 }
 0x422   : > { %3100 = vst.msk [vmem:[%s6711_s12 + $0x10] sm:$0xff] %vm2282_vm4, %v3068_v58  ;;  %v3032_v29 = vmul.f32 %v6669_v24, %v2994_v0  ;;  %v2963_v1 = vmul.f32 %v4445_v19, %v2931_v27  ;;  %v2930_v53 = vsub.f32 2.0, %v2898_v5  ;;  %v2838_v15 = vadd.f32 1e-06, %v2680_v61 }
 0x423   : > { %v3031_v12 = vmul.f32 %v6669_v24, %v2993_v52  ;;  %v2701_v60 = vsel %vm2699_vm15, %v2700_v62, %v2698_v45  ;;  %v6765_v30 = vmul.f32 0.05263158, %v2523_v35  ;;  %v6771_v3 = vmul.f32 0.05263158, %v2529_v56 }
 0x424   : > { %v4451_v21 = vpop.eup %4450  ;;  %v3071_v34 = vadd.f32 %v6680_v20, %v3032_v29  ;;  %v2996_v10 = vmul.f32 %v2963_v1, %v6418_v9  ;;  %v2962_v23 = vmul.f32 %v4449_v18, %v2930_v53  ;;  %v2841_v19 = vadd.f32 1e-06, %v2701_v60  ;;  %v2535_v1 = vpop.xlane.xlu1 %2534 }
 0x425   : > { %v3070_v43 = vadd.f32 %v6680_v20, %v3031_v12  ;;  %v2901_v57 = vmul.f32 %v4451_v21, %v6698_v33  ;;  %4458 = vrcp.f32 %v2838_v15  ;;  %v6769_v18 = vmul.f32 0.05263158, %v2520_v39 }
 0x426   : > { %3103 = vst.msk [vmem:[%s6711_s12 + $0x28] sm:$0xff] %vm2282_vm4, %v3071_v34  ;;  %v3034_v40 = vmul.f32 %v6669_v24, %v2996_v10  ;;  %v2995_v16 = vmul.f32 %v2962_v23, %v6413_v25  ;;  %4460 = vrcp.f32 %v2841_v19  ;;  %v2526_v25 = vpop.xlane.xlu0 %2525  ;;  %vm2690_vm0 = vcmp.eq.f32.partialorder %v6707_v49, inf }
 0x427   : > { %v4453_v54 = vpop.eup %4452  ;;  %3102 = vst.msk [vmem:[%s6711_s12 + $0x20] sm:$0xff] %vm2282_vm4, %v3070_v43  ;;  %v2933_v9 = vsub.f32 2.0, %v2901_v57  ;;  %4462 = vrsqrt.f32 %v6765_v30  ;;  %vm2692_vm1 = vcmp.eq.f32.partialorder %v6707_v49, 0.0  ;;  %v2693_v53 = vand.u32 2147483648, %v6707_v49 }
 0x428   : > { %v3073_v33 = vadd.f32 %v6680_v20, %v3034_v40  ;;  %v3033_v14 = vmul.f32 %v6669_v24, %v2995_v16  ;;  %v2900_v62 = vmul.f32 %v4453_v54, %v2836_v42  ;;  %v4455_v58 = vpop.eup %4454  ;;  %4464 = vrsqrt.f32 %v6769_v18 }
 0x429   : > { %v2965_v35 = vmul.f32 %v4451_v21, %v2933_v9  ;;  %v2903_v5 = vmul.f32 %v4455_v58, %v2839_v51  ;;  %4466 = vrsqrt.f32 %v6771_v3  ;;  %vm2711_vm2 = vcmp.eq.f32.partialorder %v6765_v30, inf }
 0x42a   : > { %3105 = vst.msk [vmem:[%s6711_s12 + $0x38] sm:$0xff] %vm2282_vm4, %v3073_v33  ;;  %v3072_v0 = vadd.f32 %v6680_v20, %v3033_v14  ;;  %v2932_v27 = vsub.f32 2.0, %v2900_v62  ;;  %vm2713_vm3 = vcmp.eq.f32.partialorder %v6765_v30, 0.0  ;;  %v6793_v12 = vmul.f32 0.05263158, %v2526_v25  ;;  %v2532_v60 = vpop.xlane.xlu0 %2531 }
 0x42b   : > { %v4457_v52 = vpop.eup %4456  ;;  %v2998_v32 = vmul.f32 %v2965_v35, %v6430_v59  ;;  %v2935_v45 = vsub.f32 2.0, %v2903_v5  ;;  %v2714_v23 = vand.u32 2147483648, %v6765_v30  ;;  %v6799_v56 = vmul.f32 0.05263158, %v2535_v1 }
 0x42c   : > { %3104 = vst.msk [vmem:[%s6711_s12 + $0x30] sm:$0xff] %vm2282_vm4, %v3072_v0  ;;  %v2964_v42 = vmul.f32 %v4453_v54, %v2932_v27  ;;  %v2689_v29 = vmul.f32 %v4457_v52, %v6707_v49  ;;  %vm2704_vm5 = vcmp.eq.f32.partialorder %v6769_v18, inf  ;;  %4468 = vrsqrt.f32 %v6793_v12 }
 0x42d   : > { %v3036_v51 = vmul.f32 %v6669_v24, %v2998_v32  ;;  %v2967_v61 = vmul.f32 %v4455_v58, %v2935_v45  ;;  %vm2706_vm6 = vcmp.eq.f32.partialorder %v6769_v18, 0.0  ;;  %v2707_v0 = vand.u32 2147483648, %v6769_v18 }
 0x42e   : > { %v2997_v59 = vmul.f32 %v2964_v42, %v6425_v28  ;;  %v2691_v39 = vsel %vm2690_vm0, %v6707_v49, %v2689_v29  ;;  %v6809_v49 = vmul.f32 0.05263158, %v2532_v60  ;;  %vm2725_vm7 = vcmp.eq.f32.partialorder %v6771_v3, inf  ;;  %v2538_v1 = vpop.xlane.xlu0 %2537 }
 0x42f   : > { %v4459_v21 = vpop.eup %4458  ;;  %v3075_v34 = vadd.f32 %v6680_v20, %v3036_v51  ;;  %v2694_v10 = vsel %vm2692_vm1, %v2693_v53, %v2691_v39  ;;  %v3000_v28 = vmul.f32 %v2967_v61, %v6442_v13  ;;  %v2541_v13 = vpop.xlane.xlu1 %2540  ;;  %vm2727_vm8 = vcmp.eq.f32.partialorder %v6771_v3, 0.0 }
 0x430   : > { %v4461_v43 = vpop.eup %4460  ;;  %v3035_v57 = vmul.f32 %v6669_v24, %v2997_v59  ;;  %v2902_v40 = vmul.f32 %v4459_v21, %v2838_v15  ;;  %v6803_v16 = vadd.f32 1e-06, %v2694_v10  ;;  %v2728_v29 = vand.u32 2147483648, %v6771_v3 }
 0x431   : > { %3107 = vst.msk [vmem:[%s6711_s12 + $0x48] sm:$0xff] %vm2282_vm4, %v3075_v34  ;;  %v2905_v54 = vmul.f32 %v4461_v43, %v2841_v19  ;;  %v4463_v9 = vpop.eup %4462  ;;  %v3038_v14 = vmul.f32 %v6669_v24, %v3000_v28  ;;  %vm2718_vm9 = vcmp.eq.f32.partialorder %v6793_v12, inf  ;;  %vm2720_vm10 = vcmp.eq.f32.partialorder %v6793_v12, 0.0 }
 0x432   : > { %v3074_v33 = vadd.f32 %v6680_v20, %v3035_v57  ;;  %v2934_v62 = vsub.f32 2.0, %v2902_v40  ;;  %4470 = vrcp.f32 %v6803_v16  ;;  %v2710_v25 = vmul.f32 %v4463_v9, %v6765_v30  ;;  %v4465_v19 = vpop.eup %4464 }
 0x433   : > { %v2937_v15 = vsub.f32 2.0, %v2905_v54  ;;  %4472 = vrsqrt.f32 %v6799_v56  ;;  %v3077_v58 = vadd.f32 %v6680_v20, %v3038_v14  ;;  %v2703_v52 = vmul.f32 %v4465_v19, %v6769_v18  ;;  %v4467_v32 = vpop.eup %4466  ;;  %v2547_v39 = vpop.xlane.xlu1 %2546 }
 0x434   : > { %3106 = vst.msk [vmem:[%s6711_s12 + $0x40] sm:$0xff] %vm2282_vm4, %v3074_v33  ;;  %v2966_v35 = vmul.f32 %v4459_v21, %v2934_v62  ;;  %v2712_v5 = vsel %vm2711_vm2, %v6765_v30, %v2710_v25  ;;  %4474 = vrsqrt.f32 %v6809_v49  ;;  %v2724_v61 = vmul.f32 %v4467_v32, %v6771_v3  ;;  %v2544_v33 = vpop.xlane.xlu0 %2543 }
 0x435   : > { %v2969_v27 = vmul.f32 %v4461_v43, %v2937_v15  ;;  %3109 = vst.msk [vmem:[%s6711_s12 + $0x58] sm:$0xff] %vm2282_vm4, %v3077_v58  ;;  %v2715_v45 = vsel %vm2713_vm3, %v2714_v23, %v2712_v5  ;;  %v2705_v59 = vsel %vm2704_vm5, %v6769_v18, %v2703_v52  ;;  %v6856_v10 = vmul.f32 0.05263158, %v2541_v13 }
 0x436   : > { %v2999_v42 = vmul.f32 %v2966_v35, %v6437_v50  ;;  %v6835_v53 = vadd.f32 1e-06, %v2715_v45  ;;  %v2708_v30 = vsel %vm2706_vm6, %v2707_v0, %v2705_v59  ;;  %v2726_v21 = vsel %vm2725_vm7, %v6771_v3, %v2724_v61  ;;  %v4469_v43 = vpop.eup %4468 }
 0x437   : > { %v3002_v51 = vmul.f32 %v2969_v27, %v6454_v41  ;;  %v6848_v60 = vadd.f32 1e-06, %v2708_v30  ;;  %v2729_v18 = vsel %vm2727_vm8, %v2728_v29, %v2726_v21  ;;  %v6858_v23 = vmul.f32 0.05263158, %v2538_v1  ;;  %v2553_v58 = vpop.xlane.xlu1 %2552 }
 0x438   : > { %v3037_v50 = vmul.f32 %v6669_v24, %v2999_v42  ;;  %4476 = vrcp.f32 %v6835_v53  ;;  %v6862_v28 = vadd.f32 1e-06, %v2729_v18  ;;  %v6864_v40 = vmul.f32 0.05263158, %v2547_v39 }
 0x439   : > { %v3040_v41 = vmul.f32 %v6669_v24, %v3002_v51  ;;  %4478 = vrcp.f32 %v6848_v60  ;;  %v2717_v3 = vmul.f32 %v4469_v43, %v6793_v12  ;;  %v2721_v9 = vand.u32 2147483648, %v6793_v12  ;;  %v2550_v51 = vpop.xlane.xlu0 %2549 }
 0x43a   : > { %v3076_v34 = vadd.f32 %v6680_v20, %v3037_v50  ;;  %vm2739_vm11 = vcmp.eq.f32.partialorder %v6799_v56, inf  ;;  %4480 = vrsqrt.f32 %v6856_v10  ;;  %vm2741_vm12 = vcmp.eq.f32.partialorder %v6799_v56, 0.0 }
 0x43b   : > { %v3079_v57 = vadd.f32 %v6680_v20, %v3040_v41  ;;  %4482 = vrcp.f32 %v6862_v28  ;;  %v2742_v13 = vand.u32 2147483648, %v6799_v56  ;;  %v2719_v15 = vsel %vm2718_vm9, %v6793_v12, %v2717_v3  ;;  %v2559_v18 = vpop.xlane.xlu1 %2558 }
 0x43c   : > { %v4471_v54 = vpop.eup %4470  ;;  %3108 = vst.msk [vmem:[%s6711_s12 + $0x50] sm:$0xff] %vm2282_vm4, %v3076_v34  ;;  %vm2732_vm13 = vcmp.eq.f32.partialorder %v6809_v49, inf  ;;  %4484 = vrsqrt.f32 %v6858_v23  ;;  %vm2734_vm14 = vcmp.eq.f32.partialorder %v6809_v49, 0.0  ;;  %v2735_v5 = vand.u32 2147483648, %v6809_v49 }
 0x43d   : > { %v4473_v14 = vpop.eup %4472  ;;  %3111 = vst.msk [vmem:[%s6711_s12 + $0x68] sm:$0xff] %vm2282_vm4, %v3079_v57  ;;  %v2904_v62 = vmul.f32 %v4471_v54, %v6803_v16  ;;  %v2722_v16 = vsel %vm2720_vm10, %v2721_v9, %v2719_v15  ;;  %4486 = vrsqrt.f32 %v6864_v40  ;;  %vm2753_vm15 = vcmp.eq.f32.partialorder %v6856_v10, inf }
 0x43e   : > { %v2738_v25 = vmul.f32 %v4473_v14, %v6799_v56  ;;  %v4475_v35 = vpop.eup %4474  ;;  %v6888_v0 = vadd.f32 1e-06, %v2722_v16  ;;  %vm2755_vm0 = vcmp.eq.f32.partialorder %v6856_v10, 0.0  ;;  %v2756_v42 = vand.u32 2147483648, %v6856_v10 }
 0x43f   : > { %v2936_v19 = vsub.f32 2.0, %v2904_v62  ;;  %v2731_v32 = vmul.f32 %v4475_v35, %v6809_v49  ;;  %vm2746_vm1 = vcmp.eq.f32.partialorder %v6858_v23, inf  ;;  %v6904_v29 = vmul.f32 0.05263158, %v2544_v33 }
 0x440   : > { %v2740_v27 = vsel %vm2739_vm11, %v6799_v56, %v2738_v25  ;;  %4488 = vrcp.f32 %v6888_v0  ;;  %v6906_v1 = vmul.f32 0.05263158, %v2553_v58  ;;  %vm2748_vm2 = vcmp.eq.f32.partialorder %v6858_v23, 0.0 }
 0x441   : > { %v2968_v52 = vmul.f32 %v4471_v54, %v2936_v19  ;;  %v2743_v12 = vsel %vm2741_vm12, %v2742_v13, %v2740_v27  ;;  %v2733_v61 = vsel %vm2732_vm13, %v6809_v49, %v2731_v32  ;;  %v2749_v50 = vand.u32 2147483648, %v6858_v23 }
 0x442   : > { %v6901_v45 = vadd.f32 1e-06, %v2743_v12  ;;  %v4477_v59 = vpop.eup %4476  ;;  %v2736_v39 = vsel %vm2734_vm14, %v2735_v5, %v2733_v61  ;;  %vm2767_vm3 = vcmp.eq.f32.partialorder %v6864_v40, inf  ;;  %v6923_v34 = vmul.f32 0.05263158, %v2550_v51 }
 0x443   : > { %v3001_v56 = vmul.f32 %v2968_v52, %v6449_v17  ;;  %v2907_v30 = vmul.f32 %v4477_v59, %v6835_v53  ;;  %v4479_v41 = vpop.eup %4478  ;;  %v6920_v21 = vadd.f32 1e-06, %v2736_v39  ;;  %vm2769_vm5 = vcmp.eq.f32.partialorder %v6864_v40, 0.0 }
 0x444   : > { %4490 = vrcp.f32 %v6901_v45  ;;  %v4481_v43 = vpop.eup %4480  ;;  %v2906_v57 = vmul.f32 %v4479_v41, %v6848_v60  ;;  %v2770_v9 = vand.u32 2147483648, %v6864_v40  ;;  %v6933_v15 = vmul.f32 0.05263158, %v2559_v18 }
 0x445   : > { %v3039_v17 = vmul.f32 %v6669_v24, %v3001_v56  ;;  %4492 = vrsqrt.f32 %v6904_v29  ;;  %v2939_v53 = vsub.f32 2.0, %v2907_v30  ;;  %v4483_v49 = vpop.eup %4482  ;;  %v2752_v3 = vmul.f32 %v4481_v43, %v6856_v10 }
 0x446   : > { %4494 = vrsqrt.f32 %v6906_v1  ;;  %v4485_v33 = vpop.eup %4484  ;;  %v2938_v62 = vsub.f32 2.0, %v2906_v57  ;;  %v2909_v13 = vmul.f32 %v4483_v49, %v6862_v28  ;;  %vm2760_vm6 = vcmp.eq.f32.partialorder %v6904_v29, inf }
 0x447   : > { %v3078_v54 = vadd.f32 %v6680_v20, %v3039_v17  ;;  %4496 = vrcp.f32 %v6920_v21  ;;  %v2971_v14 = vmul.f32 %v4477_v59, %v2939_v53  ;;  %v4487_v60 = vpop.eup %4486  ;;  %v2754_v25 = vsel %vm2753_vm15, %v6856_v10, %v2752_v3 }
 0x448   : > { %v2745_v19 = vmul.f32 %v4485_v33, %v6858_v23  ;;  %v2763_v16 = vand.u32 2147483648, %v6904_v29  ;;  %4498 = vrsqrt.f32 %v6923_v34  ;;  %v2970_v28 = vmul.f32 %v4479_v41, %v2938_v62 }
 0x449   : > { %3110 = vst.msk [vmem:[%s6711_s12 + $0x60] sm:$0xff] %vm2282_vm4, %v3078_v54  ;;  %v3004_v58 = vmul.f32 %v2971_v14, %v6466_v2  ;;  %v2941_v35 = vsub.f32 2.0, %v2909_v13  ;;  %v2757_v27 = vsel %vm2755_vm0, %v2756_v42, %v2754_v25  ;;  %vm2762_vm7 = vcmp.eq.f32.partialorder %v6904_v29, 0.0 }
 0x44a   : > { %vm2781_vm8 = vcmp.eq.f32.partialorder %v6906_v1, inf  ;;  %v6949_v5 = vadd.f32 1e-06, %v2757_v27  ;;  %v2747_v52 = vsel %vm2746_vm1, %v6858_v23, %v2745_v19  ;;  %v2766_v12 = vmul.f32 %v4487_v60, %v6864_v40  ;;  %v4489_v32 = vpop.eup %4488 }
 0x44b   : > { %vm2783_vm9 = vcmp.eq.f32.partialorder %v6906_v1, 0.0  ;;  %v2784_v2 = vand.u32 2147483648, %v6906_v1  ;;  %v3042_v10 = vmul.f32 %v6669_v24, %v3004_v58  ;;  %v3003_v42 = vmul.f32 %v2970_v28, %v6461_v55 }
 0x44c   : > { %v2973_v51 = vmul.f32 %v4483_v49, %v2941_v35  ;;  %v2750_v59 = vsel %vm2748_vm2, %v2749_v50, %v2747_v52  ;;  %v2908_v56 = vmul.f32 %v4489_v32, %v6888_v0  ;;  %4500 = vrcp.f32 %v6949_v5  ;;  %v2556_v52 = vpop.xlane.xlu0 %2555 }
 0x44d   : > { %v6963_v61 = vadd.f32 1e-06, %v2750_v59  ;;  %v2768_v30 = vsel %vm2767_vm3, %v6864_v40, %v2766_v12  ;;  %v3081_v41 = vadd.f32 %v6680_v20, %v3042_v10  ;;  %v3041_v55 = vmul.f32 %v6669_v24, %v3003_v42 }
 0x44e   : > { %v4491_v39 = vpop.eup %4490  ;;  %v3006_v17 = vmul.f32 %v2973_v51, %v6478_v4  ;;  %v2771_v23 = vsel %vm2769_vm5, %v2770_v9, %v2768_v30  ;;  %v2940_v0 = vsub.f32 2.0, %v2908_v56  ;;  %vm2774_vm10 = vcmp.eq.f32.partialorder %v6923_v34, inf }
 0x44f   : > { %v4493_v50 = vpop.eup %4492  ;;  %v2911_v18 = vmul.f32 %v4491_v39, %v6901_v45  ;;  %4502 = vrcp.f32 %v6963_v61  ;;  %v2851_v43 = vadd.f32 1e-06, %v2771_v23  ;;  %3113 = vst.msk [vmem:[%s6711_s12 + $0x78] sm:$0xff] %vm2282_vm4, %v3081_v41  ;;  %v3080_v57 = vadd.f32 %v6680_v20, %v3041_v55 }
 0x450   : > { %v4495_v53 = vpop.eup %4494  ;;  %v3044_v49 = vmul.f32 %v6669_v24, %v3006_v17  ;;  %v2759_v4 = vmul.f32 %v4493_v50, %v6904_v29  ;;  %v2972_v54 = vmul.f32 %v4489_v32, %v2940_v0  ;;  %v2777_v62 = vand.u32 2147483648, %v6923_v34 }
 0x451   : > { %v4497_v40 = vpop.eup %4496  ;;  %v2943_v3 = vsub.f32 2.0, %v2911_v18  ;;  %4504 = vrcp.f32 %v2851_v43  ;;  %v2780_v45 = vmul.f32 %v4495_v53, %v6906_v1  ;;  %3112 = vst.msk [vmem:[%s6711_s12 + $0x70] sm:$0xff] %vm2282_vm4, %v3080_v57  ;;  %vm2776_vm11 = vcmp.eq.f32.partialorder %v6923_v34, 0.0 }
 0x452   : > { %v3083_v9 = vadd.f32 %v6680_v20, %v3044_v49  ;;  %v2910_v33 = vmul.f32 %v4497_v40, %v6920_v21  ;;  %v2761_v14 = vsel %vm2760_vm6, %v6904_v29, %v2759_v4  ;;  %v4499_v13 = vpop.eup %4498  ;;  %v3005_v60 = vmul.f32 %v2972_v54, %v6473_v48 }
 0x453   : > { %v2975_v25 = vmul.f32 %v4491_v39, %v2943_v3  ;;  %v2764_v19 = vsel %vm2762_vm7, %v2763_v16, %v2761_v14  ;;  %v2782_v58 = vsel %vm2781_vm8, %v6906_v1, %v2780_v45  ;;  %v2773_v27 = vmul.f32 %v4499_v13, %v6923_v34  ;;  %v2565_v1 = vpop.xlane.xlu1 %2564 }
 0x454   : > { %3115 = vst.msk [vmem:[%s6711_s12 + $0x88] sm:$0xff] %vm2282_vm4, %v3083_v9  ;;  %v2942_v21 = vsub.f32 2.0, %v2910_v33  ;;  %v2850_v28 = vadd.f32 1e-06, %v2764_v19  ;;  %v2785_v35 = vsel %vm2783_vm9, %v2784_v2, %v2782_v58  ;;  %v3043_v48 = vmul.f32 %v6669_v24, %v3005_v60 }
 0x455   : > { %v3008_v12 = vmul.f32 %v2975_v25, %v6490_v44  ;;  %v2853_v29 = vadd.f32 1e-06, %v2785_v35  ;;  %4506 = vrsqrt.f32 %v6933_v15  ;;  %v2775_v32 = vsel %vm2774_vm10, %v6923_v34, %v2773_v27 }
 0x456   : > { %v2974_v16 = vmul.f32 %v4497_v40, %v2942_v21  ;;  %4508 = vrcp.f32 %v2850_v28  ;;  %v4501_v2 = vpop.eup %4500  ;;  %v3082_v10 = vadd.f32 %v6680_v20, %v3043_v48  ;;  %v2778_v44 = vsel %vm2776_vm11, %v2777_v62, %v2775_v32 }
 0x457   : > { %v3046_v42 = vmul.f32 %v6669_v24, %v3008_v12  ;;  %4510 = vrcp.f32 %v2853_v29  ;;  %v2913_v59 = vmul.f32 %v4501_v2, %v6949_v5  ;;  %v2852_v56 = vadd.f32 1e-06, %v2778_v44  ;;  %v2571_v57 = vpop.xlane.xlu1 %2570 }
 0x458   : > { %v3007_v51 = vmul.f32 %v2974_v16, %v6485_v36  ;;  %3114 = vst.msk [vmem:[%s6711_s12 + $0x80] sm:$0xff] %vm2282_vm4, %v3082_v10  ;;  %v7015_v34 = vmul.f32 0.05263158, %v2556_v52  ;;  %v7017_v41 = vmul.f32 0.05263158, %v2565_v1  ;;  %v2562_v36 = vpop.xlane.xlu0 %2561  ;;  %vm2795_vm12 = vcmp.eq.f32.partialorder %v6933_v15, inf }
 0x459   : > { %v4503_v30 = vpop.eup %4502  ;;  %v3085_v39 = vadd.f32 %v6680_v20, %v3046_v42  ;;  %v2945_v17 = vsub.f32 2.0, %v2913_v59  ;;  %4512 = vrcp.f32 %v2852_v56  ;;  %v7029_v40 = vmul.f32 0.05263158, %v2562_v36 }
 0x45a   : > { %v3045_v55 = vmul.f32 %v6669_v24, %v3007_v51  ;;  %v2912_v23 = vmul.f32 %v4503_v30, %v6963_v61  ;;  %4514 = vrsqrt.f32 %v7015_v34  ;;  %vm2797_vm13 = vcmp.eq.f32.partialorder %v6933_v15, 0.0 }
 0x45b   : > { %v4505_v50 = vpop.eup %4504  ;;  %3117 = vst.msk [vmem:[%s6711_s12 + $0x98] sm:$0xff] %vm2282_vm4, %v3085_v39  ;;  %v2977_v0 = vmul.f32 %v4501_v2, %v2945_v17  ;;  %4516 = vrsqrt.f32 %v7017_v41  ;;  %v7033_v3 = vmul.f32 0.05263158, %v2571_v57  ;;  %v2798_v60 = vand.u32 2147483648, %v6933_v15 }
 0x45c   : > { %v3084_v5 = vadd.f32 %v6680_v20, %v3045_v55  ;;  %v2944_v18 = vsub.f32 2.0, %v2912_v23  ;;  %v2915_v53 = vmul.f32 %v4505_v50, %v2851_v43  ;;  %vm2788_vm14 = vcmp.eq.f32.partialorder %v7015_v34, inf }
 0x45d   : > { %v3010_v49 = vmul.f32 %v2977_v0, %v6502_v31  ;;  %v2568_v31 = vpop.xlane.xlu0 %2567  ;;  %4518 = vrsqrt.f32 %v7029_v40  ;;  %vm2790_vm15 = vcmp.eq.f32.partialorder %v7015_v34, 0.0  ;;  %v2791_v44 = vand.u32 2147483648, %v7015_v34 }
 0x45e   : > { %3116 = vst.msk [vmem:[%s6711_s12 + $0x90] sm:$0xff] %vm2282_vm4, %v3084_v5  ;;  %v2976_v61 = vmul.f32 %v4503_v30, %v2944_v18  ;;  %v2947_v4 = vsub.f32 2.0, %v2915_v53  ;;  %4520 = vrsqrt.f32 %v7033_v3  ;;  %vm2809_vm0 = vcmp.eq.f32.partialorder %v7017_v41, inf }
 0x45f   : > { %v4507_v54 = vpop.eup %4506  ;;  %v3048_v43 = vmul.f32 %v6669_v24, %v3010_v49  ;;  %v2812_v23 = vand.u32 2147483648, %v7017_v41  ;;  %vm2811_vm1 = vcmp.eq.f32.partialorder %v7017_v41, 0.0  ;;  %vm2802_vm2 = vcmp.eq.f32.partialorder %v7029_v40, inf }
 0x460   : > { %v4509_v45 = vpop.eup %4508  ;;  %v3009_v9 = vmul.f32 %v2976_v61, %v6497_v6  ;;  %v2979_v33 = vmul.f32 %v4505_v50, %v2947_v4  ;;  %v2794_v14 = vmul.f32 %v4507_v54, %v6933_v15  ;;  %vm2804_vm3 = vcmp.eq.f32.partialorder %v7029_v40, 0.0 }
 0x461   : > { %v4511_v62 = vpop.eup %4510  ;;  %v2914_v13 = vmul.f32 %v4509_v45, %v2850_v28  ;;  %v3087_v25 = vadd.f32 %v6680_v20, %v3048_v43  ;;  %v7048_v28 = vmul.f32 0.05263158, %v2568_v31  ;;  %vm2823_vm5 = vcmp.eq.f32.partialorder %v7033_v3, inf }
 0x462   : > { %v3047_v19 = vmul.f32 %v6669_v24, %v3009_v9  ;;  %v3012_v58 = vmul.f32 %v2979_v33, %v6514_v47  ;;  %v2917_v6 = vmul.f32 %v4511_v62, %v2853_v29  ;;  %v2796_v35 = vsel %vm2795_vm12, %v6933_v15, %v2794_v14 }
 0x463   : > { %v2946_v21 = vsub.f32 2.0, %v2914_v13  ;;  %v4513_v27 = vpop.eup %4512  ;;  %3119 = vst.msk [vmem:[%s6711_s12 + $0xa8] sm:$0xff] %vm2282_vm4, %v3087_v25  ;;  %v2799_v47 = vsel %vm2797_vm13, %v2798_v60, %v2796_v35  ;;  %v2826_v9 = vand.u32 2147483648, %v7033_v3  ;;  %vm2825_vm6 = vcmp.eq.f32.partialorder %v7033_v3, 0.0 }
 0x464   : > { %v3086_v52 = vadd.f32 %v6680_v20, %v3047_v19  ;;  %v3050_v48 = vmul.f32 %v6669_v24, %v3012_v58  ;;  %v2949_v12 = vsub.f32 2.0, %v2917_v6  ;;  %v4515_v29 = vpop.eup %4514  ;;  %v2916_v32 = vmul.f32 %v4513_v27, %v2852_v56 }
 0x465   : > { %v2978_v16 = vmul.f32 %v4509_v45, %v2946_v21  ;;  %v2855_v1 = vadd.f32 1e-06, %v2799_v47  ;;  %v2787_v42 = vmul.f32 %v4515_v29, %v7015_v34  ;;  %v4517_v51 = vpop.eup %4516  ;;  %vm2816_vm7 = vcmp.eq.f32.partialorder %v7048_v28, inf }
 0x466   : > { %3118 = vst.msk [vmem:[%s6711_s12 + $0xa0] sm:$0xff] %vm2282_vm4, %v3086_v52  ;;  %v3089_v2 = vadd.f32 %v6680_v20, %v3050_v48  ;;  %v2981_v10 = vmul.f32 %v4511_v62, %v2949_v12  ;;  %v2948_v59 = vsub.f32 2.0, %v2916_v32  ;;  %v2808_v39 = vmul.f32 %v4517_v51, %v7017_v41 }
 0x467   : > { %v3011_v15 = vmul.f32 %v2978_v16, %v6509_v26  ;;  %4522 = vrcp.f32 %v2855_v1  ;;  %v2789_v30 = vsel %vm2788_vm14, %v7015_v34, %v2787_v42  ;;  %v4519_v5 = vpop.eup %4518  ;;  %v2819_v58 = vand.u32 2147483648, %v7048_v28 }
 0x468   : > { %3121 = vst.msk [vmem:[%s6711_s12 + $0xb8] sm:$0xff] %vm2282_vm4, %v3089_v2  ;;  %v3014_v56 = vmul.f32 %v2981_v10, %v6526_v38  ;;  %4524 = vrsqrt.f32 %v7048_v28  ;;  %v2980_v17 = vmul.f32 %v4513_v27, %v2948_v59  ;;  %v2792_v26 = vsel %vm2790_vm15, %v2791_v44, %v2789_v30  ;;  %v4521_v61 = vpop.eup %4520 }
 0x469   : > { %v3049_v55 = vmul.f32 %v6669_v24, %v3011_v15  ;;  %v2854_v38 = vadd.f32 1e-06, %v2792_v26  ;;  %v2810_v50 = vsel %vm2809_vm0, %v7017_v41, %v2808_v39  ;;  %v2801_v49 = vmul.f32 %v4519_v5, %v7029_v40 }
 0x46a   : > { %v3052_v36 = vmul.f32 %v6669_v24, %v3014_v56  ;;  %v3013_v18 = vmul.f32 %v2980_v17, %v6521_v37  ;;  %v2813_v53 = vsel %vm2811_vm1, %v2812_v23, %v2810_v50  ;;  %v2805_v41 = vand.u32 2147483648, %v7029_v40 }
 0x46b   : > { %v3088_v0 = vadd.f32 %v6680_v20, %v3049_v55  ;;  %4526 = vrcp.f32 %v2854_v38  ;;  %v2857_v57 = vadd.f32 1e-06, %v2813_v53  ;;  %v2803_v37 = vsel %vm2802_vm2, %v7029_v40, %v2801_v49 }
 0x46c   : > { %v3091_v34 = vadd.f32 %v6680_v20, %v3052_v36  ;;  %v3051_v4 = vmul.f32 %v6669_v24, %v3013_v18  ;;  %v2822_v54 = vmul.f32 %v4521_v61, %v7033_v3  ;;  %v2806_v43 = vsel %vm2804_vm3, %v2805_v41, %v2803_v37  ;;  %v4536_v18 = vld [vmem:[#allocation6] ss:$0 sm:$0xff] }
 0x46d   : > { %3120 = vst.msk [vmem:[%s6711_s12 + $0xb0] sm:$0xff] %vm2282_vm4, %v3088_v0  ;;  %4528 = vrcp.f32 %v2857_v57  ;;  %v2856_v33 = vadd.f32 1e-06, %v2806_v43  ;;  %vm2818_vm8 = vcmp.eq.f32.partialorder %v7048_v28, 0.0 }
 0x46e   : > { %3123 = vst.msk [vmem:[%s6711_s12 + $0xc8] sm:$0xff] %vm2282_vm4, %v3091_v34  ;;  %v3090_v45 = vadd.f32 %v6680_v20, %v3051_v4  ;;  %v2824_v14 = vsel %vm2823_vm5, %v7033_v3, %v2822_v54 }
 0x46f   : > { %v2827_v62 = vsel %vm2825_vm6, %v2826_v9, %v2824_v14  ;;  %4530 = vrcp.f32 %v2856_v33 }
 0x470   : > { %3122 = vst.msk [vmem:[%s6711_s12 + $0xc0] sm:$0xff] %vm2282_vm4, %v3090_v45  ;;  %v2859_v60 = vadd.f32 1e-06, %v2827_v62 }
 0x471   : > { %v4523_v31 = vpop.eup %4522 }
 0x472   : > { %v4525_v13 = vpop.eup %4524  ;;  %v2919_v40 = vmul.f32 %v4523_v31, %v2855_v1  ;;  %4532 = vrcp.f32 %v2859_v60 }
 0x473   : > { %v2815_v25 = vmul.f32 %v4525_v13, %v7048_v28 }
 0x474   : > { %v2951_v19 = vsub.f32 2.0, %v2919_v40 }
 0x475   : > { %v2817_v6 = vsel %vm2816_vm7, %v7048_v28, %v2815_v25  ;;  %v4527_v3 = vpop.eup %4526 }
 0x476   : > { %v2983_v21 = vmul.f32 %v4523_v31, %v2951_v19  ;;  %v2820_v35 = vsel %vm2818_vm8, %v2819_v58, %v2817_v6  ;;  %v2918_v27 = vmul.f32 %v4527_v3, %v2854_v38 }
 0x477   : > { %v2858_v52 = vadd.f32 1e-06, %v2820_v35  ;;  %v4529_v48 = vpop.eup %4528 }
 0x478   : > { %v3016_v12 = vmul.f32 %v2983_v21, %v6538_v8  ;;  %v2950_v47 = vsub.f32 2.0, %v2918_v27  ;;  %v2921_v29 = vmul.f32 %v4529_v48, %v2857_v57 }
 0x479   : > { %4534 = vrcp.f32 %v2858_v52  ;;  %v4531_v2 = vpop.eup %4530 }
 0x47a   : > { %v3054_v16 = vmul.f32 %v6669_v24, %v3016_v12  ;;  %v2982_v32 = vmul.f32 %v4527_v3, %v2950_v47  ;;  %v2953_v1 = vsub.f32 2.0, %v2921_v29  ;;  %v2920_v44 = vmul.f32 %v4531_v2, %v2856_v33 }
 0x47c   : > { %v3093_v28 = vadd.f32 %v6680_v20, %v3054_v16  ;;  %v3015_v10 = vmul.f32 %v2982_v32, %v6533_v7  ;;  %v2985_v42 = vmul.f32 %v4529_v48, %v2953_v1  ;;  %v4533_v51 = vpop.eup %4532  ;;  %v2952_v59 = vsub.f32 2.0, %v2920_v44 }
 0x47d   : > { %v2923_v56 = vmul.f32 %v4533_v51, %v2859_v60 }
 0x47e   : > { %3125 = vst.msk [vmem:[%s6711_s12 + $0xd8] sm:$0xff] %vm2282_vm4, %v3093_v28  ;;  %v3053_v8 = vmul.f32 %v6669_v24, %v3015_v10  ;;  %v3018_v15 = vmul.f32 %v2985_v42, %v6550_v11  ;;  %v2984_v55 = vmul.f32 %v4531_v2, %v2952_v59 }
 0x47f   : > { %v2955_v17 = vsub.f32 2.0, %v2923_v56 }
 0x480   : > { %v3092_v30 = vadd.f32 %v6680_v20, %v3053_v8  ;;  %v3056_v39 = vmul.f32 %v6669_v24, %v3018_v15  ;;  %v3017_v23 = vmul.f32 %v2984_v55, %v6545_v63 }
 0x481   : > { %v2987_v36 = vmul.f32 %v4533_v51, %v2955_v17 }
 0x482   : > { %3124 = vst.msk [vmem:[%s6711_s12 + $0xd0] sm:$0xff] %vm2282_vm4, %v3092_v30  ;;  %v3095_v26 = vadd.f32 %v6680_v20, %v3056_v39  ;;  %v3055_v38 = vmul.f32 %v6669_v24, %v3017_v23 }
 0x483   : > { %v4535_v7 = vpop.eup %4534  ;;  %v3020_v50 = vmul.f32 %v2987_v36, %v6562_v46 }
 0x484   : > { %v2922_v11 = vmul.f32 %v4535_v7, %v2858_v52  ;;  %3127 = vst.msk [vmem:[%s6711_s12 + $0xe8] sm:$0xff] %vm2282_vm4, %v3095_v26  ;;  %v3094_v0 = vadd.f32 %v6680_v20, %v3055_v38 }
 0x485   : > { %v3058_v53 = vmul.f32 %v4536_v18, %v3020_v50 }
 0x486   : > { %v2954_v5 = vsub.f32 2.0, %v2922_v11  ;;  %3126 = vst.msk [vmem:[%s6711_s12 + $0xe0] sm:$0xff] %vm2282_vm4, %v3094_v0 }
 0x487   : > { %v3097_v57 = vadd.f32 %v6680_v20, %v3058_v53 }
 0x488   : > { %v2986_v34 = vmul.f32 %v4535_v7, %v2954_v5 }
 0x489   : > { %3129 = vst.msk [vmem:[%s6711_s12 + $0xf8] sm:$0xff] %vm2282_vm4, %v3097_v57 }
 0x48a   : > { %v3019_v63 = vmul.f32 %v2986_v34, %v6557_v22  ;;  %3136 = sbr.rel (!%p7297_p9) target bundleno = 1225 (0x4c9), region = 60 }
 0x48c   : > { %v3057_v49 = vmul.f32 %v4536_v18, %v3019_v63 }
 0x48e   : > { %v3096_v61 = vadd.f32 %v6680_v20, %v3057_v49 }
 0x490   : > { %3128 = vst.msk [vmem:[%s6711_s12 + $0xf0] sm:$0xff] %vm2282_vm4, %v3096_v61 }
 0x491   : > { %s7310_s25 = smov (!%p3139_p12, %s3138_s25), 32 }
 0x492   : > { %s3565_s28 = sshll.u32 %s7310_s25, 7 }
 0x493   : > { %p3568_p0 = scmp.eq.s32.totalorder %s3565_s28, 0 }
 0x494   : > { %s7146_s29 = sshrl.u32 (!%p3568_p0), %s7310_s25, 5 }
 0x495   : > { %3147 = sbr.rel (%p3568_p0) target bundleno = 1225 (0x4c9), region = 64  ;;  %p3569_p1 = scmp.le.s32.totalorder (!%p3568_p0), %s7146_s29, 0 }
 0x49c   : > { %3435 = sbr.rel (%p3569_p1) target bundleno = 1204 (0x4b4), region = 146  ;;  %s7298_s22 = smov (!%p3569_p1), %s7140_s30 }
 0x49d   : > { %s7299_s10 = smov (!%p3569_p1), %s6711_s12  ;;  %s7155_s17 = smov (!%p3569_p1), 0  }
 0x49e   : > { %s7157_s24 = smov (!%p3569_p1), 0  }
 0x4a3 LB: >> { %v3271_v22 = vld [vmem:[%s4731_s10] sm:$0xff]  ;;  %v3273_v46 = vld [vmem:[%s4731_s10 + $0x8] sm:$0xff]  ;;  %v3275_v24 = vld [vmem:[%s4731_s10 + $0x10] sm:$0xff]  ;;  %s3335_s9 = sadd.s32 1, %s4735_s17  ;;  %s3265_s24 = sadd.s32 1, %s4739_s24   ;;  %s4739_s24 = sphi %s7157_s24, %s3265_s24   ;;  %s4735_s17 = sphi %s7155_s17, %s7302_s17   ;;  %s4731_s10 = sphi %s7299_s10, %s7301_s10   ;;  %s4727_s22 = sphi %s7298_s22, %s7300_s22  }
 0x4a4   : >> { %3272 = vst [vmem:[%s4727_s22] sm:$0xff] %v3271_v22  ;;  %3274 = vst [vmem:[%s4727_s22 + $0x8] sm:$0xff] %v3273_v46  ;;  %v3277_v20 = vld [vmem:[%s4731_s10 + $0x18] sm:$0xff]  ;;  %v3279_v4 = vld [vmem:[%s4731_s10 + $0x20] sm:$0xff]  ;;  %p3336_p2 = scmp.ge.s32.totalorder %s3335_s9, %s7146_s29  ;;  %p3264_p8 = scmp.ge.s32.totalorder %s3265_s24, %s7146_s29 }
 0x4a5   : >> { %3276 = vst [vmem:[%s4727_s22 + $0x10] sm:$0xff] %v3275_v24  ;;  %v3281_v41 = vld [vmem:[%s4731_s10 + $0x28] sm:$0xff]  ;;  %3278 = vst [vmem:[%s4727_s22 + $0x18] sm:$0xff] %v3277_v20  ;;  %v3283_v37 = vld [vmem:[%s4731_s10 + $0x30] sm:$0xff] }
 0x4a6   : >> { %3280 = vst [vmem:[%s4727_s22 + $0x20] sm:$0xff] %v3279_v4  ;;  %3282 = vst [vmem:[%s4727_s22 + $0x28] sm:$0xff] %v3281_v41  ;;  %v3285_v54 = vld [vmem:[%s4731_s10 + $0x38] sm:$0xff]  ;;  %v3287_v45 = vld [vmem:[%s4731_s10 + $0x40] sm:$0xff]  ;;  %s7312_s9 = smov (%p3336_p2, %s3335_s9), 0 }
 0x4a7   : >> { %3284 = vst [vmem:[%s4727_s22 + $0x30] sm:$0xff] %v3283_v37  ;;  %3286 = vst [vmem:[%s4727_s22 + $0x38] sm:$0xff] %v3285_v54  ;;  %v3289_v43 = vld [vmem:[%s4731_s10 + $0x48] sm:$0xff]  ;;  %v3291_v9 = vld [vmem:[%s4731_s10 + $0x50] sm:$0xff]  ;;  %s3570_s21 = sshll.u32 %s7312_s9, 8  ;;  %s7302_s17 = smov %s7312_s9 }
 0x4a8   : >> { %3288 = vst [vmem:[%s4727_s22 + $0x40] sm:$0xff] %v3287_v45  ;;  %v3293_v33 = vld [vmem:[%s4731_s10 + $0x58] sm:$0xff]  ;;  %3290 = vst [vmem:[%s4727_s22 + $0x48] sm:$0xff] %v3289_v43  ;;  %v3295_v14 = vld [vmem:[%s4731_s10 + $0x60] sm:$0xff]  ;;  %s7213_s18 = scalar_lea.vmem %s6711_s12, %s3570_s21 [#allocation9]   ;;  %s3341_s13 = scalar_lea.vmem %s7140_s30, %s3570_s21  }
 0x4a9   : >> { %3292 = vst [vmem:[%s4727_s22 + $0x50] sm:$0xff] %v3291_v9  ;;  %3294 = vst [vmem:[%s4727_s22 + $0x58] sm:$0xff] %v3293_v33  ;;  %v3297_v31 = vld [vmem:[%s4731_s10 + $0x68] sm:$0xff]  ;;  %v3299_v62 = vld [vmem:[%s4731_s10 + $0x70] sm:$0xff] }
 0x4aa   : >> { %3296 = vst [vmem:[%s4727_s22 + $0x60] sm:$0xff] %v3295_v14  ;;  %3298 = vst [vmem:[%s4727_s22 + $0x68] sm:$0xff] %v3297_v31  ;;  %v3301_v13 = vld [vmem:[%s4731_s10 + $0x78] sm:$0xff]  ;;  %v3303_v40 = vld [vmem:[%s4731_s10 + $0x80] sm:$0xff] }
 0x4ab   : >> { %3300 = vst [vmem:[%s4727_s22 + $0x70] sm:$0xff] %v3299_v62  ;;  %v3305_v60 = vld [vmem:[%s4731_s10 + $0x88] sm:$0xff]  ;;  %3302 = vst [vmem:[%s4727_s22 + $0x78] sm:$0xff] %v3301_v13  ;;  %v3307_v25 = vld [vmem:[%s4731_s10 + $0x90] sm:$0xff] }
 0x4ac   : >> { %3304 = vst [vmem:[%s4727_s22 + $0x80] sm:$0xff] %v3303_v40  ;;  %3306 = vst [vmem:[%s4727_s22 + $0x88] sm:$0xff] %v3305_v60  ;;  %v3309_v19 = vld [vmem:[%s4731_s10 + $0x98] sm:$0xff]  ;;  %v3311_v58 = vld [vmem:[%s4731_s10 + $0xa0] sm:$0xff] }
 0x4ad   : >> { %3308 = vst [vmem:[%s4727_s22 + $0x90] sm:$0xff] %v3307_v25  ;;  %3310 = vst [vmem:[%s4727_s22 + $0x98] sm:$0xff] %v3309_v19  ;;  %v3313_v6 = vld [vmem:[%s4731_s10 + $0xa8] sm:$0xff]  ;;  %v3315_v3 = vld [vmem:[%s4731_s10 + $0xb0] sm:$0xff]  ;;  %3267 = sbr.rel (!%p3264_p8) target bundleno = 1187 (0x4a3), region = 152 }
 0x4ae   : >> { %3312 = vst [vmem:[%s4727_s22 + $0xa0] sm:$0xff] %v3311_v58  ;;  %v3317_v21 = vld [vmem:[%s4731_s10 + $0xb8] sm:$0xff]  ;;  %3314 = vst [vmem:[%s4727_s22 + $0xa8] sm:$0xff] %v3313_v6  ;;  %v3319_v35 = vld [vmem:[%s4731_s10 + $0xc0] sm:$0xff] }
 0x4af   : >> { %3316 = vst [vmem:[%s4727_s22 + $0xb0] sm:$0xff] %v3315_v3  ;;  %3318 = vst [vmem:[%s4727_s22 + $0xb8] sm:$0xff] %v3317_v21  ;;  %v3321_v27 = vld [vmem:[%s4731_s10 + $0xc8] sm:$0xff]  ;;  %v3323_v52 = vld [vmem:[%s4731_s10 + $0xd0] sm:$0xff] }
 0x4b0   : >> { %3320 = vst [vmem:[%s4727_s22 + $0xc0] sm:$0xff] %v3319_v35  ;;  %3322 = vst [vmem:[%s4727_s22 + $0xc8] sm:$0xff] %v3321_v27  ;;  %v3325_v48 = vld [vmem:[%s4731_s10 + $0xd8] sm:$0xff]  ;;  %v3327_v12 = vld [vmem:[%s4731_s10 + $0xe0] sm:$0xff] }
 0x4b1   : >> { %3324 = vst [vmem:[%s4727_s22 + $0xd0] sm:$0xff] %v3323_v52  ;;  %v3329_v47 = vld [vmem:[%s4731_s10 + $0xe8] sm:$0xff]  ;;  %3326 = vst [vmem:[%s4727_s22 + $0xd8] sm:$0xff] %v3325_v48  ;;  %v3331_v29 = vld [vmem:[%s4731_s10 + $0xf0] sm:$0xff] }
 0x4b2   : >> { %3328 = vst [vmem:[%s4727_s22 + $0xe0] sm:$0xff] %v3327_v12  ;;  %3330 = vst [vmem:[%s4727_s22 + $0xe8] sm:$0xff] %v3329_v47  ;;  %v3333_v16 = vld [vmem:[%s4731_s10 + $0xf8] sm:$0xff]  ;;  %s7301_s10 = smov %s7213_s18 }
 0x4b3   : >> { %3332 = vst [vmem:[%s4727_s22 + $0xf0] sm:$0xff] %v3331_v29  ;;  %3334 = vst [vmem:[%s4727_s22 + $0xf8] sm:$0xff] %v3333_v16  ;;  %s7300_s22 = smov %s3341_s13 }
 0x4b4 PF: > { %s7254_s14 = sand.u32 31, %s7310_s25   ;;  %s3581_s15 = sshll.u32 %s7146_s29, 8 }
 0x4b5   : > { %s3346_s16 = scalar_lea.vmem %s6711_s12, %s3581_s15 [#allocation9]   ;;  %s3348_s11 = scalar_lea.vmem %s7140_s30, %s3581_s15  }
 0x4b6   : > { %p3575_p4 = scmp.le.s32.totalorder %s7254_s14, 0 }
 0x4b7   : > { %s4741_s6 = smov (!%p3575_p4), %s3348_s11   ;;  %s4745_s27 = smov (!%p3575_p4), %s3346_s16  }
 0x4b8   : > { %3449 = sbr.rel (%p3575_p4) target bundleno = 1225 (0x4c9), region = 157  ;;  %s4749_s7 = smov (!%p3575_p4), 0  }
 0x4b9   : > { %s4753_s8 = smov (!%p3575_p4), 0  }
 0x4bf LB: >> { %v3358_v32 = vld [vmem:[%s4747_s27] sm:$0xff]  ;;  %s3360_s25 = sadd.s32 1, %s4751_s7  ;;  %s3352_s8 = sadd.s32 1, %s4755_s8   ;;  %s4755_s8 = sphi %s4753_s8, %s3352_s8   ;;  %s4751_s7 = sphi %s4749_s7, %s4750_s7   ;;  %s4747_s27 = sphi %s4745_s27, %s3365_s27   ;;  %s4743_s6 = sphi %s4741_s6, %s3366_s6  }
 0x4c0   : >> { %3359 = vst [vmem:[%s4743_s6] sm:$0xff] %v3358_v32  ;;  %p3361_p10 = scmp.ge.s32.totalorder %s3360_s25, %s7254_s14  ;;  %p3351_p5 = scmp.ge.s32.totalorder %s3352_s8, %s7254_s14 }
 0x4c2   : >> { %s7314_s25 = smov (%p3361_p10, %s3360_s25), 0  ;;  %3354 = sbr.rel (!%p3351_p5) target bundleno = 1215 (0x4bf), region = 163 }
 0x4c3   : >> { %s3576_s12 = sshll.u32 %s7314_s25, 3  ;;  %s4750_s7 = smov %s7314_s25  }
 0x4c4   : >> { %s3365_s27 = scalar_lea.vmem %s3346_s16, %s3576_s12 [#allocation9]   ;;  %s3366_s6 = scalar_lea.vmem %s3348_s11, %s3576_s12  }
 0x4c9 PF: > { %p17_p11 = scmp.ge.s32.totalorder %s4817_s23, 6   ;;  %s7303_s18 = smov %s4715_s19 }
 0x4ca   : > { %s7304_s19 = smov %s4719_s20  ;;  %s7305_s20 = smov %s4827_s26 }
 0x4cb   : > { %s7306_s21 = smov %s4817_s23  ;;  %19 = sbr.rel (!%p17_p11) target bundleno = 5 (0x5), region = 174 }
 0x4d2   :  { %3382 = vsyncpa [#allocation3], 1 }
 0x4d3   :  { %3384 = vsyncpa [#allocation3 + $0x1], 1 }
 0x4d4   :  { %3385 = vsyncpa [#allocation5], 1 }
 0x4d5   :  { %3386 = vsyncpa [#allocation8], 1 }

</bundles_post_ra>
